<compile_context>
chip_gen: v7x
topology: tpu7x:2x2x1
jax: 0.10.0
libtpu: 0.0.40
codegen_flags: <defaults>
</compile_context>

<pallas_src>
import functools

import jax
import jax.numpy as jnp
from jax.experimental import pallas as pl
from jax.experimental.pallas import tpu as pltpu

EPS = 1e-5
EXPANSION = 4

_CPARAMS = pltpu.CompilerParams(
    dimension_semantics=("parallel",),      # shard the row/image grid over the TCs
    vmem_limit_bytes=32 * 1024 * 1024,      # explicit scoped-VMEM budget (v7x-safe)
)

# Per-pallas_call budget used when sizing row tiles (leaves headroom for weights
# and double-buffering inside the 32 MiB scoped-VMEM limit).
_TILE_VMEM_BUDGET = 8 * 1024 * 1024


def _pick_tile_rows(m, row_bytes, cap=2048):
    """Largest multiple-of-8 divisor of m with tile_rows*row_bytes <= budget."""
    target = max(256, min(cap, _TILE_VMEM_BUDGET // max(int(row_bytes), 1)))
    target = (target // 8) * 8
    if m <= target:
        return m
    cands = [t for t in range(8, target + 1, 8) if m % t == 0]
    return max(cands) if cands else m


def _partial_stats(y):
    """Single-pass per-tile BN stats: shape (1, 2, C) = [[sum_c], [sum_sq_c]]."""
    return jnp.concatenate(
        [jnp.sum(y, axis=0, keepdims=True),
         jnp.sum(y * y, axis=0, keepdims=True)], axis=0)[None, :, :]


# ----------------------------------------------------------------------------
# Kernels
# ----------------------------------------------------------------------------
def _conv1x1_stats_kernel(x_ref, w_ref, y_ref, st_ref):
    # conv1 as matmul (bf16 x bf16 -> f32 on the MXU) + single-pass BN1 stats.
    y = jnp.dot(x_ref[...], w_ref[...], preferred_element_type=jnp.float32)
    y_ref[...] = y.astype(y_ref.dtype)
    st_ref[...] = _partial_stats(y)


def _conv3x3_deferred_bn_kernel(ph_ref, ss_ref, w_ref, y_ref, st_ref,
                                *, stride, H, W, Ho, Wo):
    # BN1+ReLU applied on the fly to the raw conv1 output, then the 3x3 conv as
    # 9 accumulated shifted-window matmuls over stride-polyphase planes.
    s = stride
    n_phase = s * s
    Hs, Ws, C1 = ph_ref.shape[1], ph_ref.shape[2], ph_ref.shape[3]
    C2 = w_ref.shape[2]
    scale = ss_ref[0:1, :]
    shift = ss_ref[1:2, :]

    # Padded-frame coordinates of each polyphase element: used to zero the pad=1
    # border *after* BN1+ReLU (matching zero-padding of the post-BN activation).
    row = jax.lax.broadcasted_iota(jnp.int32, (Hs, Ws, 1), 0)
    col = jax.lax.broadcasted_iota(jnp.int32, (Hs, Ws, 1), 1)

    planes = []
    for p in range(n_phase):
        i, j = p // s, p % s
        hval = jnp.maximum(ph_ref[p] * scale + shift, 0.0)      # BN1 + ReLU
        valid = ((row * s + i >= 1) & (row * s + i <= H) &
                 (col * s + j >= 1) & (col * s + j <= W))
        planes.append(hval * valid.astype(hval.dtype))

    acc = jnp.zeros((Ho * Wo, C2), jnp.float32)
    for t in range(9):                                          # 9 accumulated matmuls
        dh, dw = t // 3, t % 3
        p = (dh % s) * s + (dw % s)
        ro, co = dh // s, dw // s
        win = planes[p][ro:ro + Ho, co:co + Wo, :]
        acc = acc + jnp.dot(win.reshape(Ho * Wo, C1).astype(jnp.bfloat16),
                            w_ref[t], preferred_element_type=jnp.float32)
    y_ref[...] = acc.astype(y_ref.dtype)
    st_ref[...] = _partial_stats(acc)


def _conv1x1_deferred_bn_kernel(y_in_ref, ss_ref, w_ref, y_ref, st_ref):
    # BN2+ReLU on the fly, then conv3 as matmul + single-pass BN3 stats.
    h = jnp.maximum(y_in_ref[...] * ss_ref[0:1, :] + ss_ref[1:2, :], 0.0)
    y = jnp.dot(h.astype(jnp.bfloat16), w_ref[...], preferred_element_type=jnp.float32)
    y_ref[...] = y.astype(y_ref.dtype)
    st_ref[...] = _partial_stats(y)


def _conv3_plus_downsample_kernel(y2_ref, ss2_ref, w3_ref, xi_ref, wd_ref,
                                  y3_ref, st3_ref, yd_ref, std_ref):
    # Fused: conv3 (with BN2+ReLU on the fly) and the downsample 1x1 conv share
    # one pipelined pallas_call (removes one kernel launch + HBM round trip).
    h2 = jnp.maximum(y2_ref[...] * ss2_ref[0:1, :] + ss2_ref[1:2, :], 0.0)
    y3 = jnp.dot(h2.astype(jnp.bfloat16), w3_ref[...], preferred_element_type=jnp.float32)
    y3_ref[...] = y3.astype(y3_ref.dtype)
    st3_ref[...] = _partial_stats(y3)
    yd = jnp.dot(xi_ref[...], wd_ref[...], preferred_element_type=jnp.float32)
    yd_ref[...] = yd.astype(yd_ref.dtype)
    std_ref[...] = _partial_stats(yd)


def _bn_bn_add_relu_kernel(y3_ref, ss3_ref, yd_ref, ssd_ref, o_ref):
    a = y3_ref[...] * ss3_ref[0:1, :] + ss3_ref[1:2, :]
    b = yd_ref[...] * ssd_ref[0:1, :] + ssd_ref[1:2, :]
    o_ref[...] = jnp.maximum(a + b, 0.0).astype(o_ref.dtype)


def _bn_add_relu_kernel(y3_ref, ss3_ref, id_ref, o_ref):
    a = y3_ref[...] * ss3_ref[0:1, :] + ss3_ref[1:2, :]
    o_ref[...] = jnp.maximum(a + id_ref[...], 0.0).astype(o_ref.dtype)


# ----------------------------------------------------------------------------
# pallas_call wrappers (row-tiled, "parallel" grid)
# ----------------------------------------------------------------------------
def conv1x1_with_stats(x2d, w_mat):
    m, k = x2d.shape
    c = w_mat.shape[1]
    tm = _pick_tile_rows(m, 2 * (2 * k + 4 * c))
    nt = m // tm
    return pl.pallas_call(
        _conv1x1_stats_kernel,
        grid=(nt,),
        in_specs=(pl.BlockSpec((tm, k), lambda i: (i, 0)),
                  pl.BlockSpec((k, c), lambda i: (0, 0))),
        out_specs=(pl.BlockSpec((tm, c), lambda i: (i, 0)),
                   pl.BlockSpec((1, 2, c), lambda i: (i, 0, 0))),
        out_shape=(jax.ShapeDtypeStruct((m, c), jnp.float32),
                   jax.ShapeDtypeStruct((nt, 2, c), jnp.float32)),
        compiler_params=_CPARAMS,
    )(x2d, w_mat)


def conv3x3_deferred_bn(y1_flat, ss1, w2_taps, n, h, w, stride):
    c1 = y1_flat.shape[1]
    c2 = w2_taps.shape[2]
    s = stride
    ho = (h - 1) // s + 1
    wo = (w - 1) // s + 1
    n_phase = s * s
    hpp = -(-(h + 2) // s) * s
    wpp = -(-(w + 2) // s) * s
    hs, ws = hpp // s, wpp // s

    # Re-organise the raw conv1 output into stride-polyphase planes of the padded
    # frame (same total bytes as the input -- no 9x im2col tensor in HBM).
    y1n = y1_flat.reshape(n, h, w, c1)
    xp = jnp.pad(y1n, ((0, 0), (1, hpp - h - 1), (1, wpp - w - 1), (0, 0)))
    ph = xp.reshape(n, hs, s, ws, s, c1).transpose(0, 2, 4, 1, 3, 5)
    ph = ph.reshape(n * n_phase, hs, ws, c1)

    kernel = functools.partial(_conv3x3_deferred_bn_kernel,
                               stride=s, H=h, W=w, Ho=ho, Wo=wo)
    y2, st2 = pl.pallas_call(
        kernel,
        grid=(n,),
        in_specs=(pl.BlockSpec((n_phase, hs, ws, c1), lambda i: (i, 0, 0, 0)),
                  pl.BlockSpec((2, c1), lambda i: (0, 0)),
                  pl.BlockSpec((9, c1, c2), lambda i: (0, 0, 0))),
        out_specs=(pl.BlockSpec((ho * wo, c2), lambda i: (i, 0)),
                   pl.BlockSpec((1, 2, c2), lambda i: (i, 0, 0))),
        out_shape=(jax.ShapeDtypeStruct((n * ho * wo, c2), jnp.bfloat16),
                   jax.ShapeDtypeStruct((n, 2, c2), jnp.float32)),
        compiler_params=_CPARAMS,
    )(ph, ss1, w2_taps)
    return y2, st2, ho, wo


def conv3_and_downsample(y2, ss2, w3, xi, wd):
    m, c2 = y2.shape
    c3 = w3.shape[1]
    cin = xi.shape[1]
    tm = _pick_tile_rows(m, 2 * (2 * c2 + 2 * cin + 2 * c3 + 2 * c3))
    nt = m // tm
    return pl.pallas_call(
        _conv3_plus_downsample_kernel,
        grid=(nt,),
        in_specs=(pl.BlockSpec((tm, c2), lambda i: (i, 0)),
                  pl.BlockSpec((2, c2), lambda i: (0, 0)),
                  pl.BlockSpec((c2, c3), lambda i: (0, 0)),
                  pl.BlockSpec((tm, cin), lambda i: (i, 0)),
                  pl.BlockSpec((cin, c3), lambda i: (0, 0))),
        out_specs=(pl.BlockSpec((tm, c3), lambda i: (i, 0)),
                   pl.BlockSpec((1, 2, c3), lambda i: (i, 0, 0)),
                   pl.BlockSpec((tm, c3), lambda i: (i, 0)),
                   pl.BlockSpec((1, 2, c3), lambda i: (i, 0, 0))),
        out_shape=(jax.ShapeDtypeStruct((m, c3), jnp.bfloat16),
                   jax.ShapeDtypeStruct((nt, 2, c3), jnp.float32),
                   jax.ShapeDtypeStruct((m, c3), jnp.bfloat16),
                   jax.ShapeDtypeStruct((nt, 2, c3), jnp.float32)),
        compiler_params=_CPARAMS,
    )(y2, ss2, w3, xi, wd)


def conv3_only(y2, ss2, w3):
    m, c2 = y2.shape
    c3 = w3.shape[1]
    tm = _pick_tile_rows(m, 2 * (2 * c2 + 2 * c3))
    nt = m // tm
    return pl.pallas_call(
        _conv1x1_deferred_bn_kernel,
        grid=(nt,),
        in_specs=(pl.BlockSpec((tm, c2), lambda i: (i, 0)),
                  pl.BlockSpec((2, c2), lambda i: (0, 0)),
                  pl.BlockSpec((c2, c3), lambda i: (0, 0))),
        out_specs=(pl.BlockSpec((tm, c3), lambda i: (i, 0)),
                   pl.BlockSpec((1, 2, c3), lambda i: (i, 0, 0))),
        out_shape=(jax.ShapeDtypeStruct((m, c3), jnp.bfloat16),
                   jax.ShapeDtypeStruct((nt, 2, c3), jnp.float32)),
        compiler_params=_CPARAMS,
    )(y2, ss2, w3)


def bn_bn_add_relu(y3, ss3, yd, ssd):
    m, c3 = y3.shape
    tm = _pick_tile_rows(m, 2 * (2 * c3 + 2 * c3 + 4 * c3))
    nt = m // tm
    return pl.pallas_call(
        _bn_bn_add_relu_kernel,
        grid=(nt,),
        in_specs=(pl.BlockSpec((tm, c3), lambda i: (i, 0)),
                  pl.BlockSpec((2, c3), lambda i: (0, 0)),
                  pl.BlockSpec((tm, c3), lambda i: (i, 0)),
                  pl.BlockSpec((2, c3), lambda i: (0, 0))),
        out_specs=pl.BlockSpec((tm, c3), lambda i: (i, 0)),
        out_shape=jax.ShapeDtypeStruct((m, c3), jnp.float32),
        compiler_params=_CPARAMS,
    )(y3, ss3, yd, ssd)


def bn_add_relu(y3, ss3, identity):
    m, c3 = y3.shape
    tm = _pick_tile_rows(m, 2 * (2 * c3 + 4 * c3 + 4 * c3))
    nt = m // tm
    return pl.pallas_call(
        _bn_add_relu_kernel,
        grid=(nt,),
        in_specs=(pl.BlockSpec((tm, c3), lambda i: (i, 0)),
                  pl.BlockSpec((2, c3), lambda i: (0, 0)),
                  pl.BlockSpec((tm, c3), lambda i: (i, 0))),
        out_specs=pl.BlockSpec((tm, c3), lambda i: (i, 0)),
        out_shape=jax.ShapeDtypeStruct((m, c3), jnp.float32),
        compiler_params=_CPARAMS,
    )(y3, ss3, identity)


# ----------------------------------------------------------------------------
# O(C) plain-JAX glue: cross-tile stat reduction + BN fold into scale/shift.
# ----------------------------------------------------------------------------
def fold_bn(partial_stats, count, gamma, beta, eps=EPS):
    tot = jnp.sum(partial_stats, axis=0)                   # (2, C)
    mean = tot[0] / count
    var = jnp.maximum(tot[1] / count - mean * mean, 0.0)   # biased (training-mode) var
    scale = gamma * jax.lax.rsqrt(var + eps)
    shift = beta - mean * scale
    return jnp.stack([scale, shift], axis=0).astype(jnp.float32)   # packed (2, C)


# ----------------------------------------------------------------------------
# BottleNeck forward (NCHW in, NCHW out — same as the PyTorch module).
# ----------------------------------------------------------------------------
def bottleneck_forward(x_nchw, params, *, stride, is_first_block, eps=EPS):
    n, cin, h, w = x_nchw.shape
    x = jnp.transpose(x_nchw, (0, 2, 3, 1)).astype(jnp.float32)    # NHWC
    x_bf = x.astype(jnp.bfloat16)

    w1 = params["w1"].reshape(cin, -1).astype(jnp.bfloat16)        # (Cin, C1)
    c1 = w1.shape[1]
    w2 = params["w2"].reshape(9, c1, -1).astype(jnp.bfloat16)      # (9, C1, C2)
    c2 = w2.shape[2]
    w3 = params["w3"].reshape(c2, -1).astype(jnp.bfloat16)         # (C2, C3)
    c3 = w3.shape[1]

    m0 = n * h * w

    # conv1 (1x1): raw output + single-pass BN1 partial stats
    y1, st1 = conv1x1_with_stats(x_bf.reshape(m0, cin), w1)
    ss1 = fold_bn(st1, m0, params["g1"], params["beta1"], eps)

    # conv2 (3x3, stride, pad=1); BN1 + ReLU applied on the fly inside the kernel
    y2, st2, ho, wo = conv3x3_deferred_bn(y1, ss1, w2, n, h, w, stride)
    m1 = n * ho * wo
    ss2 = fold_bn(st2, m1, params["g2"], params["beta2"], eps)

    if is_first_block:
        wd = params["wd"].reshape(cin, c3).astype(jnp.bfloat16)
        # TODO(synk): feed this strided identity window through a BlockSpec /
        # pl.ds(stride=...) window instead of materialising the slice in XLA.
        xi = x_bf[:, ::stride, ::stride, :].reshape(m1, cin)
        y3, st3, yd, std_ = conv3_and_downsample(y2, ss2, w3, xi, wd)
        ss3 = fold_bn(st3, m1, params["g3"], params["beta3"], eps)
        ssd = fold_bn(std_, m1, params["gd"], params["betad"], eps)
        out = bn_bn_add_relu(y3, ss3, yd, ssd)
    else:
        # identity path: requires stride == 1 and cin == c3 (as in the PyTorch module)
        y3, st3 = conv3_only(y2, ss2, w3)
        ss3 = fold_bn(st3, m1, params["g3"], params["beta3"], eps)
        out = bn_add_relu(y3, ss3, x.reshape(m0, cin))

    out = out.reshape(n, ho, wo, c3)
    return jnp.transpose(out, (0, 3, 1, 2))                        # back to NCHW


# ----------------------------------------------------------------------------
# Deterministic synthetic parameters (HWIO conv weights, BN affine params).
# NOTE: the PyTorch convs carry biases, but every conv here is immediately
# followed by BatchNorm whose mean subtraction cancels a per-channel constant
# exactly, so biases are provably output-irrelevant and omitted.
# ----------------------------------------------------------------------------
def init_params(key, in_channels, out_channels, is_first_block):
    c1 = out_channels
    c2 = out_channels
    c3 = out_channels * EXPANSION
    keys = jax.random.split(key, 8)

    def conv_w(k, kh, kw, cin, cout):
        return 0.1 * jax.random.normal(k, (kh, kw, cin, cout), jnp.float32)  # HWIO

    def bn_p(k, c):
        g = 1.0 + 0.1 * jax.random.normal(k, (c,), jnp.float32)
        b = 0.1 * jax.random.normal(jax.random.fold_in(k, 1), (c,), jnp.float32)
        return g, b

    p = {}
    p["w1"] = conv_w(keys[0], 1, 1, in_channels, c1)
    p["g1"], p["beta1"] = bn_p(keys[1], c1)
    p["w2"] = conv_w(keys[2], 3, 3, c1, c2)
    p["g2"], p["beta2"] = bn_p(keys[3], c2)
    p["w3"] = conv_w(keys[4], 1, 1, c2, c3)
    p["g3"], p["beta3"] = bn_p(keys[5], c3)
    if is_first_block:
        p["wd"] = conv_w(keys[6], 1, 1, in_channels, c3)
        p["gd"], p["betad"] = bn_p(keys[7], c3)
    return p


# ----------------------------------------------------------------------------
# Pure-JAX reference (same math: bf16 conv operands, f32 accumulation,
# training-mode BatchNorm) used only for a tolerance check in __main__.
# ----------------------------------------------------------------------------
def bottleneck_reference(x_nchw, params, *, stride, is_first_block, eps=EPS):
    x = jnp.transpose(x_nchw, (0, 2, 3, 1)).astype(jnp.float32)

    def conv(y, w_hwio, s, pad):
        return jax.lax.conv_general_dilated(
            y.astype(jnp.bfloat16), w_hwio.astype(jnp.bfloat16),
            window_strides=(s, s), padding=[(pad, pad), (pad, pad)],
            dimension_numbers=("NHWC", "HWIO", "NHWC"),
            preferred_element_type=jnp.float32)

    def bn(y, g, b):
        mean = jnp.mean(y, axis=(0, 1, 2))
        var = jnp.mean(jnp.square(y - mean), axis=(0, 1, 2))
        return (y - mean) * jax.lax.rsqrt(var + eps) * g + b

    h = jax.nn.relu(bn(conv(x, params["w1"], 1, 0), params["g1"], params["beta1"]))
    h = jax.nn.relu(bn(conv(h, params["w2"], stride, 1), params["g2"], params["beta2"]))
    h = bn(conv(h, params["w3"], 1, 0), params["g3"], params["beta3"])
    if is_first_block:
        idn = bn(conv(x, params["wd"], stride, 0), params["gd"], params["betad"])
    else:
        idn = x
    return jnp.transpose(jax.nn.relu(h + idn), (0, 3, 1, 2))


if __name__ == "__main__":
    key = jax.random.PRNGKey(0)
    kx, kp = jax.random.split(key)

    N, Cin, H, W = 2, 16, 16, 16
    out_channels, stride, is_first_block = 8, 2, True

    x = jax.random.normal(kx, (N, Cin, H, W), jnp.float32)
    params = init_params(kp, Cin, out_channels, is_first_block)

    fwd = jax.jit(functools.partial(
        bottleneck_forward, stride=stride, is_first_block=is_first_block))
    y = jax.block_until_ready(fwd(x, params))

    assert y.shape == (N, out_channels * EXPANSION, H // stride, W // stride), y.shape
    assert bool(jnp.all(jnp.isfinite(y)))
    assert bool(jnp.all(y >= 0.0))                       # post-ReLU

    y_ref = bottleneck_reference(x, params, stride=stride,
                                 is_first_block=is_first_block)
    assert bool(jnp.allclose(y, y_ref, atol=5e-2, rtol=5e-2)), \
        float(jnp.max(jnp.abs(y - y_ref)))

    print("KERNEL_OK")
</pallas_src>

<mosaic_0001>
module attributes {stable_mosaic.version = 11 : i64} {
  func.func @_conv1x1_stats_kernel(%arg0: i32, %arg1: memref<512x16xbf16, #tpu.memory_space<vmem>>, %arg2: memref<16x8xbf16, #tpu.memory_space<vmem>>, %arg3: memref<512x8xf32, #tpu.memory_space<vmem>>, %arg4: memref<1x2x8xf32, #tpu.memory_space<vmem>>) attributes {dimension_semantics = [#tpu.dimension_semantics<parallel>], iteration_bounds = array<i64: 1>, scalar_prefetch = 0 : i64, scratch_operands = 0 : i64, tpu.core_type = #tpu.core_type<tc>, window_params = [{transform_indices = @transform_0, window_bounds = array<i64: 512, 16>}, {pipeline_mode = #tpu.pipeline_mode<synchronous>, transform_indices = @transform_1, window_bounds = array<i64: 16, 8>}, {transform_indices = @transform_2, window_bounds = array<i64: 512, 8>}, {transform_indices = @transform_3, window_bounds = array<i64: 1, 2, 8>}]} {
    %c0 = arith.constant 0 : index
    %c0_0 = arith.constant 0 : index
    %0 = vector.load %arg1[%c0, %c0_0] : memref<512x16xbf16, #tpu.memory_space<vmem>>, vector<512x16xbf16>
    %c0_1 = arith.constant 0 : index
    %c0_2 = arith.constant 0 : index
    %1 = vector.load %arg2[%c0_1, %c0_2] : memref<16x8xbf16, #tpu.memory_space<vmem>>, vector<16x8xbf16>
    %cst = arith.constant dense<0.000000e+00> : vector<512x8xf32>
    %2 = tpu.matmul %0, %1, %cst {dimension_numbers = #tpu.dot_dimension_numbers<[1], [0], [0], [1], [0, 0, 1, 1], [], []>} : vector<512x16xbf16>, vector<16x8xbf16>, vector<512x8xf32> -> vector<512x8xf32>
    %c0_3 = arith.constant 0 : index
    %c0_4 = arith.constant 0 : index
    %3 = vector.load %arg3[%c0_3, %c0_4] : memref<512x8xf32, #tpu.memory_space<vmem>>, vector<512x8xf32>
    tpu.vector_store %arg3[%c0_3, %c0_4], %2 {strides = array<i32>} : memref<512x8xf32, #tpu.memory_space<vmem>>, vector<512x8xf32>,
    %cst_5 = arith.constant dense<0.000000e+00> : vector<8xf32>
    %4 = vector.multi_reduction <add>, %2, %cst_5 [0] : vector<512x8xf32> to vector<8xf32>
    %5 = vector.shape_cast %4 : vector<8xf32> to vector<1x8xf32>
    %6 = arith.mulf %2, %2 : vector<512x8xf32>
    %cst_6 = arith.constant dense<0.000000e+00> : vector<8xf32>
    %7 = vector.multi_reduction <add>, %6, %cst_6 [0] : vector<512x8xf32> to vector<8xf32>
    %8 = vector.shape_cast %7 : vector<8xf32> to vector<1x8xf32>
    %9 = tpu.concatenate %5, %8 in 0 : vector<1x8xf32>, vector<1x8xf32> -> vector<2x8xf32>
    %10 = vector.shape_cast %9 : vector<2x8xf32> to vector<1x2x8xf32>
    %c0_7 = arith.constant 0 : index
    %c0_8 = arith.constant 0 : index
    %c0_9 = arith.constant 0 : index
    %11 = vector.load %arg4[%c0_7, %c0_8, %c0_9] : memref<1x2x8xf32, #tpu.memory_space<vmem>>, vector<1x2x8xf32>
    tpu.vector_store %arg4[%c0_7, %c0_8, %c0_9], %10 {strides = array<i32>} : memref<1x2x8xf32, #tpu.memory_space<vmem>>, vector<1x2x8xf32>,
    return
  }
  func.func @transform_0(%arg0: i32) -> (i32, i32) {
    %c0_i32 = arith.constant 0 : i32
    %c0_i32_0 = arith.constant 0 : i32
    return %arg0, %c0_i32 : i32, i32
  }
  func.func @transform_1(%arg0: i32) -> (i32, i32) {
    %c0_i32 = arith.constant 0 : i32
    %c0_i32_0 = arith.constant 0 : i32
    %c0_i32_1 = arith.constant 0 : i32
    return %c0_i32, %c0_i32_0 : i32, i32
  }
  func.func @transform_2(%arg0: i32) -> (i32, i32) {
    %c0_i32 = arith.constant 0 : i32
    %c0_i32_0 = arith.constant 0 : i32
    return %arg0, %c0_i32 : i32, i32
  }
  func.func @transform_3(%arg0: i32) -> (i32, i32, i32) {
    %c0_i32 = arith.constant 0 : i32
    %c0_i32_0 = arith.constant 0 : i32
    %c0_i32_1 = arith.constant 0 : i32
    return %arg0, %c0_i32, %c0_i32_0 : i32, i32, i32
  }
}

module attributes {stable_mosaic.version = 11 : i64} {
  func.func @_conv3x3_deferred_bn_kernel(%arg0: i32, %arg1: memref<4x9x9x8xf32, #tpu.memory_space<vmem>>, %arg2: memref<2x8xf32, #tpu.memory_space<vmem>>, %arg3: memref<9x8x8xbf16, #tpu.memory_space<vmem>>, %arg4: memref<64x8xbf16, #tpu.memory_space<vmem>>, %arg5: memref<1x2x8xf32, #tpu.memory_space<vmem>>) attributes {dimension_semantics = [#tpu.dimension_semantics<parallel>], iteration_bounds = array<i64: 2>, scalar_prefetch = 0 : i64, scratch_operands = 0 : i64, tpu.core_type = #tpu.core_type<tc>, window_params = [{transform_indices = @transform_0, window_bounds = array<i64: 4, 9, 9, 8>}, {pipeline_mode = #tpu.pipeline_mode<synchronous>, transform_indices = @transform_1, window_bounds = array<i64: 2, 8>}, {pipeline_mode = #tpu.pipeline_mode<synchronous>, transform_indices = @transform_2, window_bounds = array<i64: 9, 8, 8>}, {transform_indices = @transform_3, window_bounds = array<i64: 64, 8>}, {transform_indices = @transform_4, window_bounds = array<i64: 1, 2, 8>}]} {
    %c0 = arith.constant 0 : index
    %c0_0 = arith.constant 0 : index
    %0 = vector.load %arg2[%c0, %c0_0] : memref<2x8xf32, #tpu.memory_space<vmem>>, vector<1x8xf32>
    %c1 = arith.constant 1 : index
    %c0_1 = arith.constant 0 : index
    %1 = vector.load %arg2[%c1, %c0_1] : memref<2x8xf32, #tpu.memory_space<vmem>>, vector<1x8xf32>
    %2 = tpu.iota {dimensions = array<i32: 0>} : vector<9x9x1xi32>
    %3 = tpu.iota {dimensions = array<i32: 1>} : vector<9x9x1xi32>
    %c0_2 = arith.constant 0 : index
    %c0_3 = arith.constant 0 : index
    %c0_4 = arith.constant 0 : index
    %c0_5 = arith.constant 0 : index
    %4 = vector.load %arg1[%c0_2, %c0_3, %c0_4, %c0_5] : memref<4x9x9x8xf32, #tpu.memory_space<vmem>>, vector<1x9x9x8xf32>
    %5 = vector.shape_cast %4 : vector<1x9x9x8xf32> to vector<9x9x8xf32>
    %6 = vector.shape_cast %0 : vector<1x8xf32> to vector<1x1x8xf32>
    %7 = vector.broadcast %6 : vector<1x1x8xf32> to vector<9x9x8xf32>
    %8 = arith.mulf %5, %7 : vector<9x9x8xf32>
    %9 = vector.shape_cast %1 : vector<1x8xf32> to vector<1x1x8xf32>
    %10 = vector.broadcast %9 : vector<1x1x8xf32> to vector<9x9x8xf32>
    %11 = arith.addf %8, %10 : vector<9x9x8xf32>
    %cst = arith.constant 0.000000e+00 : f32
    %12 = vector.broadcast %cst : f32 to vector<9x9x8xf32>
    %13 = arith.maximumf %11, %12 : vector<9x9x8xf32>
    %c2_i32 = arith.constant 2 : i32
    %14 = vector.broadcast %c2_i32 : i32 to vector<9x9x1xi32>
    %15 = arith.muli %2, %14 : vector<9x9x1xi32>
    %c0_i32 = arith.constant 0 : i32
    %16 = vector.broadcast %c0_i32 : i32 to vector<9x9x1xi32>
    %17 = arith.addi %15, %16 : vector<9x9x1xi32>
    %c1_i32 = arith.constant 1 : i32
    %18 = vector.broadcast %c1_i32 : i32 to vector<9x9x1xi32>
    %19 = arith.cmpi sge, %17, %18 : vector<9x9x1xi32>
    %c2_i32_6 = arith.constant 2 : i32
    %20 = vector.broadcast %c2_i32_6 : i32 to vector<9x9x1xi32>
    %21 = arith.muli %2, %20 : vector<9x9x1xi32>
    %c0_i32_7 = arith.constant 0 : i32
    %22 = vector.broadcast %c0_i32_7 : i32 to vector<9x9x1xi32>
    %23 = arith.addi %21, %22 : vector<9x9x1xi32>
    %c16_i32 = arith.constant 16 : i32
    %24 = vector.broadcast %c16_i32 : i32 to vector<9x9x1xi32>
    %25 = arith.cmpi sle, %23, %24 : vector<9x9x1xi32>
    %26 = arith.andi %19, %25 : vector<9x9x1xi1>
    %c2_i32_8 = arith.constant 2 : i32
    %27 = vector.broadcast %c2_i32_8 : i32 to vector<9x9x1xi32>
    %28 = arith.muli %3, %27 : vector<9x9x1xi32>
    %c0_i32_9 = arith.constant 0 : i32
    %29 = vector.broadcast %c0_i32_9 : i32 to vector<9x9x1xi32>
    %30 = arith.addi %28, %29 : vector<9x9x1xi32>
    %c1_i32_10 = arith.constant 1 : i32
    %31 = vector.broadcast %c1_i32_10 : i32 to vector<9x9x1xi32>
    %32 = arith.cmpi sge, %30, %31 : vector<9x9x1xi32>
    %33 = arith.andi %26, %32 : vector<9x9x1xi1>
    %c2_i32_11 = arith.constant 2 : i32
    %34 = vector.broadcast %c2_i32_11 : i32 to vector<9x9x1xi32>
    %35 = arith.muli %3, %34 : vector<9x9x1xi32>
    %c0_i32_12 = arith.constant 0 : i32
    %36 = vector.broadcast %c0_i32_12 : i32 to vector<9x9x1xi32>
    %37 = arith.addi %35, %36 : vector<9x9x1xi32>
    %c16_i32_13 = arith.constant 16 : i32
    %38 = vector.broadcast %c16_i32_13 : i32 to vector<9x9x1xi32>
    %39 = arith.cmpi sle, %37, %38 : vector<9x9x1xi32>
    %40 = arith.andi %33, %39 : vector<9x9x1xi1>
    %41 = arith.extui %40 : vector<9x9x1xi1> to vector<9x9x1xi32>
    %42 = arith.sitofp %41 : vector<9x9x1xi32> to vector<9x9x1xf32>
    %43 = vector.broadcast %42 : vector<9x9x1xf32> to vector<9x9x8xf32>
    %44 = arith.mulf %13, %43 : vector<9x9x8xf32>
    %c1_14 = arith.constant 1 : index
    %c0_15 = arith.constant 0 : index
    %c0_16 = arith.constant 0 : index
    %c0_17 = arith.constant 0 : index
    %45 = vector.load %arg1[%c1_14, %c0_15, %c0_16, %c0_17] : memref<4x9x9x8xf32, #tpu.memory_space<vmem>>, vector<1x9x9x8xf32>
    %46 = vector.shape_cast %45 : vector<1x9x9x8xf32> to vector<9x9x8xf32>
    %47 = vector.shape_cast %0 : vector<1x8xf32> to vector<1x1x8xf32>
    %48 = vector.broadcast %47 : vector<1x1x8xf32> to vector<9x9x8xf32>
    %49 = arith.mulf %46, %48 : vector<9x9x8xf32>
    %50 = vector.shape_cast %1 : vector<1x8xf32> to vector<1x1x8xf32>
    %51 = vector.broadcast %50 : vector<1x1x8xf32> to vector<9x9x8xf32>
    %52 = arith.addf %49, %51 : vector<9x9x8xf32>
    %cst_18 = arith.constant 0.000000e+00 : f32
    %53 = vector.broadcast %cst_18 : f32 to vector<9x9x8xf32>
    %54 = arith.maximumf %52, %53 : vector<9x9x8xf32>
    %c2_i32_19 = arith.constant 2 : i32
    %55 = vector.broadcast %c2_i32_19 : i32 to vector<9x9x1xi32>
    %56 = arith.muli %2, %55 : vector<9x9x1xi32>
    %c0_i32_20 = arith.constant 0 : i32
    %57 = vector.broadcast %c0_i32_20 : i32 to vector<9x9x1xi32>
    %58 = arith.addi %56, %57 : vector<9x9x1xi32>
    %c1_i32_21 = arith.constant 1 : i32
    %59 = vector.broadcast %c1_i32_21 : i32 to vector<9x9x1xi32>
    %60 = arith.cmpi sge, %58, %59 : vector<9x9x1xi32>
    %c2_i32_22 = arith.constant 2 : i32
    %61 = vector.broadcast %c2_i32_22 : i32 to vector<9x9x1xi32>
    %62 = arith.muli %2, %61 : vector<9x9x1xi32>
    %c0_i32_23 = arith.constant 0 : i32
    %63 = vector.broadcast %c0_i32_23 : i32 to vector<9x9x1xi32>
    %64 = arith.addi %62, %63 : vector<9x9x1xi32>
    %c16_i32_24 = arith.constant 16 : i32
    %65 = vector.broadcast %c16_i32_24 : i32 to vector<9x9x1xi32>
    %66 = arith.cmpi sle, %64, %65 : vector<9x9x1xi32>
    %67 = arith.andi %60, %66 : vector<9x9x1xi1>
    %c2_i32_25 = arith.constant 2 : i32
    %68 = vector.broadcast %c2_i32_25 : i32 to vector<9x9x1xi32>
    %69 = arith.muli %3, %68 : vector<9x9x1xi32>
    %c1_i32_26 = arith.constant 1 : i32
    %70 = vector.broadcast %c1_i32_26 : i32 to vector<9x9x1xi32>
    %71 = arith.addi %69, %70 : vector<9x9x1xi32>
    %c1_i32_27 = arith.constant 1 : i32
    %72 = vector.broadcast %c1_i32_27 : i32 to vector<9x9x1xi32>
    %73 = arith.cmpi sge, %71, %72 : vector<9x9x1xi32>
    %74 = arith.andi %67, %73 : vector<9x9x1xi1>
    %c2_i32_28 = arith.constant 2 : i32
    %75 = vector.broadcast %c2_i32_28 : i32 to vector<9x9x1xi32>
    %76 = arith.muli %3, %75 : vector<9x9x1xi32>
    %c1_i32_29 = arith.constant 1 : i32
    %77 = vector.broadcast %c1_i32_29 : i32 to vector<9x9x1xi32>
    %78 = arith.addi %76, %77 : vector<9x9x1xi32>
    %c16_i32_30 = arith.constant 16 : i32
    %79 = vector.broadcast %c16_i32_30 : i32 to vector<9x9x1xi32>
    %80 = arith.cmpi sle, %78, %79 : vector<9x9x1xi32>
    %81 = arith.andi %74, %80 : vector<9x9x1xi1>
    %82 = arith.extui %81 : vector<9x9x1xi1> to vector<9x9x1xi32>
    %83 = arith.sitofp %82 : vector<9x9x1xi32> to vector<9x9x1xf32>
    %84 = vector.broadcast %83 : vector<9x9x1xf32> to vector<9x9x8xf32>
    %85 = arith.mulf %54, %84 : vector<9x9x8xf32>
    %c2 = arith.constant 2 : index
    %c0_31 = arith.constant 0 : index
    %c0_32 = arith.constant 0 : index
    %c0_33 = arith.constant 0 : index
    %86 = vector.load %arg1[%c2, %c0_31, %c0_32, %c0_33] : memref<4x9x9x8xf32, #tpu.memory_space<vmem>>, vector<1x9x9x8xf32>
    %87 = vector.shape_cast %86 : vector<1x9x9x8xf32> to vector<9x9x8xf32>
    %88 = vector.shape_cast %0 : vector<1x8xf32> to vector<1x1x8xf32>
    %89 = vector.broadcast %88 : vector<1x1x8xf32> to vector<9x9x8xf32>
    %90 = arith.mulf %87, %89 : vector<9x9x8xf32>
    %91 = vector.shape_cast %1 : vector<1x8xf32> to vector<1x1x8xf32>
    %92 = vector.broadcast %91 : vector<1x1x8xf32> to vector<9x9x8xf32>
    %93 = arith.addf %90, %92 : vector<9x9x8xf32>
    %cst_34 = arith.constant 0.000000e+00 : f32
    %94 = vector.broadcast %cst_34 : f32 to vector<9x9x8xf32>
    %95 = arith.maximumf %93, %94 : vector<9x9x8xf32>
    %c2_i32_35 = arith.constant 2 : i32
    %96 = vector.broadcast %c2_i32_35 : i32 to vector<9x9x1xi32>
    %97 = arith.muli %2, %96 : vector<9x9x1xi32>
    %c1_i32_36 = arith.constant 1 : i32
    %98 = vector.broadcast %c1_i32_36 : i32 to vector<9x9x1xi32>
    %99 = arith.addi %97, %98 : vector<9x9x1xi32>
    %c1_i32_37 = arith.constant 1 : i32
    %100 = vector.broadcast %c1_i32_37 : i32 to vector<9x9x1xi32>
    %101 = arith.cmpi sge, %99, %100 : vector<9x9x1xi32>
    %c2_i32_38 = arith.constant 2 : i32
    %102 = vector.broadcast %c2_i32_38 : i32 to vector<9x9x1xi32>
    %103 = arith.muli %2, %102 : vector<9x9x1xi32>
    %c1_i32_39 = arith.constant 1 : i32
    %104 = vector.broadcast %c1_i32_39 : i32 to vector<9x9x1xi32>
    %105 = arith.addi %103, %104 : vector<9x9x1xi32>
    %c16_i32_40 = arith.constant 16 : i32
    %106 = vector.broadcast %c16_i32_40 : i32 to vector<9x9x1xi32>
    %107 = arith.cmpi sle, %105, %106 : vector<9x9x1xi32>
    %108 = arith.andi %101, %107 : vector<9x9x1xi1>
    %c2_i32_41 = arith.constant 2 : i32
    %109 = vector.broadcast %c2_i32_41 : i32 to vector<9x9x1xi32>
    %110 = arith.muli %3, %109 : vector<9x9x1xi32>
    %c0_i32_42 = arith.constant 0 : i32
    %111 = vector.broadcast %c0_i32_42 : i32 to vector<9x9x1xi32>
    %112 = arith.addi %110, %111 : vector<9x9x1xi32>
    %c1_i32_43 = arith.constant 1 : i32
    %113 = vector.broadcast %c1_i32_43 : i32 to vector<9x9x1xi32>
    %114 = arith.cmpi sge, %112, %113 : vector<9x9x1xi32>
    %115 = arith.andi %108, %114 : vector<9x9x1xi1>
    %c2_i32_44 = arith.constant 2 : i32
    %116 = vector.broadcast %c2_i32_44 : i32 to vector<9x9x1xi32>
    %117 = arith.muli %3, %116 : vector<9x9x1xi32>
    %c0_i32_45 = arith.constant 0 : i32
    %118 = vector.broadcast %c0_i32_45 : i32 to vector<9x9x1xi32>
    %119 = arith.addi %117, %118 : vector<9x9x1xi32>
    %c16_i32_46 = arith.constant 16 : i32
    %120 = vector.broadcast %c16_i32_46 : i32 to vector<9x9x1xi32>
    %121 = arith.cmpi sle, %119, %120 : vector<9x9x1xi32>
    %122 = arith.andi %115, %121 : vector<9x9x1xi1>
    %123 = arith.extui %122 : vector<9x9x1xi1> to vector<9x9x1xi32>
    %124 = arith.sitofp %123 : vector<9x9x1xi32> to vector<9x9x1xf32>
    %125 = vector.broadcast %124 : vector<9x9x1xf32> to vector<9x9x8xf32>
    %126 = arith.mulf %95, %125 : vector<9x9x8xf32>
    %c3 = arith.constant 3 : index
    %c0_47 = arith.constant 0 : index
    %c0_48 = arith.constant 0 : index
    %c0_49 = arith.constant 0 : index
    %127 = vector.load %arg1[%c3, %c0_47, %c0_48, %c0_49] : memref<4x9x9x8xf32, #tpu.memory_space<vmem>>, vector<1x9x9x8xf32>
    %128 = vector.shape_cast %127 : vector<1x9x9x8xf32> to vector<9x9x8xf32>
    %129 = vector.shape_cast %0 : vector<1x8xf32> to vector<1x1x8xf32>
    %130 = vector.broadcast %129 : vector<1x1x8xf32> to vector<9x9x8xf32>
    %131 = arith.mulf %128, %130 : vector<9x9x8xf32>
    %132 = vector.shape_cast %1 : vector<1x8xf32> to vector<1x1x8xf32>
    %133 = vector.broadcast %132 : vector<1x1x8xf32> to vector<9x9x8xf32>
    %134 = arith.addf %131, %133 : vector<9x9x8xf32>
    %cst_50 = arith.constant 0.000000e+00 : f32
    %135 = vector.broadcast %cst_50 : f32 to vector<9x9x8xf32>
    %136 = arith.maximumf %134, %135 : vector<9x9x8xf32>
    %c2_i32_51 = arith.constant 2 : i32
    %137 = vector.broadcast %c2_i32_51 : i32 to vector<9x9x1xi32>
    %138 = arith.muli %2, %137 : vector<9x9x1xi32>
    %c1_i32_52 = arith.constant 1 : i32
    %139 = vector.broadcast %c1_i32_52 : i32 to vector<9x9x1xi32>
    %140 = arith.addi %138, %139 : vector<9x9x1xi32>
    %c1_i32_53 = arith.constant 1 : i32
    %141 = vector.broadcast %c1_i32_53 : i32 to vector<9x9x1xi32>
    %142 = arith.cmpi sge, %140, %141 : vector<9x9x1xi32>
    %c2_i32_54 = arith.constant 2 : i32
    %143 = vector.broadcast %c2_i32_54 : i32 to vector<9x9x1xi32>
    %144 = arith.muli %2, %143 : vector<9x9x1xi32>
    %c1_i32_55 = arith.constant 1 : i32
    %145 = vector.broadcast %c1_i32_55 : i32 to vector<9x9x1xi32>
    %146 = arith.addi %144, %145 : vector<9x9x1xi32>
    %c16_i32_56 = arith.constant 16 : i32
    %147 = vector.broadcast %c16_i32_56 : i32 to vector<9x9x1xi32>
    %148 = arith.cmpi sle, %146, %147 : vector<9x9x1xi32>
    %149 = arith.andi %142, %148 : vector<9x9x1xi1>
    %c2_i32_57 = arith.constant 2 : i32
    %150 = vector.broadcast %c2_i32_57 : i32 to vector<9x9x1xi32>
    %151 = arith.muli %3, %150 : vector<9x9x1xi32>
    %c1_i32_58 = arith.constant 1 : i32
    %152 = vector.broadcast %c1_i32_58 : i32 to vector<9x9x1xi32>
    %153 = arith.addi %151, %152 : vector<9x9x1xi32>
    %c1_i32_59 = arith.constant 1 : i32
    %154 = vector.broadcast %c1_i32_59 : i32 to vector<9x9x1xi32>
    %155 = arith.cmpi sge, %153, %154 : vector<9x9x1xi32>
    %156 = arith.andi %149, %155 : vector<9x9x1xi1>
    %c2_i32_60 = arith.constant 2 : i32
    %157 = vector.broadcast %c2_i32_60 : i32 to vector<9x9x1xi32>
    %158 = arith.muli %3, %157 : vector<9x9x1xi32>
    %c1_i32_61 = arith.constant 1 : i32
    %159 = vector.broadcast %c1_i32_61 : i32 to vector<9x9x1xi32>
    %160 = arith.addi %158, %159 : vector<9x9x1xi32>
    %c16_i32_62 = arith.constant 16 : i32
    %161 = vector.broadcast %c16_i32_62 : i32 to vector<9x9x1xi32>
    %162 = arith.cmpi sle, %160, %161 : vector<9x9x1xi32>
    %163 = arith.andi %156, %162 : vector<9x9x1xi1>
    %164 = arith.extui %163 : vector<9x9x1xi1> to vector<9x9x1xi32>
    %165 = arith.sitofp %164 : vector<9x9x1xi32> to vector<9x9x1xf32>
    %166 = vector.broadcast %165 : vector<9x9x1xf32> to vector<9x9x8xf32>
    %167 = arith.mulf %136, %166 : vector<9x9x8xf32>
    %cst_63 = arith.constant 0.000000e+00 : f32
    %168 = vector.broadcast %cst_63 : f32 to vector<64x8xf32>
    %169 = vector.extract_strided_slice %44 {offsets = [0, 0, 0], sizes = [8, 8, 8], strides = [1, 1, 1]} : vector<9x9x8xf32> to vector<8x8x8xf32>
    %170 = vector.shape_cast %169 : vector<8x8x8xf32> to vector<64x8xf32>
    %171 = arith.truncf %170 : vector<64x8xf32> to vector<64x8xbf16>
    %c0_64 = arith.constant 0 : index
    %c0_65 = arith.constant 0 : index
    %c0_66 = arith.constant 0 : index
    %172 = vector.load %arg3[%c0_64, %c0_65, %c0_66] : memref<9x8x8xbf16, #tpu.memory_space<vmem>>, vector<1x8x8xbf16>
    %173 = vector.shape_cast %172 : vector<1x8x8xbf16> to vector<8x8xbf16>
    %cst_67 = arith.constant dense<0.000000e+00> : vector<64x8xf32>
    %174 = tpu.matmul %171, %173, %cst_67 {dimension_numbers = #tpu.dot_dimension_numbers<[1], [0], [0], [1], [0, 0, 1, 1], [], []>} : vector<64x8xbf16>, vector<8x8xbf16>, vector<64x8xf32> -> vector<64x8xf32>
    %175 = arith.addf %168, %174 : vector<64x8xf32>
    %176 = vector.extract_strided_slice %85 {offsets = [0, 0, 0], sizes = [8, 8, 8], strides = [1, 1, 1]} : vector<9x9x8xf32> to vector<8x8x8xf32>
    %177 = vector.shape_cast %176 : vector<8x8x8xf32> to vector<64x8xf32>
    %178 = arith.truncf %177 : vector<64x8xf32> to vector<64x8xbf16>
    %c1_68 = arith.constant 1 : index
    %c0_69 = arith.constant 0 : index
    %c0_70 = arith.constant 0 : index
    %179 = vector.load %arg3[%c1_68, %c0_69, %c0_70] : memref<9x8x8xbf16, #tpu.memory_space<vmem>>, vector<1x8x8xbf16>
    %180 = vector.shape_cast %179 : vector<1x8x8xbf16> to vector<8x8xbf16>
    %cst_71 = arith.constant dense<0.000000e+00> : vector<64x8xf32>
    %181 = tpu.matmul %178, %180, %cst_71 {dimension_numbers = #tpu.dot_dimension_numbers<[1], [0], [0], [1], [0, 0, 1, 1], [], []>} : vector<64x8xbf16>, vector<8x8xbf16>, vector<64x8xf32> -> vector<64x8xf32>
    %182 = arith.addf %175, %181 : vector<64x8xf32>
    %183 = vector.extract_strided_slice %44 {offsets = [0, 1, 0], sizes = [8, 8, 8], strides = [1, 1, 1]} : vector<9x9x8xf32> to vector<8x8x8xf32>
    %184 = vector.shape_cast %183 : vector<8x8x8xf32> to vector<64x8xf32>
    %185 = arith.truncf %184 : vector<64x8xf32> to vector<64x8xbf16>
    %c2_72 = arith.constant 2 : index
    %c0_73 = arith.constant 0 : index
    %c0_74 = arith.constant 0 : index
    %186 = vector.load %arg3[%c2_72, %c0_73, %c0_74] : memref<9x8x8xbf16, #tpu.memory_space<vmem>>, vector<1x8x8xbf16>
    %187 = vector.shape_cast %186 : vector<1x8x8xbf16> to vector<8x8xbf16>
    %cst_75 = arith.constant dense<0.000000e+00> : vector<64x8xf32>
    %188 = tpu.matmul %185, %187, %cst_75 {dimension_numbers = #tpu.dot_dimension_numbers<[1], [0], [0], [1], [0, 0, 1, 1], [], []>} : vector<64x8xbf16>, vector<8x8xbf16>, vector<64x8xf32> -> vector<64x8xf32>
    %189 = arith.addf %182, %188 : vector<64x8xf32>
    %190 = vector.extract_strided_slice %126 {offsets = [0, 0, 0], sizes = [8, 8, 8], strides = [1, 1, 1]} : vector<9x9x8xf32> to vector<8x8x8xf32>
    %191 = vector.shape_cast %190 : vector<8x8x8xf32> to vector<64x8xf32>
    %192 = arith.truncf %191 : vector<64x8xf32> to vector<64x8xbf16>
    %c3_76 = arith.constant 3 : index
    %c0_77 = arith.constant 0 : index
    %c0_78 = arith.constant 0 : index
    %193 = vector.load %arg3[%c3_76, %c0_77, %c0_78] : memref<9x8x8xbf16, #tpu.memory_space<vmem>>, vector<1x8x8xbf16>
    %194 = vector.shape_cast %193 : vector<1x8x8xbf16> to vector<8x8xbf16>
    %cst_79 = arith.constant dense<0.000000e+00> : vector<64x8xf32>
    %195 = tpu.matmul %192, %194, %cst_79 {dimension_numbers = #tpu.dot_dimension_numbers<[1], [0], [0], [1], [0, 0, 1, 1], [], []>} : vector<64x8xbf16>, vector<8x8xbf16>, vector<64x8xf32> -> vector<64x8xf32>
    %196 = arith.addf %189, %195 : vector<64x8xf32>
    %197 = vector.extract_strided_slice %167 {offsets = [0, 0, 0], sizes = [8, 8, 8], strides = [1, 1, 1]} : vector<9x9x8xf32> to vector<8x8x8xf32>
    %198 = vector.shape_cast %197 : vector<8x8x8xf32> to vector<64x8xf32>
    %199 = arith.truncf %198 : vector<64x8xf32> to vector<64x8xbf16>
    %c4 = arith.constant 4 : index
    %c0_80 = arith.constant 0 : index
    %c0_81 = arith.constant 0 : index
    %200 = vector.load %arg3[%c4, %c0_80, %c0_81] : memref<9x8x8xbf16, #tpu.memory_space<vmem>>, vector<1x8x8xbf16>
    %201 = vector.shape_cast %200 : vector<1x8x8xbf16> to vector<8x8xbf16>
    %cst_82 = arith.constant dense<0.000000e+00> : vector<64x8xf32>
    %202 = tpu.matmul %199, %201, %cst_82 {dimension_numbers = #tpu.dot_dimension_numbers<[1], [0], [0], [1], [0, 0, 1, 1], [], []>} : vector<64x8xbf16>, vector<8x8xbf16>, vector<64x8xf32> -> vector<64x8xf32>
    %203 = arith.addf %196, %202 : vector<64x8xf32>
    %204 = vector.extract_strided_slice %126 {offsets = [0, 1, 0], sizes = [8, 8, 8], strides = [1, 1, 1]} : vector<9x9x8xf32> to vector<8x8x8xf32>
    %205 = vector.shape_cast %204 : vector<8x8x8xf32> to vector<64x8xf32>
    %206 = arith.truncf %205 : vector<64x8xf32> to vector<64x8xbf16>
    %c5 = arith.constant 5 : index
    %c0_83 = arith.constant 0 : index
    %c0_84 = arith.constant 0 : index
    %207 = vector.load %arg3[%c5, %c0_83, %c0_84] : memref<9x8x8xbf16, #tpu.memory_space<vmem>>, vector<1x8x8xbf16>
    %208 = vector.shape_cast %207 : vector<1x8x8xbf16> to vector<8x8xbf16>
    %cst_85 = arith.constant dense<0.000000e+00> : vector<64x8xf32>
    %209 = tpu.matmul %206, %208, %cst_85 {dimension_numbers = #tpu.dot_dimension_numbers<[1], [0], [0], [1], [0, 0, 1, 1], [], []>} : vector<64x8xbf16>, vector<8x8xbf16>, vector<64x8xf32> -> vector<64x8xf32>
    %210 = arith.addf %203, %209 : vector<64x8xf32>
    %211 = vector.extract_strided_slice %44 {offsets = [1, 0, 0], sizes = [8, 8, 8], strides = [1, 1, 1]} : vector<9x9x8xf32> to vector<8x8x8xf32>
    %212 = vector.shape_cast %211 : vector<8x8x8xf32> to vector<64x8xf32>
    %213 = arith.truncf %212 : vector<64x8xf32> to vector<64x8xbf16>
    %c6 = arith.constant 6 : index
    %c0_86 = arith.constant 0 : index
    %c0_87 = arith.constant 0 : index
    %214 = vector.load %arg3[%c6, %c0_86, %c0_87] : memref<9x8x8xbf16, #tpu.memory_space<vmem>>, vector<1x8x8xbf16>
    %215 = vector.shape_cast %214 : vector<1x8x8xbf16> to vector<8x8xbf16>
    %cst_88 = arith.constant dense<0.000000e+00> : vector<64x8xf32>
    %216 = tpu.matmul %213, %215, %cst_88 {dimension_numbers = #tpu.dot_dimension_numbers<[1], [0], [0], [1], [0, 0, 1, 1], [], []>} : vector<64x8xbf16>, vector<8x8xbf16>, vector<64x8xf32> -> vector<64x8xf32>
    %217 = arith.addf %210, %216 : vector<64x8xf32>
    %218 = vector.extract_strided_slice %85 {offsets = [1, 0, 0], sizes = [8, 8, 8], strides = [1, 1, 1]} : vector<9x9x8xf32> to vector<8x8x8xf32>
    %219 = vector.shape_cast %218 : vector<8x8x8xf32> to vector<64x8xf32>
    %220 = arith.truncf %219 : vector<64x8xf32> to vector<64x8xbf16>
    %c7 = arith.constant 7 : index
    %c0_89 = arith.constant 0 : index
    %c0_90 = arith.constant 0 : index
    %221 = vector.load %arg3[%c7, %c0_89, %c0_90] : memref<9x8x8xbf16, #tpu.memory_space<vmem>>, vector<1x8x8xbf16>
    %222 = vector.shape_cast %221 : vector<1x8x8xbf16> to vector<8x8xbf16>
    %cst_91 = arith.constant dense<0.000000e+00> : vector<64x8xf32>
    %223 = tpu.matmul %220, %222, %cst_91 {dimension_numbers = #tpu.dot_dimension_numbers<[1], [0], [0], [1], [0, 0, 1, 1], [], []>} : vector<64x8xbf16>, vector<8x8xbf16>, vector<64x8xf32> -> vector<64x8xf32>
    %224 = arith.addf %217, %223 : vector<64x8xf32>
    %225 = vector.extract_strided_slice %44 {offsets = [1, 1, 0], sizes = [8, 8, 8], strides = [1, 1, 1]} : vector<9x9x8xf32> to vector<8x8x8xf32>
    %226 = vector.shape_cast %225 : vector<8x8x8xf32> to vector<64x8xf32>
    %227 = arith.truncf %226 : vector<64x8xf32> to vector<64x8xbf16>
    %c8 = arith.constant 8 : index
    %c0_92 = arith.constant 0 : index
    %c0_93 = arith.constant 0 : index
    %228 = vector.load %arg3[%c8, %c0_92, %c0_93] : memref<9x8x8xbf16, #tpu.memory_space<vmem>>, vector<1x8x8xbf16>
    %229 = vector.shape_cast %228 : vector<1x8x8xbf16> to vector<8x8xbf16>
    %cst_94 = arith.constant dense<0.000000e+00> : vector<64x8xf32>
    %230 = tpu.matmul %227, %229, %cst_94 {dimension_numbers = #tpu.dot_dimension_numbers<[1], [0], [0], [1], [0, 0, 1, 1], [], []>} : vector<64x8xbf16>, vector<8x8xbf16>, vector<64x8xf32> -> vector<64x8xf32>
    %231 = arith.addf %224, %230 : vector<64x8xf32>
    %232 = arith.truncf %231 : vector<64x8xf32> to vector<64x8xbf16>
    %c0_95 = arith.constant 0 : index
    %c0_96 = arith.constant 0 : index
    %233 = vector.load %arg4[%c0_95, %c0_96] : memref<64x8xbf16, #tpu.memory_space<vmem>>, vector<64x8xbf16>
    tpu.vector_store %arg4[%c0_95, %c0_96], %232 {strides = array<i32>} : memref<64x8xbf16, #tpu.memory_space<vmem>>, vector<64x8xbf16>,
    %cst_97 = arith.constant dense<0.000000e+00> : vector<8xf32>
    %234 = vector.multi_reduction <add>, %231, %cst_97 [0] : vector<64x8xf32> to vector<8xf32>
    %235 = vector.shape_cast %234 : vector<8xf32> to vector<1x8xf32>
    %236 = arith.mulf %231, %231 : vector<64x8xf32>
    %cst_98 = arith.constant dense<0.000000e+00> : vector<8xf32>
    %237 = vector.multi_reduction <add>, %236, %cst_98 [0] : vector<64x8xf32> to vector<8xf32>
    %238 = vector.shape_cast %237 : vector<8xf32> to vector<1x8xf32>
    %239 = tpu.concatenate %235, %238 in 0 : vector<1x8xf32>, vector<1x8xf32> -> vector<2x8xf32>
    %240 = vector.shape_cast %239 : vector<2x8xf32> to vector<1x2x8xf32>
    %c0_99 = arith.constant 0 : index
    %c0_100 = arith.constant 0 : index
    %c0_101 = arith.constant 0 : index
    %241 = vector.load %arg5[%c0_99, %c0_100, %c0_101] : memref<1x2x8xf32, #tpu.memory_space<vmem>>, vector<1x2x8xf32>
    tpu.vector_store %arg5[%c0_99, %c0_100, %c0_101], %240 {strides = array<i32>} : memref<1x2x8xf32, #tpu.memory_space<vmem>>, vector<1x2x8xf32>,
    return
  }
  func.func @transform_0(%arg0: i32) -> (i32, i32, i32, i32) {
    %c0_i32 = arith.constant 0 : i32
    %c0_i32_0 = arith.constant 0 : i32
    %c0_i32_1 = arith.constant 0 : i32
    %c0_i32_2 = arith.constant 0 : i32
    return %arg0, %c0_i32, %c0_i32_0, %c0_i32_1 : i32, i32, i32, i32
  }
  func.func @transform_1(%arg0: i32) -> (i32, i32) {
    %c0_i32 = arith.constant 0 : i32
    %c0_i32_0 = arith.constant 0 : i32
    %c0_i32_1 = arith.constant 0 : i32
    return %c0_i32, %c0_i32_0 : i32, i32
  }
  func.func @transform_2(%arg0: i32) -> (i32, i32, i32) {
    %c0_i32 = arith.constant 0 : i32
    %c0_i32_0 = arith.constant 0 : i32
    %c0_i32_1 = arith.constant 0 : i32
    %c0_i32_2 = arith.constant 0 : i32
    return %c0_i32, %c0_i32_0, %c0_i32_1 : i32, i32, i32
  }
  func.func @transform_3(%arg0: i32) -> (i32, i32) {
    %c0_i32 = arith.constant 0 : i32
    %c0_i32_0 = arith.constant 0 : i32
    return %arg0, %c0_i32 : i32, i32
  }
  func.func @transform_4(%arg0: i32) -> (i32, i32, i32) {
    %c0_i32 = arith.constant 0 : i32
    %c0_i32_0 = arith.constant 0 : i32
    %c0_i32_1 = arith.constant 0 : i32
    return %arg0, %c0_i32, %c0_i32_0 : i32, i32, i32
  }
}

module attributes {stable_mosaic.version = 11 : i64} {
  func.func @_conv3_plus_downsample_kernel(%arg0: i32, %arg1: memref<128x8xbf16, #tpu.memory_space<vmem>>, %arg2: memref<2x8xf32, #tpu.memory_space<vmem>>, %arg3: memref<8x32xbf16, #tpu.memory_space<vmem>>, %arg4: memref<128x16xbf16, #tpu.memory_space<vmem>>, %arg5: memref<16x32xbf16, #tpu.memory_space<vmem>>, %arg6: memref<128x32xbf16, #tpu.memory_space<vmem>>, %arg7: memref<1x2x32xf32, #tpu.memory_space<vmem>>, %arg8: memref<128x32xbf16, #tpu.memory_space<vmem>>, %arg9: memref<1x2x32xf32, #tpu.memory_space<vmem>>) attributes {dimension_semantics = [#tpu.dimension_semantics<parallel>], iteration_bounds = array<i64: 1>, scalar_prefetch = 0 : i64, scratch_operands = 0 : i64, tpu.core_type = #tpu.core_type<tc>, window_params = [{transform_indices = @transform_0, window_bounds = array<i64: 128, 8>}, {pipeline_mode = #tpu.pipeline_mode<synchronous>, transform_indices = @transform_1, window_bounds = array<i64: 2, 8>}, {pipeline_mode = #tpu.pipeline_mode<synchronous>, transform_indices = @transform_2, window_bounds = array<i64: 8, 32>}, {transform_indices = @transform_3, window_bounds = array<i64: 128, 16>}, {pipeline_mode = #tpu.pipeline_mode<synchronous>, transform_indices = @transform_4, window_bounds = array<i64: 16, 32>}, {transform_indices = @transform_5, window_bounds = array<i64: 128, 32>}, {transform_indices = @transform_6, window_bounds = array<i64: 1, 2, 32>}, {transform_indices = @transform_7, window_bounds = array<i64: 128, 32>}, {transform_indices = @transform_8, window_bounds = array<i64: 1, 2, 32>}]} {
    %c0 = arith.constant 0 : index
    %c0_0 = arith.constant 0 : index
    %0 = vector.load %arg1[%c0, %c0_0] : memref<128x8xbf16, #tpu.memory_space<vmem>>, vector<128x8xbf16>
    %c0_1 = arith.constant 0 : index
    %c0_2 = arith.constant 0 : index
    %1 = vector.load %arg2[%c0_1, %c0_2] : memref<2x8xf32, #tpu.memory_space<vmem>>, vector<1x8xf32>
    %2 = arith.extf %0 : vector<128x8xbf16> to vector<128x8xf32>
    %3 = vector.broadcast %1 : vector<1x8xf32> to vector<128x8xf32>
    %4 = arith.mulf %2, %3 : vector<128x8xf32>
    %c1 = arith.constant 1 : index
    %c0_3 = arith.constant 0 : index
    %5 = vector.load %arg2[%c1, %c0_3] : memref<2x8xf32, #tpu.memory_space<vmem>>, vector<1x8xf32>
    %6 = vector.broadcast %5 : vector<1x8xf32> to vector<128x8xf32>
    %7 = arith.addf %4, %6 : vector<128x8xf32>
    %cst = arith.constant 0.000000e+00 : f32
    %8 = vector.broadcast %cst : f32 to vector<128x8xf32>
    %9 = arith.maximumf %7, %8 : vector<128x8xf32>
    %10 = arith.truncf %9 : vector<128x8xf32> to vector<128x8xbf16>
    %c0_4 = arith.constant 0 : index
    %c0_5 = arith.constant 0 : index
    %11 = vector.load %arg3[%c0_4, %c0_5] : memref<8x32xbf16, #tpu.memory_space<vmem>>, vector<8x32xbf16>
    %cst_6 = arith.constant dense<0.000000e+00> : vector<128x32xf32>
    %12 = tpu.matmul %10, %11, %cst_6 {dimension_numbers = #tpu.dot_dimension_numbers<[1], [0], [0], [1], [0, 0, 1, 1], [], []>} : vector<128x8xbf16>, vector<8x32xbf16>, vector<128x32xf32> -> vector<128x32xf32>
    %13 = arith.truncf %12 : vector<128x32xf32> to vector<128x32xbf16>
    %c0_7 = arith.constant 0 : index
    %c0_8 = arith.constant 0 : index
    %14 = vector.load %arg6[%c0_7, %c0_8] : memref<128x32xbf16, #tpu.memory_space<vmem>>, vector<128x32xbf16>
    tpu.vector_store %arg6[%c0_7, %c0_8], %13 {strides = array<i32>} : memref<128x32xbf16, #tpu.memory_space<vmem>>, vector<128x32xbf16>,
    %cst_9 = arith.constant dense<0.000000e+00> : vector<32xf32>
    %15 = vector.multi_reduction <add>, %12, %cst_9 [0] : vector<128x32xf32> to vector<32xf32>
    %16 = vector.shape_cast %15 : vector<32xf32> to vector<1x32xf32>
    %17 = arith.mulf %12, %12 : vector<128x32xf32>
    %cst_10 = arith.constant dense<0.000000e+00> : vector<32xf32>
    %18 = vector.multi_reduction <add>, %17, %cst_10 [0] : vector<128x32xf32> to vector<32xf32>
    %19 = vector.shape_cast %18 : vector<32xf32> to vector<1x32xf32>
    %20 = tpu.concatenate %16, %19 in 0 : vector<1x32xf32>, vector<1x32xf32> -> vector<2x32xf32>
    %21 = vector.shape_cast %20 : vector<2x32xf32> to vector<1x2x32xf32>
    %c0_11 = arith.constant 0 : index
    %c0_12 = arith.constant 0 : index
    %c0_13 = arith.constant 0 : index
    %22 = vector.load %arg7[%c0_11, %c0_12, %c0_13] : memref<1x2x32xf32, #tpu.memory_space<vmem>>, vector<1x2x32xf32>
    tpu.vector_store %arg7[%c0_11, %c0_12, %c0_13], %21 {strides = array<i32>} : memref<1x2x32xf32, #tpu.memory_space<vmem>>, vector<1x2x32xf32>,
    %c0_14 = arith.constant 0 : index
    %c0_15 = arith.constant 0 : index
    %23 = vector.load %arg4[%c0_14, %c0_15] : memref<128x16xbf16, #tpu.memory_space<vmem>>, vector<128x16xbf16>
    %c0_16 = arith.constant 0 : index
    %c0_17 = arith.constant 0 : index
    %24 = vector.load %arg5[%c0_16, %c0_17] : memref<16x32xbf16, #tpu.memory_space<vmem>>, vector<16x32xbf16>
    %cst_18 = arith.constant dense<0.000000e+00> : vector<128x32xf32>
    %25 = tpu.matmul %23, %24, %cst_18 {dimension_numbers = #tpu.dot_dimension_numbers<[1], [0], [0], [1], [0, 0, 1, 1], [], []>} : vector<128x16xbf16>, vector<16x32xbf16>, vector<128x32xf32> -> vector<128x32xf32>
    %26 = arith.truncf %25 : vector<128x32xf32> to vector<128x32xbf16>
    %c0_19 = arith.constant 0 : index
    %c0_20 = arith.constant 0 : index
    %27 = vector.load %arg8[%c0_19, %c0_20] : memref<128x32xbf16, #tpu.memory_space<vmem>>, vector<128x32xbf16>
    tpu.vector_store %arg8[%c0_19, %c0_20], %26 {strides = array<i32>} : memref<128x32xbf16, #tpu.memory_space<vmem>>, vector<128x32xbf16>,
    %cst_21 = arith.constant dense<0.000000e+00> : vector<32xf32>
    %28 = vector.multi_reduction <add>, %25, %cst_21 [0] : vector<128x32xf32> to vector<32xf32>
    %29 = vector.shape_cast %28 : vector<32xf32> to vector<1x32xf32>
    %30 = arith.mulf %25, %25 : vector<128x32xf32>
    %cst_22 = arith.constant dense<0.000000e+00> : vector<32xf32>
    %31 = vector.multi_reduction <add>, %30, %cst_22 [0] : vector<128x32xf32> to vector<32xf32>
    %32 = vector.shape_cast %31 : vector<32xf32> to vector<1x32xf32>
    %33 = tpu.concatenate %29, %32 in 0 : vector<1x32xf32>, vector<1x32xf32> -> vector<2x32xf32>
    %34 = vector.shape_cast %33 : vector<2x32xf32> to vector<1x2x32xf32>
    %c0_23 = arith.constant 0 : index
    %c0_24 = arith.constant 0 : index
    %c0_25 = arith.constant 0 : index
    %35 = vector.load %arg9[%c0_23, %c0_24, %c0_25] : memref<1x2x32xf32, #tpu.memory_space<vmem>>, vector<1x2x32xf32>
    tpu.vector_store %arg9[%c0_23, %c0_24, %c0_25], %34 {strides = array<i32>} : memref<1x2x32xf32, #tpu.memory_space<vmem>>, vector<1x2x32xf32>,
    return
  }
  func.func @transform_0(%arg0: i32) -> (i32, i32) {
    %c0_i32 = arith.constant 0 : i32
    %c0_i32_0 = arith.constant 0 : i32
    return %arg0, %c0_i32 : i32, i32
  }
  func.func @transform_1(%arg0: i32) -> (i32, i32) {
    %c0_i32 = arith.constant 0 : i32
    %c0_i32_0 = arith.constant 0 : i32
    %c0_i32_1 = arith.constant 0 : i32
    return %c0_i32, %c0_i32_0 : i32, i32
  }
  func.func @transform_2(%arg0: i32) -> (i32, i32) {
    %c0_i32 = arith.constant 0 : i32
    %c0_i32_0 = arith.constant 0 : i32
    %c0_i32_1 = arith.constant 0 : i32
    return %c0_i32, %c0_i32_0 : i32, i32
  }
  func.func @transform_3(%arg0: i32) -> (i32, i32) {
    %c0_i32 = arith.constant 0 : i32
    %c0_i32_0 = arith.constant 0 : i32
    return %arg0, %c0_i32 : i32, i32
  }
  func.func @transform_4(%arg0: i32) -> (i32, i32) {
    %c0_i32 = arith.constant 0 : i32
    %c0_i32_0 = arith.constant 0 : i32
    %c0_i32_1 = arith.constant 0 : i32
    return %c0_i32, %c0_i32_0 : i32, i32
  }
  func.func @transform_5(%arg0: i32) -> (i32, i32) {
    %c0_i32 = arith.constant 0 : i32
    %c0_i32_0 = arith.constant 0 : i32
    return %arg0, %c0_i32 : i32, i32
  }
  func.func @transform_6(%arg0: i32) -> (i32, i32, i32) {
    %c0_i32 = arith.constant 0 : i32
    %c0_i32_0 = arith.constant 0 : i32
    %c0_i32_1 = arith.constant 0 : i32
    return %arg0, %c0_i32, %c0_i32_0 : i32, i32, i32
  }
  func.func @transform_7(%arg0: i32) -> (i32, i32) {
    %c0_i32 = arith.constant 0 : i32
    %c0_i32_0 = arith.constant 0 : i32
    return %arg0, %c0_i32 : i32, i32
  }
  func.func @transform_8(%arg0: i32) -> (i32, i32, i32) {
    %c0_i32 = arith.constant 0 : i32
    %c0_i32_0 = arith.constant 0 : i32
    %c0_i32_1 = arith.constant 0 : i32
    return %arg0, %c0_i32, %c0_i32_0 : i32, i32, i32
  }
}

module attributes {stable_mosaic.version = 11 : i64} {
  func.func @_bn_bn_add_relu_kernel(%arg0: i32, %arg1: memref<128x32xbf16, #tpu.memory_space<vmem>>, %arg2: memref<2x32xf32, #tpu.memory_space<vmem>>, %arg3: memref<128x32xbf16, #tpu.memory_space<vmem>>, %arg4: memref<2x32xf32, #tpu.memory_space<vmem>>, %arg5: memref<128x32xf32, #tpu.memory_space<vmem>>) attributes {dimension_semantics = [#tpu.dimension_semantics<parallel>], iteration_bounds = array<i64: 1>, scalar_prefetch = 0 : i64, scratch_operands = 0 : i64, tpu.core_type = #tpu.core_type<tc>, window_params = [{transform_indices = @transform_0, window_bounds = array<i64: 128, 32>}, {pipeline_mode = #tpu.pipeline_mode<synchronous>, transform_indices = @transform_1, window_bounds = array<i64: 2, 32>}, {transform_indices = @transform_2, window_bounds = array<i64: 128, 32>}, {pipeline_mode = #tpu.pipeline_mode<synchronous>, transform_indices = @transform_3, window_bounds = array<i64: 2, 32>}, {transform_indices = @transform_4, window_bounds = array<i64: 128, 32>}]} {
    %c0 = arith.constant 0 : index
    %c0_0 = arith.constant 0 : index
    %0 = vector.load %arg1[%c0, %c0_0] : memref<128x32xbf16, #tpu.memory_space<vmem>>, vector<128x32xbf16>
    %c0_1 = arith.constant 0 : index
    %c0_2 = arith.constant 0 : index
    %1 = vector.load %arg2[%c0_1, %c0_2] : memref<2x32xf32, #tpu.memory_space<vmem>>, vector<1x32xf32>
    %2 = arith.extf %0 : vector<128x32xbf16> to vector<128x32xf32>
    %3 = vector.broadcast %1 : vector<1x32xf32> to vector<128x32xf32>
    %4 = arith.mulf %2, %3 : vector<128x32xf32>
    %c1 = arith.constant 1 : index
    %c0_3 = arith.constant 0 : index
    %5 = vector.load %arg2[%c1, %c0_3] : memref<2x32xf32, #tpu.memory_space<vmem>>, vector<1x32xf32>
    %6 = vector.broadcast %5 : vector<1x32xf32> to vector<128x32xf32>
    %7 = arith.addf %4, %6 : vector<128x32xf32>
    %c0_4 = arith.constant 0 : index
    %c0_5 = arith.constant 0 : index
    %8 = vector.load %arg3[%c0_4, %c0_5] : memref<128x32xbf16, #tpu.memory_space<vmem>>, vector<128x32xbf16>
    %c0_6 = arith.constant 0 : index
    %c0_7 = arith.constant 0 : index
    %9 = vector.load %arg4[%c0_6, %c0_7] : memref<2x32xf32, #tpu.memory_space<vmem>>, vector<1x32xf32>
    %10 = arith.extf %8 : vector<128x32xbf16> to vector<128x32xf32>
    %11 = vector.broadcast %9 : vector<1x32xf32> to vector<128x32xf32>
    %12 = arith.mulf %10, %11 : vector<128x32xf32>
    %c1_8 = arith.constant 1 : index
    %c0_9 = arith.constant 0 : index
    %13 = vector.load %arg4[%c1_8, %c0_9] : memref<2x32xf32, #tpu.memory_space<vmem>>, vector<1x32xf32>
    %14 = vector.broadcast %13 : vector<1x32xf32> to vector<128x32xf32>
    %15 = arith.addf %12, %14 : vector<128x32xf32>
    %16 = arith.addf %7, %15 : vector<128x32xf32>
    %cst = arith.constant 0.000000e+00 : f32
    %17 = vector.broadcast %cst : f32 to vector<128x32xf32>
    %18 = arith.maximumf %16, %17 : vector<128x32xf32>
    %c0_10 = arith.constant 0 : index
    %c0_11 = arith.constant 0 : index
    %19 = vector.load %arg5[%c0_10, %c0_11] : memref<128x32xf32, #tpu.memory_space<vmem>>, vector<128x32xf32>
    tpu.vector_store %arg5[%c0_10, %c0_11], %18 {strides = array<i32>} : memref<128x32xf32, #tpu.memory_space<vmem>>, vector<128x32xf32>,
    return
  }
  func.func @transform_0(%arg0: i32) -> (i32, i32) {
    %c0_i32 = arith.constant 0 : i32
    %c0_i32_0 = arith.constant 0 : i32
    return %arg0, %c0_i32 : i32, i32
  }
  func.func @transform_1(%arg0: i32) -> (i32, i32) {
    %c0_i32 = arith.constant 0 : i32
    %c0_i32_0 = arith.constant 0 : i32
    %c0_i32_1 = arith.constant 0 : i32
    return %c0_i32, %c0_i32_0 : i32, i32
  }
  func.func @transform_2(%arg0: i32) -> (i32, i32) {
    %c0_i32 = arith.constant 0 : i32
    %c0_i32_0 = arith.constant 0 : i32
    return %arg0, %c0_i32 : i32, i32
  }
  func.func @transform_3(%arg0: i32) -> (i32, i32) {
    %c0_i32 = arith.constant 0 : i32
    %c0_i32_0 = arith.constant 0 : i32
    %c0_i32_1 = arith.constant 0 : i32
    return %c0_i32, %c0_i32_0 : i32, i32
  }
  func.func @transform_4(%arg0: i32) -> (i32, i32) {
    %c0_i32 = arith.constant 0 : i32
    %c0_i32_0 = arith.constant 0 : i32
    return %arg0, %c0_i32 : i32, i32
  }
}

</mosaic_0001>

<bundles_post_ra>
// kernel: bottleneck_forward.4
= control target key start
LH: loop header
LB: loop body
LE: loop exit
PB: predicated region body
PF: predicated region fallthrough
CT: control target
= control target key end

     0   :  { %vm246_vm0 = vcmask 130048   ;;  %vm632_vm1 = vcmask 64512   ;;  %vm1027_vm2 = vcmask 1040384   ;;  %vm1029_vm3 = vcmask 58368   ;;  %s1968_s1 = inlined_call_operand.vmem [shape: bf16[16,8], index: 1, kind: input, shape index: {}]   ;;  %s1969_s0 = inlined_call_operand.vmem [shape: bf16[512,16], index: 0, kind: input, shape index: {}]   ;;  %s1970_s2 = inlined_call_operand.vmem [shape: f32[512,8], index: 2, kind: output, shape index: {0}]   ;;  %s1971_s3 = inlined_call_operand.vmem [shape: f32[1,2,8], index: 3, kind: output, shape index: {1}]  }
   0x1   :  { %v1205_v0 = vld [vmem:[%s1968_s1] sm:$0xff]   ;;  %v1207_v2 = vld [vmem:[%s1969_s0 + $0x8] sm:$0xff]   ;;  %v1208_v3 = vld [vmem:[%s1969_s0 + $0x10] sm:$0xff]  }
   0x2   :  { %v1206_v1 = vld [vmem:[%s1969_s0] sm:$0xff]   ;;  %1137 = vmatprep.subr.bf16.mxu0 %v1205_v0  ;;  %1203 = vmatprep.subr.bf16.mxu1 %v1205_v0  ;;  %v1209_v4 = vld [vmem:[%s1969_s0 + $0x18] sm:$0xff]   ;;  %v1211_v6 = vld [vmem:[%s1969_s0 + $0x28] sm:$0xff]  }
   0x3   :  { %1138 = vmatpush3.bf16.msra.mxu0 %v1205_v0  ;;  %1139 = vmatprep.mubr.msk.bf16.mxu0 %vm246_vm0, %v1206_v1  ;;  %v1210_v5 = vld [vmem:[%s1969_s0 + $0x20] sm:$0xff]   ;;  %v1212_v7 = vld [vmem:[%s1969_s0 + $0x30] sm:$0xff]   ;;  %v1223_v9 = vld [vmem:[%s1969_s0 + $0x88] sm:$0xff]  }
   0x4   :  { %1204 = vmatpush3.bf16.msra.mxu1 %v1205_v0  ;;  %v1222_v8 = vld [vmem:[%s1969_s0 + $0x80] sm:$0xff]   ;;  %v1224_v10 = vld [vmem:[%s1969_s0 + $0x90] sm:$0xff]   ;;  %v1225_v11 = vld [vmem:[%s1969_s0 + $0x98] sm:$0xff]  }
   0x5   :  { %1171 = vmatprep.mubr.msk.bf16.mxu1 %vm246_vm0, %v1222_v8  ;;  %v1226_v12 = vld [vmem:[%s1969_s0 + $0xa0] sm:$0xff]   ;;  %v1213_v13 = vld [vmem:[%s1969_s0 + $0x38] sm:$0xff]   ;;  %v1227_v15 = vld [vmem:[%s1969_s0 + $0xa8] sm:$0xff]  }
   0x6   :  { %1140 = vmatmul.mubr.msk.bf16.vlgmr.msra.gmra.mrb[0].mxu0 %vm246_vm0, %v1207_v2  ;;  %v1214_v14 = vld [vmem:[%s1969_s0 + $0x40] sm:$0xff]   ;;  %v1228_v16 = vld [vmem:[%s1969_s0 + $0xb0] sm:$0xff]   ;;  %v1215_v17 = vld [vmem:[%s1969_s0 + $0x48] sm:$0xff]  }
   0x7   :  { %1143 = vmatprep.mubr.msk.bf16.mxu0 %vm246_vm0, %v1208_v3  ;;  %1172 = vmatmul.mubr.msk.bf16.vlgmr.msra.gmra.mrb[0].mxu1 %vm246_vm0, %v1223_v9  ;;  %v1216_v18 = vld [vmem:[%s1969_s0 + $0x50] sm:$0xff]   ;;  %v1229_v19 = vld [vmem:[%s1969_s0 + $0xb8] sm:$0xff]   ;;  %v1230_v20 = vld [vmem:[%s1969_s0 + $0xc0] sm:$0xff]  }
   0x8   :  { %1175 = vmatprep.mubr.msk.bf16.mxu1 %vm246_vm0, %v1224_v10  ;;  %v1217_v21 = vld [vmem:[%s1969_s0 + $0x58] sm:$0xff]   ;;  %v1218_v22 = vld [vmem:[%s1969_s0 + $0x60] sm:$0xff]   ;;  %v1231_v23 = vld [vmem:[%s1969_s0 + $0xc8] sm:$0xff]  }
   0x9   :  { %v1232_v24 = vld [vmem:[%s1969_s0 + $0xd0] sm:$0xff]   ;;  %v1219_v25 = vld [vmem:[%s1969_s0 + $0x68] sm:$0xff]   ;;  %v1233_v27 = vld [vmem:[%s1969_s0 + $0xd8] sm:$0xff]  }
   0xa   :  { %v1220_v26 = vld [vmem:[%s1969_s0 + $0x70] sm:$0xff]   ;;  %v1234_v28 = vld [vmem:[%s1969_s0 + $0xe0] sm:$0xff]   ;;  %v1221_v29 = vld [vmem:[%s1969_s0 + $0x78] sm:$0xff]  }
   0xb   :  { %v1235_v30 = vld [vmem:[%s1969_s0 + $0xe8] sm:$0xff]   ;;  %v1236_v31 = vld [vmem:[%s1969_s0 + $0xf0] sm:$0xff]   ;;  %v1237_v32 = vld [vmem:[%s1969_s0 + $0xf8] sm:$0xff]  }
   0xe   :  { %1144 = vmatmul.mubr.msk.bf16.gmra.mrb[4].mxu0 %vm246_vm0, %v1209_v4 }
   0xf   :  { %1147 = vmatprep.mubr.msk.bf16.mxu0 %vm246_vm0, %v1210_v5  ;;  %1176 = vmatmul.mubr.msk.bf16.gmra.mrb[4].mxu1 %vm246_vm0, %v1225_v11 }
  0x10   :  { %1179 = vmatprep.mubr.msk.bf16.mxu1 %vm246_vm0, %v1226_v12 }
  0x16   :  { %1148 = vmatmul.mubr.msk.bf16.gmra.mrb[8].mxu0 %vm246_vm0, %v1211_v6 }
  0x17   :  { %1151 = vmatprep.mubr.msk.bf16.mxu0 %vm246_vm0, %v1212_v7  ;;  %1180 = vmatmul.mubr.msk.bf16.gmra.mrb[8].mxu1 %vm246_vm0, %v1227_v15 }
  0x18   :  { %1183 = vmatprep.mubr.msk.bf16.mxu1 %vm246_vm0, %v1228_v16 }
  0x1e   :  { %1152 = vmatmul.mubr.msk.bf16.gmra.mrb[12].mxu0 %vm246_vm0, %v1213_v13 }
  0x1f   :  { %1155 = vmatprep.mubr.msk.bf16.mxu0 %vm246_vm0, %v1214_v14  ;;  %1184 = vmatmul.mubr.msk.bf16.gmra.mrb[12].mxu1 %vm246_vm0, %v1229_v19 }
  0x20   :  { %1187 = vmatprep.mubr.msk.bf16.mxu1 %vm246_vm0, %v1230_v20 }
  0x26   :  { %1156 = vmatmul.mubr.msk.bf16.gmra.mrb[16].mxu0 %vm246_vm0, %v1215_v17 }
  0x27   :  { %1159 = vmatprep.mubr.msk.bf16.mxu0 %vm246_vm0, %v1216_v18  ;;  %1188 = vmatmul.mubr.msk.bf16.gmra.mrb[16].mxu1 %vm246_vm0, %v1231_v23 }
  0x28   :  { %1191 = vmatprep.mubr.msk.bf16.mxu1 %vm246_vm0, %v1232_v24 }
  0x2e   :  { %1160 = vmatmul.mubr.msk.bf16.gmra.mrb[20].mxu0 %vm246_vm0, %v1217_v21 }
  0x2f   :  { %1163 = vmatprep.mubr.msk.bf16.mxu0 %vm246_vm0, %v1218_v22  ;;  %1192 = vmatmul.mubr.msk.bf16.gmra.mrb[20].mxu1 %vm246_vm0, %v1233_v27 }
  0x30   :  { %1195 = vmatprep.mubr.msk.bf16.mxu1 %vm246_vm0, %v1234_v28 }
  0x36   :  { %1164 = vmatmul.mubr.msk.bf16.gmra.mrb[24].mxu0 %vm246_vm0, %v1219_v25 }
  0x37   :  { %1167 = vmatprep.mubr.msk.bf16.mxu0 %vm246_vm0, %v1220_v26  ;;  %1196 = vmatmul.mubr.msk.bf16.gmra.mrb[24].mxu1 %vm246_vm0, %v1235_v30 }
  0x38   :  { %1199 = vmatprep.mubr.msk.bf16.mxu1 %vm246_vm0, %v1236_v31 }
  0x3e   :  { %1168 = vmatmul.mubr.msk.bf16.gmra.mrb[28].mxu0 %vm246_vm0, %v1221_v29 }
  0x3f   :  { %1200 = vmatmul.mubr.msk.bf16.gmra.mrb[28].mxu1 %vm246_vm0, %v1237_v32 }
  0xd9   :  { %v1141_v33 = vpop.f32.mrb[0].mxu0 }
  0xda   :  { %635 = vst.msk [vmem:[%s1970_s2 + $0x10] sm:$0xff] %vm632_vm1, %v1141_v33  ;;  %v377_v34 = vpop.f32.mrb[1].mxu0  ;;  %v832_v38 = vmul.f32 %v1141_v33, %v1141_v33  ;;  %v700_v43 = vsel %vm632_vm1, %v1141_v33, 0.0  ;;  %v1434_v7 = vpop.f32.mrb[0].mxu1 }
  0xdb   :  { %633 = vst.msk [vmem:[%s1970_s2] sm:$0xff] %vm632_vm1, %v377_v34  ;;  %v830_v35 = vmul.f32 %v377_v34, %v377_v34  ;;  %v1142_v36 = vpop.f32.mrb[2].mxu0  ;;  %v697_v39 = vsel %vm632_vm1, %v377_v34, 0.0  ;;  %667 = vst.msk [vmem:[%s1970_s2 + $0x110] sm:$0xff] %vm632_vm1, %v1434_v7  ;;  %v1441_v10 = vpop.f32.mrb[1].mxu1 }
  0xdc   :  { %636 = vst.msk [vmem:[%s1970_s2 + $0x18] sm:$0xff] %vm632_vm1, %v1142_v36  ;;  %v380_v37 = vpop.f32.mrb[3].mxu0  ;;  %v833_v45 = vmul.f32 %v1142_v36, %v1142_v36  ;;  %v897_v49 = vsel %vm632_vm1, %v832_v38, 0.0  ;;  %v702_v50 = vsel %vm632_vm1, %v1142_v36, 0.0  ;;  %665 = vst.msk [vmem:[%s1970_s2 + $0x100] sm:$0xff] %vm632_vm1, %v1441_v10  ;;  %v1450_v14 = vpop.f32.mrb[2].mxu1 }
  0xdd   :  { %634 = vst.msk [vmem:[%s1970_s2 + $0x8] sm:$0xff] %vm632_vm1, %v380_v37  ;;  %v698_v40 = vsel %vm632_vm1, %v380_v37, 0.0  ;;  %v831_v41 = vmul.f32 %v380_v37, %v380_v37  ;;  %v894_v44 = vsel %vm632_vm1, %v830_v35, 0.0  ;;  %668 = vst.msk [vmem:[%s1970_s2 + $0x118] sm:$0xff] %vm632_vm1, %v1450_v14  ;;  %v1461_v18 = vpop.f32.mrb[3].mxu1 }
  0xde   :  { %v699_v42 = vadd.f32 %v698_v40, %v697_v39  ;;  %v899_v55 = vsel %vm632_vm1, %v833_v45, 0.0  ;;  %666 = vst.msk [vmem:[%s1970_s2 + $0x108] sm:$0xff] %vm632_vm1, %v1461_v18 }
  0xdf   :  { %v895_v46 = vsel %vm632_vm1, %v831_v41, 0.0 }
  0xe0   :  { %v701_v47 = vadd.f32 %v700_v43, %v699_v42  ;;  %v896_v48 = vadd.f32 %v895_v46, %v894_v44 }
  0xe1   :  { %v1145_v51 = vpop.f32.mrb[4].mxu0 }
  0xe2   :  { %v898_v52 = vadd.f32 %v897_v49, %v896_v48  ;;  %639 = vst.msk [vmem:[%s1970_s2 + $0x30] sm:$0xff] %vm632_vm1, %v1145_v51  ;;  %v393_v53 = vpop.f32.mrb[5].mxu0  ;;  %v703_v54 = vadd.f32 %v702_v50, %v701_v47  ;;  %v836_v62 = vmul.f32 %v1145_v51, %v1145_v51  ;;  %v708_v4 = vsel %vm632_vm1, %v1145_v51, 0.0  ;;  %v1486_v35 = vpop.f32.mrb[4].mxu1 }
  0xe3   :  { %637 = vst.msk [vmem:[%s1970_s2 + $0x20] sm:$0xff] %vm632_vm1, %v393_v53  ;;  %v704_v56 = vsel %vm632_vm1, %v393_v53, 0.0  ;;  %v834_v57 = vmul.f32 %v393_v53, %v393_v53  ;;  %v1146_v58 = vpop.f32.mrb[6].mxu0  ;;  %671 = vst.msk [vmem:[%s1970_s2 + $0x130] sm:$0xff] %vm632_vm1, %v1486_v35  ;;  %v1493_v38 = vpop.f32.mrb[5].mxu1 }
  0xe4   :  { %v705_v59 = vadd.f32 %v704_v56, %v703_v54  ;;  %v900_v60 = vadd.f32 %v899_v55, %v898_v52  ;;  %640 = vst.msk [vmem:[%s1970_s2 + $0x38] sm:$0xff] %vm632_vm1, %v1146_v58  ;;  %v396_v61 = vpop.f32.mrb[7].mxu0  ;;  %v837_v5 = vmul.f32 %v1146_v58, %v1146_v58  ;;  %v905_v11 = vsel %vm632_vm1, %v836_v62, 0.0  ;;  %669 = vst.msk [vmem:[%s1970_s2 + $0x120] sm:$0xff] %vm632_vm1, %v1493_v38  ;;  %v1502_v42 = vpop.f32.mrb[6].mxu1 }
  0xe5   :  { %v901_v63 = vsel %vm632_vm1, %v834_v57, 0.0  ;;  %638 = vst.msk [vmem:[%s1970_s2 + $0x28] sm:$0xff] %vm632_vm1, %v396_v61  ;;  %v706_v0 = vsel %vm632_vm1, %v396_v61, 0.0  ;;  %v835_v1 = vmul.f32 %v396_v61, %v396_v61  ;;  %v710_v12 = vsel %vm632_vm1, %v1146_v58, 0.0  ;;  %672 = vst.msk [vmem:[%s1970_s2 + $0x138] sm:$0xff] %vm632_vm1, %v1502_v42  ;;  %v1513_v46 = vpop.f32.mrb[7].mxu1 }
  0xe6   :  { %v902_v2 = vadd.f32 %v901_v63, %v900_v60  ;;  %v707_v3 = vadd.f32 %v706_v0, %v705_v59  ;;  %v907_v19 = vsel %vm632_vm1, %v837_v5, 0.0  ;;  %670 = vst.msk [vmem:[%s1970_s2 + $0x128] sm:$0xff] %vm632_vm1, %v1513_v46 }
  0xe7   :  { %v903_v6 = vsel %vm632_vm1, %v835_v1, 0.0 }
  0xe8   :  { %v709_v8 = vadd.f32 %v708_v4, %v707_v3  ;;  %v904_v9 = vadd.f32 %v903_v6, %v902_v2 }
  0xe9   :  { %v1149_v13 = vpop.f32.mrb[8].mxu0 }
  0xea   :  { %v906_v15 = vadd.f32 %v905_v11, %v904_v9  ;;  %643 = vst.msk [vmem:[%s1970_s2 + $0x50] sm:$0xff] %vm632_vm1, %v1149_v13  ;;  %v409_v16 = vpop.f32.mrb[9].mxu0  ;;  %v711_v17 = vadd.f32 %v710_v12, %v709_v8  ;;  %v840_v26 = vmul.f32 %v1149_v13, %v1149_v13  ;;  %v716_v32 = vsel %vm632_vm1, %v1149_v13, 0.0  ;;  %v1538_v63 = vpop.f32.mrb[8].mxu1 }
  0xeb   :  { %641 = vst.msk [vmem:[%s1970_s2 + $0x40] sm:$0xff] %vm632_vm1, %v409_v16  ;;  %v712_v20 = vsel %vm632_vm1, %v409_v16, 0.0  ;;  %v838_v21 = vmul.f32 %v409_v16, %v409_v16  ;;  %v1150_v22 = vpop.f32.mrb[10].mxu0  ;;  %675 = vst.msk [vmem:[%s1970_s2 + $0x150] sm:$0xff] %vm632_vm1, %v1538_v63  ;;  %v1545_v2 = vpop.f32.mrb[9].mxu1 }
  0xec   :  { %v713_v23 = vadd.f32 %v712_v20, %v711_v17  ;;  %v908_v24 = vadd.f32 %v907_v19, %v906_v15  ;;  %644 = vst.msk [vmem:[%s1970_s2 + $0x58] sm:$0xff] %vm632_vm1, %v1150_v22  ;;  %v412_v25 = vpop.f32.mrb[11].mxu0  ;;  %v841_v33 = vmul.f32 %v1150_v22, %v1150_v22  ;;  %v913_v39 = vsel %vm632_vm1, %v840_v26, 0.0  ;;  %673 = vst.msk [vmem:[%s1970_s2 + $0x140] sm:$0xff] %vm632_vm1, %v1545_v2  ;;  %v1554_v6 = vpop.f32.mrb[10].mxu1 }
  0xed   :  { %v909_v27 = vsel %vm632_vm1, %v838_v21, 0.0  ;;  %642 = vst.msk [vmem:[%s1970_s2 + $0x48] sm:$0xff] %vm632_vm1, %v412_v25  ;;  %v714_v28 = vsel %vm632_vm1, %v412_v25, 0.0  ;;  %v839_v29 = vmul.f32 %v412_v25, %v412_v25  ;;  %v718_v40 = vsel %vm632_vm1, %v1150_v22, 0.0  ;;  %676 = vst.msk [vmem:[%s1970_s2 + $0x158] sm:$0xff] %vm632_vm1, %v1554_v6  ;;  %v1565_v12 = vpop.f32.mrb[11].mxu1 }
  0xee   :  { %v910_v30 = vadd.f32 %v909_v27, %v908_v24  ;;  %v715_v31 = vadd.f32 %v714_v28, %v713_v23  ;;  %v915_v47 = vsel %vm632_vm1, %v841_v33, 0.0  ;;  %674 = vst.msk [vmem:[%s1970_s2 + $0x148] sm:$0xff] %vm632_vm1, %v1565_v12 }
  0xef   :  { %v911_v34 = vsel %vm632_vm1, %v839_v29, 0.0 }
  0xf0   :  { %v717_v36 = vadd.f32 %v716_v32, %v715_v31  ;;  %v912_v37 = vadd.f32 %v911_v34, %v910_v30 }
  0xf1   :  { %v1153_v41 = vpop.f32.mrb[12].mxu0 }
  0xf2   :  { %v914_v43 = vadd.f32 %v913_v39, %v912_v37  ;;  %647 = vst.msk [vmem:[%s1970_s2 + $0x70] sm:$0xff] %vm632_vm1, %v1153_v41  ;;  %v425_v44 = vpop.f32.mrb[13].mxu0  ;;  %v719_v45 = vadd.f32 %v718_v40, %v717_v36  ;;  %v844_v54 = vmul.f32 %v1153_v41, %v1153_v41  ;;  %v724_v60 = vsel %vm632_vm1, %v1153_v41, 0.0  ;;  %v1590_v31 = vpop.f32.mrb[12].mxu1 }
  0xf3   :  { %645 = vst.msk [vmem:[%s1970_s2 + $0x60] sm:$0xff] %vm632_vm1, %v425_v44  ;;  %v720_v48 = vsel %vm632_vm1, %v425_v44, 0.0  ;;  %v842_v49 = vmul.f32 %v425_v44, %v425_v44  ;;  %v1154_v50 = vpop.f32.mrb[14].mxu0  ;;  %679 = vst.msk [vmem:[%s1970_s2 + $0x170] sm:$0xff] %vm632_vm1, %v1590_v31  ;;  %v1597_v34 = vpop.f32.mrb[13].mxu1 }
  0xf4   :  { %v721_v51 = vadd.f32 %v720_v48, %v719_v45  ;;  %v916_v52 = vadd.f32 %v915_v47, %v914_v43  ;;  %648 = vst.msk [vmem:[%s1970_s2 + $0x78] sm:$0xff] %vm632_vm1, %v1154_v50  ;;  %v428_v53 = vpop.f32.mrb[15].mxu0  ;;  %v845_v61 = vmul.f32 %v1154_v50, %v1154_v50  ;;  %v921_v3 = vsel %vm632_vm1, %v844_v54, 0.0  ;;  %677 = vst.msk [vmem:[%s1970_s2 + $0x160] sm:$0xff] %vm632_vm1, %v1597_v34  ;;  %v1606_v40 = vpop.f32.mrb[14].mxu1 }
  0xf5   :  { %v917_v55 = vsel %vm632_vm1, %v842_v49, 0.0  ;;  %646 = vst.msk [vmem:[%s1970_s2 + $0x68] sm:$0xff] %vm632_vm1, %v428_v53  ;;  %v722_v56 = vsel %vm632_vm1, %v428_v53, 0.0  ;;  %v843_v57 = vmul.f32 %v428_v53, %v428_v53  ;;  %v726_v4 = vsel %vm632_vm1, %v1154_v50, 0.0  ;;  %680 = vst.msk [vmem:[%s1970_s2 + $0x178] sm:$0xff] %vm632_vm1, %v1606_v40  ;;  %v1617_v45 = vpop.f32.mrb[15].mxu1 }
  0xf6   :  { %v918_v58 = vadd.f32 %v917_v55, %v916_v52  ;;  %v723_v59 = vadd.f32 %v722_v56, %v721_v51  ;;  %v923_v13 = vsel %vm632_vm1, %v845_v61, 0.0  ;;  %678 = vst.msk [vmem:[%s1970_s2 + $0x168] sm:$0xff] %vm632_vm1, %v1617_v45 }
  0xf7   :  { %v919_v62 = vsel %vm632_vm1, %v843_v57, 0.0 }
  0xf8   :  { %v725_v0 = vadd.f32 %v724_v60, %v723_v59  ;;  %v920_v1 = vadd.f32 %v919_v62, %v918_v58 }
  0xf9   :  { %v1157_v5 = vpop.f32.mrb[16].mxu0 }
  0xfa   :  { %v922_v8 = vadd.f32 %v921_v3, %v920_v1  ;;  %651 = vst.msk [vmem:[%s1970_s2 + $0x90] sm:$0xff] %vm632_vm1, %v1157_v5  ;;  %v441_v9 = vpop.f32.mrb[17].mxu0  ;;  %v727_v11 = vadd.f32 %v726_v4, %v725_v0  ;;  %v848_v22 = vmul.f32 %v1157_v5, %v1157_v5  ;;  %v732_v28 = vsel %vm632_vm1, %v1157_v5, 0.0  ;;  %v1642_v0 = vpop.f32.mrb[16].mxu1 }
  0xfb   :  { %649 = vst.msk [vmem:[%s1970_s2 + $0x80] sm:$0xff] %vm632_vm1, %v441_v9  ;;  %v728_v15 = vsel %vm632_vm1, %v441_v9, 0.0  ;;  %v846_v16 = vmul.f32 %v441_v9, %v441_v9  ;;  %v1158_v17 = vpop.f32.mrb[18].mxu0  ;;  %683 = vst.msk [vmem:[%s1970_s2 + $0x190] sm:$0xff] %vm632_vm1, %v1642_v0  ;;  %v1649_v4 = vpop.f32.mrb[17].mxu1 }
  0xfc   :  { %v729_v19 = vadd.f32 %v728_v15, %v727_v11  ;;  %v924_v20 = vadd.f32 %v923_v13, %v922_v8  ;;  %652 = vst.msk [vmem:[%s1970_s2 + $0x98] sm:$0xff] %vm632_vm1, %v1158_v17  ;;  %v444_v21 = vpop.f32.mrb[19].mxu0  ;;  %v849_v29 = vmul.f32 %v1158_v17, %v1158_v17  ;;  %v929_v36 = vsel %vm632_vm1, %v848_v22, 0.0  ;;  %681 = vst.msk [vmem:[%s1970_s2 + $0x180] sm:$0xff] %vm632_vm1, %v1649_v4  ;;  %v1658_v11 = vpop.f32.mrb[18].mxu1 }
  0xfd   :  { %v925_v23 = vsel %vm632_vm1, %v846_v16, 0.0  ;;  %650 = vst.msk [vmem:[%s1970_s2 + $0x88] sm:$0xff] %vm632_vm1, %v444_v21  ;;  %v730_v24 = vsel %vm632_vm1, %v444_v21, 0.0  ;;  %v847_v25 = vmul.f32 %v444_v21, %v444_v21  ;;  %v734_v37 = vsel %vm632_vm1, %v1158_v17, 0.0  ;;  %684 = vst.msk [vmem:[%s1970_s2 + $0x198] sm:$0xff] %vm632_vm1, %v1658_v11  ;;  %v1669_v17 = vpop.f32.mrb[19].mxu1 }
  0xfe   :  { %v926_v26 = vadd.f32 %v925_v23, %v924_v20  ;;  %v731_v27 = vadd.f32 %v730_v24, %v729_v19  ;;  %v931_v47 = vsel %vm632_vm1, %v849_v29, 0.0  ;;  %682 = vst.msk [vmem:[%s1970_s2 + $0x188] sm:$0xff] %vm632_vm1, %v1669_v17 }
  0xff   :  { %v927_v30 = vsel %vm632_vm1, %v847_v25, 0.0 }
 0x100   :  { %v733_v32 = vadd.f32 %v732_v28, %v731_v27  ;;  %v928_v33 = vadd.f32 %v927_v30, %v926_v26 }
 0x101   :  { %v1161_v39 = vpop.f32.mrb[20].mxu0 }
 0x102   :  { %v930_v41 = vadd.f32 %v929_v36, %v928_v33  ;;  %655 = vst.msk [vmem:[%s1970_s2 + $0xb0] sm:$0xff] %vm632_vm1, %v1161_v39  ;;  %v457_v43 = vpop.f32.mrb[21].mxu0  ;;  %v735_v44 = vadd.f32 %v734_v37, %v733_v32  ;;  %v852_v54 = vmul.f32 %v1161_v39, %v1161_v39  ;;  %v740_v60 = vsel %vm632_vm1, %v1161_v39, 0.0  ;;  %v1694_v39 = vpop.f32.mrb[20].mxu1 }
 0x103   :  { %653 = vst.msk [vmem:[%s1970_s2 + $0xa0] sm:$0xff] %vm632_vm1, %v457_v43  ;;  %v736_v48 = vsel %vm632_vm1, %v457_v43, 0.0  ;;  %v850_v49 = vmul.f32 %v457_v43, %v457_v43  ;;  %v1162_v50 = vpop.f32.mrb[22].mxu0  ;;  %687 = vst.msk [vmem:[%s1970_s2 + $0x1b0] sm:$0xff] %vm632_vm1, %v1694_v39 }
 0x104   :  { %v737_v51 = vadd.f32 %v736_v48, %v735_v44  ;;  %v932_v52 = vadd.f32 %v931_v47, %v930_v41  ;;  %656 = vst.msk [vmem:[%s1970_s2 + $0xb8] sm:$0xff] %vm632_vm1, %v1162_v50  ;;  %v460_v53 = vpop.f32.mrb[23].mxu0  ;;  %v853_v61 = vmul.f32 %v1162_v50, %v1162_v50  ;;  %v937_v5 = vsel %vm632_vm1, %v852_v54, 0.0  ;;  %v1701_v44 = vpop.f32.mrb[21].mxu1 }
 0x105   :  { %v933_v55 = vsel %vm632_vm1, %v850_v49, 0.0  ;;  %654 = vst.msk [vmem:[%s1970_s2 + $0xa8] sm:$0xff] %vm632_vm1, %v460_v53  ;;  %v738_v56 = vsel %vm632_vm1, %v460_v53, 0.0  ;;  %v851_v57 = vmul.f32 %v460_v53, %v460_v53  ;;  %v742_v8 = vsel %vm632_vm1, %v1162_v50, 0.0  ;;  %685 = vst.msk [vmem:[%s1970_s2 + $0x1a0] sm:$0xff] %vm632_vm1, %v1701_v44  ;;  %v1710_v50 = vpop.f32.mrb[22].mxu1 }
 0x106   :  { %v934_v58 = vadd.f32 %v933_v55, %v932_v52  ;;  %v739_v59 = vadd.f32 %v738_v56, %v737_v51  ;;  %v939_v19 = vsel %vm632_vm1, %v853_v61, 0.0  ;;  %688 = vst.msk [vmem:[%s1970_s2 + $0x1b8] sm:$0xff] %vm632_vm1, %v1710_v50  ;;  %v1721_v54 = vpop.f32.mrb[23].mxu1 }
 0x107   :  { %v935_v62 = vsel %vm632_vm1, %v851_v57, 0.0  ;;  %686 = vst.msk [vmem:[%s1970_s2 + $0x1a8] sm:$0xff] %vm632_vm1, %v1721_v54 }
 0x108   :  { %v741_v1 = vadd.f32 %v740_v60, %v739_v59  ;;  %v936_v3 = vadd.f32 %v935_v62, %v934_v58 }
 0x109   :  { %v1165_v9 = vpop.f32.mrb[24].mxu0 }
 0x10a   :  { %v938_v13 = vadd.f32 %v937_v5, %v936_v3  ;;  %659 = vst.msk [vmem:[%s1970_s2 + $0xd0] sm:$0xff] %vm632_vm1, %v1165_v9  ;;  %v473_v15 = vpop.f32.mrb[25].mxu0  ;;  %v743_v16 = vadd.f32 %v742_v8, %v741_v1  ;;  %v856_v26 = vmul.f32 %v1165_v9, %v1165_v9  ;;  %v748_v33 = vsel %vm632_vm1, %v1165_v9, 0.0 }
 0x10b   :  { %657 = vst.msk [vmem:[%s1970_s2 + $0xc0] sm:$0xff] %vm632_vm1, %v473_v15  ;;  %v744_v20 = vsel %vm632_vm1, %v473_v15, 0.0  ;;  %v854_v21 = vmul.f32 %v473_v15, %v473_v15  ;;  %v1166_v22 = vpop.f32.mrb[26].mxu0 }
 0x10c   :  { %v745_v23 = vadd.f32 %v744_v20, %v743_v16  ;;  %v940_v24 = vadd.f32 %v939_v19, %v938_v13  ;;  %660 = vst.msk [vmem:[%s1970_s2 + $0xd8] sm:$0xff] %vm632_vm1, %v1166_v22  ;;  %v476_v25 = vpop.f32.mrb[27].mxu0  ;;  %v857_v36 = vmul.f32 %v1166_v22, %v1166_v22  ;;  %v945_v47 = vsel %vm632_vm1, %v856_v26, 0.0  ;;  %v1748_v20 = vpop.f32.mrb[24].mxu1 }
 0x10d   :  { %v941_v27 = vsel %vm632_vm1, %v854_v21, 0.0  ;;  %658 = vst.msk [vmem:[%s1970_s2 + $0xc8] sm:$0xff] %vm632_vm1, %v476_v25  ;;  %v746_v28 = vsel %vm632_vm1, %v476_v25, 0.0  ;;  %v855_v29 = vmul.f32 %v476_v25, %v476_v25  ;;  %v750_v48 = vsel %vm632_vm1, %v1166_v22, 0.0  ;;  %691 = vst.msk [vmem:[%s1970_s2 + $0x1d0] sm:$0xff] %vm632_vm1, %v1748_v20 }
 0x10e   :  { %v942_v30 = vadd.f32 %v941_v27, %v940_v24  ;;  %v747_v32 = vadd.f32 %v746_v28, %v745_v23  ;;  %v947_v55 = vsel %vm632_vm1, %v857_v36, 0.0  ;;  %v862_v19 = vmul.f32 %v1441_v10, %v1441_v10  ;;  %v1755_v23 = vpop.f32.mrb[25].mxu1 }
 0x10f   :  { %v943_v37 = vsel %vm632_vm1, %v855_v29, 0.0  ;;  %v760_v26 = vsel %vm632_vm1, %v1441_v10, 0.0  ;;  %689 = vst.msk [vmem:[%s1970_s2 + $0x1c0] sm:$0xff] %vm632_vm1, %v1755_v23  ;;  %v1766_v27 = vpop.f32.mrb[26].mxu1 }
 0x110   :  { %v749_v41 = vadd.f32 %v748_v33, %v747_v32  ;;  %v944_v43 = vadd.f32 %v943_v37, %v942_v30  ;;  %692 = vst.msk [vmem:[%s1970_s2 + $0x1d8] sm:$0xff] %vm632_vm1, %v1766_v27  ;;  %v1773_v30 = vpop.f32.mrb[27].mxu1  ;;  %v957_v32 = vsel %vm632_vm1, %v862_v19, 0.0  ;;  %v863_v33 = vmul.f32 %v1461_v18, %v1461_v18 }
 0x111   :  { %v1169_v49 = vpop.f32.mrb[28].mxu0  ;;  %690 = vst.msk [vmem:[%s1970_s2 + $0x1c8] sm:$0xff] %vm632_vm1, %v1773_v30  ;;  %v772_v19 = vsel %vm632_vm1, %v1486_v35, 0.0 }
 0x112   :  { %v946_v51 = vadd.f32 %v945_v47, %v944_v43  ;;  %663 = vst.msk [vmem:[%s1970_s2 + $0xf0] sm:$0xff] %vm632_vm1, %v1169_v49  ;;  %v489_v52 = vpop.f32.mrb[29].mxu0  ;;  %v751_v53 = vadd.f32 %v750_v48, %v749_v41  ;;  %v860_v62 = vmul.f32 %v1169_v49, %v1169_v49  ;;  %v756_v13 = vsel %vm632_vm1, %v1169_v49, 0.0 }
 0x113   :  { %661 = vst.msk [vmem:[%s1970_s2 + $0xe0] sm:$0xff] %vm632_vm1, %v489_v52  ;;  %v752_v56 = vsel %vm632_vm1, %v489_v52, 0.0  ;;  %v858_v57 = vmul.f32 %v489_v52, %v489_v52  ;;  %v1170_v58 = vpop.f32.mrb[30].mxu0  ;;  %v864_v41 = vmul.f32 %v1434_v7, %v1434_v7  ;;  %v762_v43 = vsel %vm632_vm1, %v1461_v18, 0.0 }
 0x114   :  { %v753_v59 = vadd.f32 %v752_v56, %v751_v53  ;;  %v948_v60 = vadd.f32 %v947_v55, %v946_v51  ;;  %664 = vst.msk [vmem:[%s1970_s2 + $0xf8] sm:$0xff] %vm632_vm1, %v1170_v58  ;;  %v492_v61 = vpop.f32.mrb[31].mxu0  ;;  %v861_v15 = vmul.f32 %v1170_v58, %v1170_v58  ;;  %v953_v24 = vsel %vm632_vm1, %v860_v62, 0.0  ;;  %v1795_v55 = vpop.f32.mrb[28].mxu1 }
 0x115   :  { %v949_v1 = vsel %vm632_vm1, %v858_v57, 0.0  ;;  %662 = vst.msk [vmem:[%s1970_s2 + $0xe8] sm:$0xff] %vm632_vm1, %v492_v61  ;;  %v754_v3 = vsel %vm632_vm1, %v492_v61, 0.0  ;;  %v859_v5 = vmul.f32 %v492_v61, %v492_v61  ;;  %v758_v25 = vsel %vm632_vm1, %v1170_v58, 0.0  ;;  %695 = vst.msk [vmem:[%s1970_s2 + $0x1f0] sm:$0xff] %vm632_vm1, %v1795_v55  ;;  %v1802_v18 = vpop.f32.mrb[29].mxu1 }
 0x116   :  { %v950_v8 = vadd.f32 %v949_v1, %v948_v60  ;;  %v755_v9 = vadd.f32 %v754_v3, %v753_v59  ;;  %v955_v10 = vsel %vm632_vm1, %v861_v15, 0.0  ;;  %v764_v49 = vsel %vm632_vm1, %v1434_v7, 0.0  ;;  %693 = vst.msk [vmem:[%s1970_s2 + $0x1e0] sm:$0xff] %vm632_vm1, %v1802_v18  ;;  %v1814_v60 = vpop.f32.mrb[30].mxu1 }
 0x117   :  { %v951_v16 = vsel %vm632_vm1, %v859_v5, 0.0  ;;  %v865_v51 = vmul.f32 %v1450_v14, %v1450_v14  ;;  %v959_v52 = vsel %vm632_vm1, %v863_v33, 0.0  ;;  %v866_v53 = vmul.f32 %v1493_v38, %v1493_v38  ;;  %696 = vst.msk [vmem:[%s1970_s2 + $0x1f8] sm:$0xff] %vm632_vm1, %v1814_v60 }
 0x118   :  { %v757_v21 = vadd.f32 %v756_v13, %v755_v9  ;;  %v952_v22 = vadd.f32 %v951_v16, %v950_v8  ;;  %v961_v7 = vsel %vm632_vm1, %v864_v41, 0.0  ;;  %v766_v58 = vsel %vm632_vm1, %v1450_v14, 0.0  ;;  %v1821_v14 = vpop.f32.mrb[31].mxu1 }
 0x119   :  { %v768_v59 = vsel %vm632_vm1, %v1493_v38, 0.0  ;;  %v963_v38 = vsel %vm632_vm1, %v865_v51, 0.0  ;;  %v965_v1 = vsel %vm632_vm1, %v866_v53, 0.0  ;;  %v867_v3 = vmul.f32 %v1513_v46, %v1513_v46  ;;  %694 = vst.msk [vmem:[%s1970_s2 + $0x1e8] sm:$0xff] %vm632_vm1, %v1821_v14 }
 0x11a   :  { %v954_v28 = vadd.f32 %v953_v24, %v952_v22  ;;  %v759_v29 = vadd.f32 %v758_v25, %v757_v21  ;;  %v868_v9 = vmul.f32 %v1486_v35, %v1486_v35  ;;  %v770_v13 = vsel %vm632_vm1, %v1513_v46, 0.0 }
 0x11b   :  { %v869_v21 = vmul.f32 %v1502_v42, %v1502_v42  ;;  %v967_v22 = vsel %vm632_vm1, %v867_v3, 0.0  ;;  %v870_v24 = vmul.f32 %v1545_v2, %v1545_v2  ;;  %v774_v46 = vsel %vm632_vm1, %v1502_v42, 0.0 }
 0x11c   :  { %v761_v36 = vadd.f32 %v760_v26, %v759_v29  ;;  %v956_v37 = vadd.f32 %v955_v10, %v954_v28  ;;  %v969_v28 = vsel %vm632_vm1, %v868_v9, 0.0  ;;  %v776_v29 = vsel %vm632_vm1, %v1545_v2, 0.0 }
 0x11d   :  { %v973_v33 = vsel %vm632_vm1, %v870_v24, 0.0  ;;  %v778_v42 = vsel %vm632_vm1, %v1565_v12, 0.0  ;;  %v780_v2 = vsel %vm632_vm1, %v1538_v63, 0.0  ;;  %v876_v3 = vmul.f32 %v1590_v31, %v1590_v31 }
 0x11e   :  { %v958_v47 = vadd.f32 %v957_v32, %v956_v37  ;;  %v763_v48 = vadd.f32 %v762_v43, %v761_v36  ;;  %v971_v32 = vsel %vm632_vm1, %v869_v21, 0.0  ;;  %v871_v36 = vmul.f32 %v1565_v12, %v1565_v12 }
 0x11f   :  { %v872_v43 = vmul.f32 %v1538_v63, %v1538_v63  ;;  %v782_v12 = vsel %vm632_vm1, %v1554_v6, 0.0  ;;  %v877_v9 = vmul.f32 %v1606_v40, %v1606_v40  ;;  %v985_v21 = vsel %vm632_vm1, %v876_v3, 0.0 }
 0x120   :  { %v765_v56 = vadd.f32 %v764_v49, %v763_v48  ;;  %v960_v57 = vadd.f32 %v959_v52, %v958_v47  ;;  %v873_v49 = vmul.f32 %v1554_v6, %v1554_v6  ;;  %v975_v51 = vsel %vm632_vm1, %v871_v36, 0.0 }
 0x121   :  { %v874_v52 = vmul.f32 %v1597_v34, %v1597_v34  ;;  %v786_v6 = vsel %vm632_vm1, %v1617_v45, 0.0 }
 0x122   :  { %v962_v61 = vadd.f32 %v961_v7, %v960_v57  ;;  %v767_v62 = vadd.f32 %v766_v58, %v765_v56  ;;  %v977_v57 = vsel %vm632_vm1, %v872_v43, 0.0  ;;  %v784_v7 = vsel %vm632_vm1, %v1597_v34, 0.0 }
 0x123   :  { %v788_v34 = vsel %vm632_vm1, %v1590_v31, 0.0 }
 0x124   :  { %v769_v5 = vadd.f32 %v768_v59, %v767_v62  ;;  %v964_v8 = vadd.f32 %v963_v38, %v962_v61  ;;  %v979_v59 = vsel %vm632_vm1, %v873_v49, 0.0  ;;  %v981_v61 = vsel %vm632_vm1, %v874_v52, 0.0 }
 0x125   :  { %v875_v62 = vmul.f32 %v1617_v45, %v1617_v45  ;;  %v790_v45 = vsel %vm632_vm1, %v1606_v40, 0.0  ;;  %v794_v40 = vsel %vm632_vm1, %v1669_v17, 0.0 }
 0x126   :  { %v966_v15 = vadd.f32 %v965_v1, %v964_v8  ;;  %v771_v16 = vadd.f32 %v770_v13, %v769_v5 }
 0x127   :  { %v983_v13 = vsel %vm632_vm1, %v875_v62, 0.0 }
 0x128   :  { %v773_v25 = vadd.f32 %v772_v19, %v771_v16  ;;  %v968_v26 = vadd.f32 %v967_v22, %v966_v15  ;;  %v878_v15 = vmul.f32 %v1649_v4, %v1649_v4  ;;  %v792_v22 = vsel %vm632_vm1, %v1649_v4, 0.0 }
 0x129   :  { %v796_v4 = vsel %vm632_vm1, %v1642_v0, 0.0 }
 0x12a   :  { %v970_v10 = vadd.f32 %v969_v28, %v968_v26  ;;  %v775_v35 = vadd.f32 %v774_v46, %v773_v25  ;;  %v987_v25 = vsel %vm632_vm1, %v877_v9, 0.0  ;;  %v989_v26 = vsel %vm632_vm1, %v878_v15, 0.0 }
 0x12b   :  { %v879_v28 = vmul.f32 %v1669_v17, %v1669_v17  ;;  %v798_v17 = vsel %vm632_vm1, %v1658_v11, 0.0  ;;  %v888_v9 = vmul.f32 %v1748_v20, %v1748_v20 }
 0x12c   :  { %v777_v37 = vadd.f32 %v776_v29, %v775_v35  ;;  %v972_v41 = vadd.f32 %v971_v32, %v970_v10  ;;  %v880_v10 = vmul.f32 %v1642_v0, %v1642_v0 }
 0x12d   :  { %v991_v36 = vsel %vm632_vm1, %v879_v28, 0.0 }
 0x12e   :  { %v974_v47 = vadd.f32 %v973_v33, %v972_v41  ;;  %v779_v48 = vadd.f32 %v778_v42, %v777_v37  ;;  %v881_v33 = vmul.f32 %v1658_v11, %v1658_v11  ;;  %v882_v37 = vmul.f32 %v1701_v44, %v1701_v44 }
 0x12f   :  { %v993_v42 = vsel %vm632_vm1, %v880_v10, 0.0  ;;  %v802_v11 = vsel %vm632_vm1, %v1721_v54, 0.0 }
 0x130   :  { %v781_v53 = vadd.f32 %v780_v2, %v779_v48  ;;  %v976_v56 = vadd.f32 %v975_v51, %v974_v47  ;;  %v800_v47 = vsel %vm632_vm1, %v1701_v44, 0.0  ;;  %v995_v2 = vsel %vm632_vm1, %v881_v33, 0.0 }
 0x131   :  { %v997_v49 = vsel %vm632_vm1, %v882_v37, 0.0  ;;  %v883_v51 = vmul.f32 %v1721_v54, %v1721_v54  ;;  %v804_v44 = vsel %vm632_vm1, %v1694_v39, 0.0  ;;  %v806_v54 = vsel %vm632_vm1, %v1710_v50, 0.0 }
 0x132   :  { %v978_v58 = vadd.f32 %v977_v57, %v976_v56  ;;  %v783_v63 = vadd.f32 %v782_v12, %v781_v53  ;;  %v884_v56 = vmul.f32 %v1694_v39, %v1694_v39 }
 0x134   :  { %v785_v38 = vadd.f32 %v784_v7, %v783_v63  ;;  %v980_v1 = vadd.f32 %v979_v59, %v978_v58  ;;  %v885_v7 = vmul.f32 %v1710_v50, %v1710_v50  ;;  %v999_v58 = vsel %vm632_vm1, %v883_v51, 0.0 }
 0x135   :  { %v886_v63 = vmul.f32 %v1755_v23, %v1755_v23  ;;  %v1001_v62 = vsel %vm632_vm1, %v884_v56, 0.0  ;;  %v810_v50 = vsel %vm632_vm1, %v1773_v30, 0.0 }
 0x136   :  { %v982_v5 = vadd.f32 %v981_v61, %v980_v1  ;;  %v787_v8 = vadd.f32 %v786_v6, %v785_v38  ;;  %v808_v38 = vsel %vm632_vm1, %v1755_v23, 0.0  ;;  %v1003_v3 = vsel %vm632_vm1, %v885_v7, 0.0 }
 0x137   :  { %v1005_v6 = vsel %vm632_vm1, %v886_v63, 0.0  ;;  %v812_v23 = vsel %vm632_vm1, %v1748_v20, 0.0 }
 0x138   :  { %v789_v16 = vadd.f32 %v788_v34, %v787_v8  ;;  %v984_v19 = vadd.f32 %v983_v13, %v982_v5  ;;  %v887_v5 = vmul.f32 %v1773_v30, %v1773_v30  ;;  %v814_v30 = vsel %vm632_vm1, %v1766_v27, 0.0 }
 0x13a   :  { %v986_v24 = vadd.f32 %v985_v21, %v984_v19  ;;  %v791_v31 = vadd.f32 %v790_v45, %v789_v16  ;;  %v889_v16 = vmul.f32 %v1766_v27, %v1766_v27  ;;  %v1007_v19 = vsel %vm632_vm1, %v887_v5, 0.0 }
 0x13b   :  { %v890_v21 = vmul.f32 %v1802_v18, %v1802_v18  ;;  %v818_v27 = vsel %vm632_vm1, %v1821_v14, 0.0 }
 0x13c   :  { %v793_v46 = vadd.f32 %v792_v22, %v791_v31  ;;  %v988_v29 = vadd.f32 %v987_v25, %v986_v24  ;;  %v1009_v24 = vsel %vm632_vm1, %v888_v9, 0.0  ;;  %v816_v31 = vsel %vm632_vm1, %v1802_v18, 0.0 }
 0x13d   :  { %v1013_v28 = vsel %vm632_vm1, %v890_v21, 0.0  ;;  %v820_v18 = vsel %vm632_vm1, %v1795_v55, 0.0 }
 0x13e   :  { %v990_v35 = vadd.f32 %v989_v26, %v988_v29  ;;  %v795_v32 = vadd.f32 %v794_v40, %v793_v46  ;;  %v1011_v26 = vsel %vm632_vm1, %v889_v16, 0.0  ;;  %v891_v46 = vmul.f32 %v1821_v14, %v1821_v14 }
 0x13f   :  { %v892_v40 = vmul.f32 %v1795_v55, %v1795_v55 }
 0x140   :  { %v797_v41 = vadd.f32 %v796_v4, %v795_v32  ;;  %v992_v43 = vadd.f32 %v991_v36, %v990_v35  ;;  %v893_v4 = vmul.f32 %v1814_v60, %v1814_v60  ;;  %v1015_v33 = vsel %vm632_vm1, %v891_v46, 0.0 }
 0x142   :  { %v994_v48 = vadd.f32 %v993_v42, %v992_v43  ;;  %v799_v0 = vadd.f32 %v798_v17, %v797_v41  ;;  %v1017_v41 = vsel %vm632_vm1, %v892_v40, 0.0  ;;  %v822_v43 = vsel %vm632_vm1, %v1814_v60, 0.0 }
 0x143   :  { %v1019_v14 = vsel %vm632_vm1, %v893_v4, 0.0 }
 0x144   :  { %v801_v52 = vadd.f32 %v800_v47, %v799_v0  ;;  %v996_v53 = vadd.f32 %v995_v2, %v994_v48 }
 0x146   :  { %v998_v57 = vadd.f32 %v997_v49, %v996_v53  ;;  %v803_v12 = vadd.f32 %v802_v11, %v801_v52 }
 0x148   :  { %v805_v59 = vadd.f32 %v804_v44, %v803_v12  ;;  %v1000_v61 = vadd.f32 %v999_v58, %v998_v57 }
 0x14a   :  { %v1002_v1 = vadd.f32 %v1001_v62, %v1000_v61  ;;  %v807_v39 = vadd.f32 %v806_v54, %v805_v59 }
 0x14c   :  { %v809_v8 = vadd.f32 %v808_v38, %v807_v39  ;;  %v1004_v34 = vadd.f32 %v1003_v3, %v1002_v1 }
 0x14e   :  { %v1006_v13 = vadd.f32 %v1005_v6, %v1004_v34  ;;  %v811_v15 = vadd.f32 %v810_v50, %v809_v8 }
 0x150   :  { %v813_v45 = vadd.f32 %v812_v23, %v811_v15  ;;  %v1008_v22 = vadd.f32 %v1007_v19, %v1006_v13 }
 0x152   :  { %v1010_v25 = vadd.f32 %v1009_v24, %v1008_v22  ;;  %v815_v20 = vadd.f32 %v814_v30, %v813_v45 }
 0x154   :  { %v817_v29 = vadd.f32 %v816_v31, %v815_v20  ;;  %v1012_v10 = vadd.f32 %v1011_v26, %v1010_v25 }
 0x156   :  { %v1014_v35 = vadd.f32 %v1013_v28, %v1012_v10  ;;  %v819_v32 = vadd.f32 %v818_v27, %v817_v29 }
 0x158   :  { %v821_v36 = vadd.f32 %v820_v18, %v819_v32  ;;  %v1016_v37 = vadd.f32 %v1015_v33, %v1014_v35 }
 0x15a   :  { %v823_v42 = vadd.f32 %v822_v43, %v821_v36  ;;  %v1018_v17 = vadd.f32 %v1017_v41, %v1016_v37 }
 0x15c   :  { %v824_v47 = vrot.slane %v823_v42, 4  ;;  %v1020_v48 = vadd.f32 %v1019_v14, %v1018_v17 }
 0x15e   :  { %v825_v0 = vadd.f32 %v824_v47, %v823_v42  ;;  %v1021_v55 = vrot.slane %v1020_v48, 4 }
 0x160   :  { %v826_v2 = vrot.slane %v825_v0, 2  ;;  %v1022_v49 = vadd.f32 %v1021_v55, %v1020_v48 }
 0x162   :  { %v827_v51 = vadd.f32 %v826_v2, %v825_v0  ;;  %v1023_v52 = vrot.slane %v1022_v49, 2 }
 0x164   :  { %v828_v53 = vrot.slane %v827_v51, 1  ;;  %v1024_v56 = vadd.f32 %v1023_v52, %v1022_v49 }
 0x166   :  { %v1025_v11 = vrot.slane %v1024_v56, 1  ;;  %v829_v57 = vadd.f32 %v828_v53, %v827_v51 }
 0x168   :  { %v1026_v12 = vadd.f32 %v1025_v11, %v1024_v56 }
 0x16a   :  { %v1028_v60 = vsel %vm1027_vm2, %v829_v57, %v1026_v12 }
 0x16b   :  { %1030 = vst.msk [vmem:[%s1971_s3] sm:$0x3] %vm1029_vm3, %v1028_v60 }

// kernel: bottleneck_forward.5
= control target key start
LH: loop header
LB: loop body
LE: loop exit
PB: predicated region body
PF: predicated region fallthrough
CT: control target
= control target key end

     0   :  { %s2001_s15 = smov 0   ;;  %s2568_s0 = inlined_call_operand.vmem [shape: f32[8,9,9,8], index: 0, kind: input, shape index: {}]   ;;  %s2569_s1 = inlined_call_operand.vmem [shape: f32[2,8], index: 1, kind: input, shape index: {}]   ;;  %s2570_s2 = inlined_call_operand.vmem [shape: bf16[9,8,8], index: 2, kind: input, shape index: {}]   ;;  %s2571_s3 = inlined_call_operand.vmem [shape: bf16[128,8], index: 3, kind: output, shape index: {0}]   ;;  %s2572_s4 = inlined_call_operand.vmem [shape: f32[2,2,8], index: 4, kind: output, shape index: {1}]  }
   0x1 LB: > { %s2007_s16 = sadd.s32 4294967295, %s1973_s15   ;;  %p1640_p0 = scmp.ge.s32.totalorder %s1973_s15, 1  ;;  %s1973_s15 = sphi %s2001_s15, %s15_s15  }
   0x2   : > { %p167_p1 = scmp.lt.s32.totalorder %s1973_s15, 3 }
   0x4   : > { %p168_p2 = pnand %p1640_p0, %p167_p1 }
   0x5   : > { %v1684_v0 = vld [vmem:[%s2570_s2 + $0x4] sm:$0xf] (!%p168_p2)  ;;  %vm544_vm0 = vcmask (!%p168_p2), 1043456   ;;  %v2017_v1 = vld [vmem:[%s2570_s2 + $0x10] sm:$0xf] (!%p168_p2)  ;;  %s1641_s21 = sshll.u32 (!%p168_p2), %s2007_s16, 2  ;;  %v218_v2 = vlaneseq (!%p168_p2) }
   0x6   : > { %171 = sbr.rel (%p168_p2) target bundleno = 356 (0x164), region = 32  ;;  %1947 = vmatprep.subr.msk.bf16.mxu1 (!%p168_p2), %vm544_vm0, %v1684_v0  ;;  %1951 = vmatprep.subr.msk.bf16.mxu0 (!%p168_p2), %vm544_vm0, %v2017_v1  ;;  %v546_v3 = vsel (!%p168_p2), %vm544_vm0, %v1684_v0, 0  ;;  %v2026_v4 = vsel (!%p168_p2), %vm544_vm0, %v2017_v1, 0  ;;  %p199_p3 = scmp.lt.s32.totalorder (!%p168_p2), %s1641_s21, 7  ;;  %v524_v6 = vld [vmem:[%s2570_s2] sm:$0xf] (!%p168_p2) }
   0x7   : > { %1792 = vmatpush3.bf16.msra.mxu1 (!%p168_p2), %v546_v3  ;;  %1832 = vmatpush3.bf16.msra.mxu0 (!%p168_p2), %v2026_v4  ;;  %v219_v5 = vshrl.u32 (!%p168_p2), %v218_v2, 7  ;;  %v1708_v7 = vld [vmem:[%s2570_s2 + $0x14] sm:$0xf] (!%p168_p2)  ;;  %v2040_v10 = vld [vmem:[%s2570_s2 + $0x18] sm:$0xf] (!%p168_p2)  ;;  %v2067_v17 = vsel (!%p168_p2), %vm544_vm0, %v524_v6, 0 }
   0x8   : > { %1948 = vmatprep.subr.msk.bf16.mxu1 (!%p168_p2), %vm544_vm0, %v524_v6  ;;  %1953 = vmatprep.subr.msk.bf16.mxu0 (!%p168_p2), %vm544_vm0, %v1708_v7  ;;  %v2045_v11 = vld [vmem:[%s2570_s2 + $0x8] sm:$0xf] (!%p168_p2)  ;;  %v2050_v12 = vld [vmem:[%s2569_s1] ss:$0 sm:$0xff] (!%p168_p2)  ;;  %v2060_v15 = vld [vmem:[%s2569_s1 + $0x1] ss:$0 sm:$0xff] (!%p168_p2) }
   0x9   : > { %v220_v8 = vadd.s32 (!%p168_p2), 8, %v219_v5  ;;  %v301_v9 = vmul.u32 (!%p168_p2), 2, %v219_v5  ;;  %v2070_v18 = vsel (!%p168_p2), %vm544_vm0, %v1708_v7, 0  ;;  %v2074_v19 = vsel (!%p168_p2), %vm544_vm0, %v2040_v10, 0  ;;  %s1643_s20 = sshll.u32 (!%p168_p2), %s2007_s16, 3  ;;  %p211_p5 = scmp.lt.s32.totalorder (!%p168_p2), %s2007_s16, 1 }
   0xa   : > { %vm531_vm6 = vcmask (!%p168_p2), 64512   ;;  %v2089_v25 = vsel (!%p168_p2), %vm544_vm0, %v2045_v11, 0  ;;  %v1975_v31 = vmov (!%p168_p2), 0.0   ;;  %vm709_vm11 = vcmask (!%p168_p2), 1046528   ;;  %p206_p4 = scmp.lt.s32.totalorder (!%p168_p2), %s1643_s20, 15 }
   0xb   : > { %v302_v13 = vmul.u32 (!%p168_p2), 2, %v220_v8  ;;  %vm303_vm1 = vcmp.ge.s32.totalorder (!%p168_p2), %v301_v9, 1  ;;  %vm309_vm2 = vcmp.le.s32.totalorder (!%p168_p2), %v301_v9, 16  ;;  %v378_v14 = vadd.s32 (!%p168_p2), 1, %v301_v9 }
   0xc   : > { %vm2062_vm3 = vmand (!%p168_p2), %vm303_vm1, %vm309_vm2  ;;  %vm1486_vm12 = vcmask (!%p168_p2), 60416   ;;  %vm1545_vm13 = vcmask (!%p168_p2), 1040384   ;;  %vm1547_vm14 = vcmask (!%p168_p2), 58368  }
   0xd   : > { %s2580_s21 = smov (!%p199_p3, %s1641_s21), 7  ;;  %vm2076_vm4 = vcmp.ge.s32.totalorder %v302_v13, 1  ;;  %vm2080_vm5 = vcmp.le.s32.totalorder %v302_v13, 16  ;;  %vm379_vm7 = vcmp.ge.s32.totalorder %v378_v14, 1  ;;  %v2098_v32 = vsel %vm2062_vm3, 1.0, %v1975_v31  ;;  %s2582_s20 = smov (!%p206_p4, %s1643_s20), 15 }
   0xe   : > { %s1957_s28 = smul.u32 144, %s2580_s21  ;;  %vm382_vm8 = vcmp.le.s32.totalorder %v378_v14, 16  ;;  %vm314_vm10 = vmand %vm2076_vm4, %vm2080_vm5  ;;  %s1644_s21 = sshll.u32 %s2582_s20, 2 }
   0xf   : > { %vm384_vm9 = vmand %vm379_vm7, %vm382_vm8  ;;  %v2139_v3 = vsel %vm314_vm10, 1.0, %v1975_v31  ;;  %s2526_s24 = scalar_lea.vmem %s2571_s3, %s1644_s21  ;;  %s2584_s16 = smov (!%p211_p5, %s2007_s16), 1 }
  0x10   : > { %s2055_s9 = scalar_lea.vmem %s2568_s0, %s1957_s28  ;;  %v2109_v42 = vsel %vm384_vm9, 1.0, %v1975_v31  ;;  %s1645_s25 = sshll.u32 %s2584_s16, 1 }
  0x11   : > { %v1650_v22 = vld [vmem:[%s2055_s9 + $0x90] sm:$0xff]  ;;  %v1651_v23 = vld [vmem:[%s2055_s9 + $0xa0] sm:$0xff]  ;;  %v1661_v9 = vld [vmem:[%s2055_s9 + $0x128] sm:$0x1]  ;;  %s214_s28 = scalar_lea.vmem %s2572_s4, %s1645_s25 }
  0x12   : > { %v1652_v24 = vld [vmem:[%s2055_s9 + $0xb0] sm:$0xff]  ;;  %v351_v26 = vmul.f32 %v1650_v22, %v2050_v12  ;;  %v352_v27 = vmul.f32 %v1651_v23, %v2050_v12  ;;  %v1677_v30 = vld [vmem:[%s2055_s9 + $0x1c0] sm:$0xff]  ;;  %v416_v31 = vmul.f32 %v1661_v9, %v2050_v12 }
  0x13   : > { %v353_v28 = vmul.f32 %v1652_v24, %v2050_v12  ;;  %v1676_v29 = vld [vmem:[%s2055_s9 + $0x1b0] sm:$0xff]  ;;  %v489_v34 = vmul.f32 %v1677_v30, %v2050_v12  ;;  %v1653_v35 = vld [vmem:[%s2055_s9 + $0xc0] sm:$0xff] }
  0x14   : > { %v488_v33 = vmul.f32 %v1676_v29, %v2050_v12  ;;  %v1678_v36 = vld [vmem:[%s2055_s9 + $0x1d0] sm:$0xff]  ;;  %v360_v37 = vadd.f32 %v2060_v15, %v351_v26  ;;  %v361_v38 = vadd.f32 %v2060_v15, %v352_v27  ;;  %v354_v40 = vmul.f32 %v1653_v35, %v2050_v12  ;;  %v1679_v41 = vld [vmem:[%s2055_s9 + $0x1e0] sm:$0xff]  ;;  %v1663_v27 = vld [vmem:[%s2055_s9 + $0x138] sm:$0x1] }
  0x15   : > { %v362_v39 = vadd.f32 %v2060_v15, %v353_v28  ;;  %v497_v44 = vadd.f32 %v2060_v15, %v489_v34  ;;  %v490_v45 = vmul.f32 %v1678_v36, %v2050_v12  ;;  %v491_v52 = vmul.f32 %v1679_v41, %v2050_v12  ;;  %v1654_v54 = vld [vmem:[%s2055_s9 + $0xd0] sm:$0xff]  ;;  %v1655_v59 = vld [vmem:[%s2055_s9 + $0xe0] sm:$0xff]  ;;  %v2173_v41 = vld [vmem:[%s2570_s2 + $0x1c] sm:$0xf] }
  0x16   : > { %v496_v43 = vadd.f32 %v2060_v15, %v488_v33  ;;  %v369_v46 = vmax.f32 %v360_v37, 0.0  ;;  %v370_v47 = vmax.f32 %v361_v38, 0.0  ;;  %v363_v49 = vadd.f32 %v2060_v15, %v354_v40  ;;  %v1656_v0 = vld [vmem:[%s2055_s9 + $0xf0] sm:$0xff]  ;;  %v1657_v2 = vld [vmem:[%s2055_s9 + $0x100] sm:$0xff] }
  0x17   : > { %v371_v48 = vmax.f32 %v362_v39, 0.0  ;;  %v505_v51 = vmax.f32 %v497_v44, 0.0  ;;  %v498_v53 = vadd.f32 %v2060_v15, %v490_v45  ;;  %v499_v62 = vadd.f32 %v2060_v15, %v491_v52  ;;  %v1660_v8 = vld [vmem:[%s2055_s9 + $0x120] sm:$0xff]  ;;  %v1662_v21 = vld [vmem:[%s2055_s9 + $0x130] sm:$0xff] }
  0x18   : > { %v504_v50 = vmax.f32 %v496_v43, 0.0  ;;  %v389_v55 = vmul.f32 0.0, %v369_v46  ;;  %v2123_v56 = vmul.f32 %v2109_v42, %v370_v47  ;;  %v372_v58 = vmax.f32 %v363_v49, 0.0 }
  0x19   : > { %v2126_v57 = vmul.f32 %v2109_v42, %v371_v48  ;;  %v513_v61 = vmul.f32 %v2109_v42, %v505_v51  ;;  %v506_v63 = vmax.f32 %v498_v53, 0.0  ;;  %v355_v7 = vmul.f32 %v1654_v54, %v2050_v12  ;;  %v1665_v51 = vld [vmem:[%s2055_s9 + $0x148] sm:$0x1]  ;;  %v1666_v54 = vld [vmem:[%s2055_s9 + $0x150] sm:$0xff] }
  0x1a   : > { %v512_v60 = vmul.f32 %v2109_v42, %v504_v50  ;;  %v525_v5 = vpack.c.bf16 %v2123_v56, %v389_v55  ;;  %v2143_v6 = vmul.f32 %v2109_v42, %v372_v58  ;;  %v507_v14 = vmax.f32 %v499_v62, 0.0  ;;  %v1664_v50 = vld [vmem:[%s2055_s9 + $0x140] sm:$0xff] }
  0x1b   : > { %v514_v16 = vmul.f32 %v2109_v42, %v506_v63  ;;  %v356_v20 = vmul.f32 %v1655_v59, %v2050_v12  ;;  %v364_v23 = vadd.f32 %v2060_v15, %v355_v7  ;;  %v357_v24 = vmul.f32 %v1656_v0, %v2050_v12 }
  0x1c   : > { %v930_v13 = vpack.c.bf16 %v513_v61, %v512_v60  ;;  %1793 = vmatprep.mubr.msk.bf16.mxu1 %vm531_vm6, %v525_v5  ;;  %v526_v22 = vpack.c.bf16 %v2143_v6, %v2126_v57  ;;  %v358_v26 = vmul.f32 %v1657_v2, %v2050_v12  ;;  %v515_v28 = vmul.f32 %v2109_v42, %v507_v14  ;;  %v1667_v61 = vld [vmem:[%s2055_s9 + $0x158] sm:$0x1]  ;;  %v221_v5 = vld [vmem:[%s2055_s9] sm:$0xff] }
  0x1d   : > { %v365_v29 = vadd.f32 %v2060_v15, %v356_v20  ;;  %v415_v30 = vmul.f32 %v1660_v8, %v2050_v12  ;;  %v373_v33 = vmax.f32 %v364_v23, 0.0  ;;  %v366_v34 = vadd.f32 %v2060_v15, %v357_v24 }
  0x1e   : > { %1833 = vmatprep.mubr.msk.bf16.mxu0 %vm531_vm6, %v930_v13  ;;  %1794 = vmatmul.mubr.msk.bf16.vlgmr.msra.gmra.mrb[0].mxu1 %vm531_vm6, %v526_v22  ;;  %v367_v35 = vadd.f32 %v2060_v15, %v358_v26  ;;  %v417_v36 = vmul.f32 %v1662_v21, %v2050_v12  ;;  %v931_v37 = vpack.c.bf16 %v515_v28, %v514_v16  ;;  %v2199_v55 = vsel %vm544_vm0, %v2173_v41, 0  ;;  %v223_v21 = vld [vmem:[%s2055_s9 + $0x10] sm:$0xff] }
  0x1f   : > { %1802 = vmatpush3.bf16.msra.mxu1 %v2067_v17  ;;  %v374_v38 = vmax.f32 %v365_v29, 0.0  ;;  %v418_v39 = vmul.f32 %v1663_v27, %v2050_v12  ;;  %v431_v40 = vadd.f32 %v2060_v15, %v415_v30  ;;  %v2176_v43 = vmul.f32 %v2109_v42, %v373_v33 }
  0x20   : > { %v375_v44 = vmax.f32 %v366_v34, 0.0  ;;  %v376_v45 = vmax.f32 %v367_v35, 0.0  ;;  %v432_v17 = vadd.f32 %v2060_v15, %v416_v31  ;;  %1949 = vmatprep.subr.msk.bf16.mxu1 %vm544_vm0, %v2045_v11  ;;  %1834 = vmatmul.mubr.msk.bf16.vlgmr.msra.gmra.mrb[0].mxu0 %vm531_vm6, %v931_v37  ;;  %v433_v47 = vadd.f32 %v2060_v15, %v417_v36  ;;  %v225_v31 = vld [vmem:[%s2055_s9 + $0x20] sm:$0xff]  ;;  %v227_v37 = vld [vmem:[%s2055_s9 + $0x30] sm:$0xff] }
  0x21   : > { %v2183_v46 = vmul.f32 %v2109_v42, %v374_v38  ;;  %v434_v48 = vadd.f32 %v2060_v15, %v418_v39  ;;  %v447_v49 = vmax.f32 %v431_v40, 0.0  ;;  %1842 = vmatpush3.bf16.msra.mxu0 %v2070_v18  ;;  %v419_v0 = vmul.f32 %v1664_v50, %v2050_v12 }
  0x22   : > { %v2191_v52 = vmul.f32 %v2109_v42, %v375_v44  ;;  %v2194_v11 = vmul.f32 %v2109_v42, %v376_v45  ;;  %v448_v53 = vmax.f32 %v432_v17, 0.0  ;;  %v449_v59 = vmax.f32 %v433_v47, 0.0  ;;  %1954 = vmatprep.subr.msk.bf16.mxu0 %vm544_vm0, %v2040_v10 }
  0x23   : > { %v527_v58 = vpack.c.bf16 %v2183_v46, %v2176_v43  ;;  %v450_v60 = vmax.f32 %v434_v48, 0.0  ;;  %v2204_v18 = vmul.f32 %v2098_v32, %v447_v49  ;;  %v420_v2 = vmul.f32 %v1665_v51, %v2050_v12  ;;  %v1668_v49 = vld [vmem:[%s2055_s9 + $0x160] sm:$0xff] }
  0x24   : > { %v528_v62 = vpack.c.bf16 %v2194_v11, %v2191_v52  ;;  %v464_v63 = vmul.f32 %v2139_v3, %v448_v53  ;;  %v2217_v7 = vmul.f32 %v2098_v32, %v449_v59  ;;  %v421_v9 = vmul.f32 %v1666_v54, %v2050_v12  ;;  %v2255_v59 = vld [vmem:[%s2570_s2 + $0xc] sm:$0xf] }
  0x25   : > { %1797 = vmatprep.mubr.msk.bf16.mxu1 %vm531_vm6, %v527_v58  ;;  %v466_v8 = vmul.f32 %v2139_v3, %v450_v60  ;;  %v1040_v10 = vrot.slane %v2204_v18, 1  ;;  %v422_v14 = vmul.f32 %v1667_v61, %v2050_v12  ;;  %v435_v16 = vadd.f32 %v2060_v15, %v419_v0  ;;  %v1669_v58 = vld [vmem:[%s2055_s9 + $0x168] sm:$0x1]  ;;  %v1670_v0 = vld [vmem:[%s2055_s9 + $0x170] sm:$0xff] }
  0x26   : > { %1798 = vmatmul.mubr.msk.bf16.gmra.mrb[4].mxu1 %vm531_vm6, %v528_v62  ;;  %v1041_v13 = vrot.slane %v464_v63, 1  ;;  %v436_v20 = vadd.f32 %v2060_v15, %v420_v2  ;;  %v1043_v22 = vrot.slane %v2217_v7, 1  ;;  %v437_v24 = vadd.f32 %v2060_v15, %v421_v9  ;;  %v1671_v2 = vld [vmem:[%s2055_s9 + $0x178] sm:$0x1] }
  0x27   : > { %v1044_v23 = vrot.slane %v466_v8, 1  ;;  %v243_v26 = vmul.f32 %v2050_v12, %v221_v5  ;;  %v438_v28 = vadd.f32 %v2060_v15, %v422_v14  ;;  %v451_v29 = vmax.f32 %v435_v16, 0.0 }
  0x28   : > { %v1042_v27 = vsel %vm709_vm11, %v1040_v10, %v1041_v13  ;;  %v452_v30 = vmax.f32 %v436_v20, 0.0  ;;  %v453_v34 = vmax.f32 %v437_v24, 0.0  ;;  %v245_v35 = vmul.f32 %v2050_v12, %v223_v21 }
  0x29   : > { %v1045_v33 = vsel %vm709_vm11, %v1043_v22, %v1044_v23  ;;  %v265_v36 = vadd.f32 %v2060_v15, %v243_v26  ;;  %v454_v39 = vmax.f32 %v438_v28, 0.0  ;;  %v2238_v40 = vmul.f32 %v2098_v32, %v451_v29  ;;  %v1672_v26 = vld [vmem:[%s2055_s9 + $0x180] sm:$0xff]  ;;  %v1674_v28 = vld [vmem:[%s2055_s9 + $0x190] sm:$0xff] }
  0x2a   : > { %v1072_v38 = vpack.c.bf16 %v1045_v33, %v1042_v27  ;;  %v468_v44 = vmul.f32 %v2139_v3, %v452_v30  ;;  %v2242_v45 = vmul.f32 %v2098_v32, %v453_v34  ;;  %v267_v17 = vadd.f32 %v2060_v15, %v245_v35  ;;  %v1673_v27 = vld [vmem:[%s2055_s9 + $0x188] sm:$0x1] }
  0x2b   : > { %v283_v47 = vmax.f32 %v265_v36, 0.0  ;;  %v247_v48 = vmul.f32 %v2050_v12, %v225_v31  ;;  %v470_v50 = vmul.f32 %v2139_v3, %v454_v39  ;;  %v1046_v51 = vrot.slane %v2238_v40, 1 }
  0x2c   : > { %1843 = vmatprep.mubr.msk.bf16.mxu0 %vm531_vm6, %v1072_v38  ;;  %v1047_v53 = vrot.slane %v468_v44, 1  ;;  %v249_v54 = vmul.f32 %v2050_v12, %v227_v37  ;;  %v1049_v60 = vrot.slane %v2242_v45, 1  ;;  %v285_v61 = vmax.f32 %v267_v17, 0.0  ;;  %v1675_v38 = vld [vmem:[%s2055_s9 + $0x198] sm:$0x1] }
  0x2d   : > { %v2258_v62 = vmul.f32 0.0, %v283_v47  ;;  %v269_v63 = vadd.f32 %v2060_v15, %v247_v48  ;;  %v1050_v8 = vrot.slane %v470_v50, 1  ;;  %v423_v9 = vmul.f32 %v1668_v49, %v2050_v12 }
  0x2e   : > { %v1048_v5 = vsel %vm709_vm11, %v1046_v51, %v1047_v53  ;;  %v271_v10 = vadd.f32 %v2060_v15, %v249_v54  ;;  %v2267_v13 = vmul.f32 %v2098_v32, %v285_v61  ;;  %v424_v16 = vmul.f32 %v1669_v58, %v2050_v12 }
  0x2f   : > { %v287_v14 = vmax.f32 %v269_v63, 0.0  ;;  %v2272_v20 = vsel %vm544_vm0, %v2255_v59, 0  ;;  %v1051_v21 = vsel %vm709_vm11, %v1049_v60, %v1050_v8  ;;  %v425_v23 = vmul.f32 %v1670_v0, %v2050_v12 }
  0x30   : > { %v289_v22 = vmax.f32 %v271_v10, 0.0  ;;  %v426_v24 = vmul.f32 %v1671_v2, %v2050_v12  ;;  %v1073_v29 = vpack.c.bf16 %v1051_v21, %v1048_v5  ;;  %v520_v30 = vpack.c.bf16 %v2267_v13, %v2258_v62  ;;  %v229_v2 = vld [vmem:[%s2055_s9 + $0x40] sm:$0xff] }
  0x31   : > { %v2283_v31 = vmul.f32 %v2098_v32, %v287_v14  ;;  %v439_v33 = vadd.f32 %v2060_v15, %v423_v9  ;;  %v440_v35 = vadd.f32 %v2060_v15, %v424_v16  ;;  %v441_v36 = vadd.f32 %v2060_v15, %v425_v23  ;;  %v231_v9 = vld [vmem:[%s2055_s9 + $0x50] sm:$0xff] }
  0x32   : > { %v2287_v34 = vmul.f32 %v2098_v32, %v289_v22  ;;  %v442_v37 = vadd.f32 %v2060_v15, %v426_v24  ;;  %1844 = vmatmul.mubr.msk.bf16.vlgmr.msra.gmra.mrb[0].mxu0 %vm531_vm6, %v1073_v29  ;;  %1803 = vmatprep.mubr.msk.bf16.mxu1 %vm531_vm6, %v520_v30  ;;  %v427_v44 = vmul.f32 %v1672_v26, %v2050_v12 }
  0x33   : > { %v455_v39 = vmax.f32 %v439_v33, 0.0  ;;  %v428_v17 = vmul.f32 %v1673_v27, %v2050_v12  ;;  %v429_v47 = vmul.f32 %v1674_v28, %v2050_v12  ;;  %1852 = vmatpush3.bf16.msra.mxu0 %v2074_v19  ;;  %v456_v49 = vmax.f32 %v440_v35, 0.0  ;;  %v233_v27 = vld [vmem:[%s2055_s9 + $0x60] sm:$0xff] }
  0x34   : > { %v521_v48 = vpack.c.bf16 %v2287_v34, %v2283_v31  ;;  %v457_v50 = vmax.f32 %v441_v36, 0.0  ;;  %v458_v51 = vmax.f32 %v442_v37, 0.0  ;;  %v430_v54 = vmul.f32 %v1675_v38, %v2050_v12  ;;  %1955 = vmatprep.subr.msk.bf16.mxu0 %vm544_vm0, %v2173_v41 }
  0x35   : > { %v2302_v53 = vmul.f32 %v2098_v32, %v455_v39  ;;  %v443_v58 = vadd.f32 %v2060_v15, %v427_v44  ;;  %v444_v60 = vadd.f32 %v2060_v15, %v428_v17  ;;  %v472_v19 = vmul.f32 %v2139_v3, %v456_v49  ;;  %v222_v39 = vld [vmem:[%s2055_s9 + $0x8] sm:$0x1]  ;;  %v224_v49 = vld [vmem:[%s2055_s9 + $0x18] sm:$0x1] }
  0x36   : > { %1804 = vmatmul.mubr.msk.bf16.vlgmr.msra.gmra.mrb[0].mxu1 %vm531_vm6, %v521_v48  ;;  %v2312_v61 = vmul.f32 %v2098_v32, %v457_v50  ;;  %v474_v63 = vmul.f32 %v2139_v3, %v458_v51  ;;  %v445_v0 = vadd.f32 %v2060_v15, %v429_v47  ;;  %v446_v8 = vadd.f32 %v2060_v15, %v430_v54 }
  0x37   : > { %1812 = vmatpush3.bf16.msra.mxu1 %v2089_v25  ;;  %v1052_v5 = vrot.slane %v2302_v53, 1  ;;  %v459_v41 = vmax.f32 %v443_v58, 0.0  ;;  %v460_v10 = vmax.f32 %v444_v60, 0.0  ;;  %v1053_v14 = vrot.slane %v472_v19, 1 }
  0x38   : > { %v1055_v16 = vrot.slane %v2312_v61, 1  ;;  %v1056_v21 = vrot.slane %v474_v63, 1  ;;  %v461_v22 = vmax.f32 %v445_v0, 0.0  ;;  %1950 = vmatprep.subr.msk.bf16.mxu1 %vm544_vm0, %v2255_v59  ;;  %v462_v23 = vmax.f32 %v446_v8, 0.0  ;;  %v235_v59 = vld [vmem:[%s2055_s9 + $0x70] sm:$0xff] }
  0x39   : > { %v2325_v25 = vmul.f32 %v2098_v32, %v459_v41  ;;  %v476_v24 = vmul.f32 %v2139_v3, %v460_v10  ;;  %v251_v26 = vmul.f32 %v2050_v12, %v229_v2  ;;  %v1054_v28 = vsel %vm709_vm11, %v1052_v5, %v1053_v14  ;;  %v226_v2 = vld [vmem:[%s2055_s9 + $0x28] sm:$0x1]  ;;  %v228_v10 = vld [vmem:[%s2055_s9 + $0x38] sm:$0x1] }
  0x3a   : > { %v1057_v29 = vsel %vm709_vm11, %v1055_v16, %v1056_v21  ;;  %v2333_v30 = vmul.f32 %v2098_v32, %v461_v22  ;;  %v253_v33 = vmul.f32 %v2050_v12, %v231_v9  ;;  %v478_v36 = vmul.f32 %v2139_v3, %v462_v23 }
  0x3b   : > { %v1074_v35 = vpack.c.bf16 %v1057_v29, %v1054_v28  ;;  %v1058_v37 = vrot.slane %v2325_v25, 1  ;;  %v1059_v38 = vrot.slane %v476_v24, 1  ;;  %v273_v17 = vadd.f32 %v2060_v15, %v251_v26 }
  0x3c   : > { %v1061_v44 = vrot.slane %v2333_v30, 1  ;;  %v275_v47 = vadd.f32 %v2060_v15, %v253_v33  ;;  %v255_v48 = vmul.f32 %v2050_v12, %v233_v27  ;;  %v710_v50 = vrot.slane %v2258_v62, 1 }
  0x3d   : > { %1847 = vmatprep.mubr.msk.bf16.mxu0 %vm531_vm6, %v1074_v35  ;;  %v1060_v51 = vsel %vm709_vm11, %v1058_v37, %v1059_v38  ;;  %v1062_v54 = vrot.slane %v478_v36, 1  ;;  %v257_v58 = vmul.f32 %v2050_v12, %v235_v59  ;;  %v291_v60 = vmax.f32 %v273_v17, 0.0  ;;  %v237_v59 = vld [vmem:[%s2055_s9 + $0x80] sm:$0xff] }
  0x3e   : > { %v293_v19 = vmax.f32 %v275_v47, 0.0  ;;  %v277_v63 = vadd.f32 %v2060_v15, %v255_v48  ;;  %v244_v0 = vmul.f32 %v2050_v12, %v222_v39  ;;  %v1166_v62 = vpack.c.bf16 %v2283_v31, %v2267_v13  ;;  %v230_v39 = vld [vmem:[%s2055_s9 + $0x48] sm:$0x1] }
  0x3f   : > { %v1063_v5 = vsel %vm709_vm11, %v1061_v44, %v1062_v54  ;;  %v279_v8 = vadd.f32 %v2060_v15, %v257_v58  ;;  %v246_v41 = vmul.f32 %v2050_v12, %v224_v49  ;;  %v2359_v14 = vmul.f32 %v2098_v32, %v291_v60  ;;  %v232_v44 = vld [vmem:[%s2055_s9 + $0x58] sm:$0x1] }
  0x40   : > { %v1075_v9 = vpack.c.bf16 %v1063_v5, %v1060_v51  ;;  %v2362_v16 = vmul.f32 %v2098_v32, %v293_v19  ;;  %v295_v21 = vmax.f32 %v277_v63, 0.0  ;;  %v266_v23 = vadd.f32 %v2060_v15, %v244_v0 }
  0x41   : > { %v297_v22 = vmax.f32 %v279_v8, 0.0  ;;  %v268_v24 = vadd.f32 %v2060_v15, %v246_v41  ;;  %v248_v26 = vmul.f32 %v2050_v12, %v226_v2  ;;  %v713_v29 = vrot.slane %v2267_v13, 1 }
  0x42   : > { %1848 = vmatmul.mubr.msk.bf16.gmra.mrb[4].mxu0 %vm531_vm6, %v1075_v9  ;;  %v522_v27 = vpack.c.bf16 %v2362_v16, %v2359_v14  ;;  %v2371_v28 = vmul.f32 %v2098_v32, %v295_v21  ;;  %v250_v33 = vmul.f32 %v2050_v12, %v228_v10  ;;  %v284_v36 = vmax.f32 %v266_v23, 0.0  ;;  %v234_v9 = vld [vmem:[%s2055_s9 + $0x68] sm:$0x1]  ;;  %v236_v21 = vld [vmem:[%s2055_s9 + $0x78] sm:$0x1] }
  0x43   : > { %v2377_v35 = vmul.f32 %v2098_v32, %v297_v22  ;;  %1853 = vmatprep.mubr.msk.bf16.mxu0 %vm531_vm6, %v1166_v62  ;;  %v286_v37 = vmax.f32 %v268_v24, 0.0  ;;  %v270_v38 = vadd.f32 %v2060_v15, %v248_v26  ;;  %v1167_v17 = vpack.c.bf16 %v2359_v14, %v2287_v34 }
  0x44   : > { %1807 = vmatprep.mubr.msk.bf16.mxu1 %vm531_vm6, %v522_v27  ;;  %v272_v13 = vadd.f32 %v2060_v15, %v250_v33  ;;  %v716_v47 = vrot.slane %v2283_v31, 1  ;;  %v719_v48 = vrot.slane %v2287_v34, 1  ;;  %v324_v51 = vmul.f32 0.0, %v284_v36  ;;  %v1723_v27 = vld [vmem:[%s2570_s2 + $0x20] sm:$0xf] }
  0x45   : > { %v523_v49 = vpack.c.bf16 %v2377_v35, %v2371_v28  ;;  %v326_v54 = vmul.f32 %v2139_v3, %v286_v37  ;;  %v288_v58 = vmax.f32 %v270_v38, 0.0  ;;  %v259_v19 = vmul.f32 %v2050_v12, %v237_v59 }
  0x46   : > { %v290_v60 = vmax.f32 %v272_v13, 0.0  ;;  %v252_v63 = vmul.f32 %v2050_v12, %v230_v39  ;;  %v254_v0 = vmul.f32 %v2050_v12, %v232_v44  ;;  %v711_v31 = vrot.slane %v324_v51, 1 }
  0x47   : > { %1808 = vmatmul.mubr.msk.bf16.gmra.mrb[4].mxu1 %vm531_vm6, %v523_v49  ;;  %v714_v34 = vrot.slane %v326_v54, 1  ;;  %v328_v2 = vmul.f32 %v2139_v3, %v288_v58  ;;  %v1168_v5 = vpack.c.bf16 %v2371_v28, %v2362_v16  ;;  %v281_v62 = vadd.f32 %v2060_v15, %v259_v19  ;;  %v1658_v19 = vld [vmem:[%s2055_s9 + $0x110] sm:$0xff] }
  0x48   : > { %v330_v8 = vmul.f32 %v2139_v3, %v290_v60  ;;  %v274_v41 = vadd.f32 %v2060_v15, %v252_v63  ;;  %v276_v10 = vadd.f32 %v2060_v15, %v254_v0  ;;  %v712_v22 = vsel %vm709_vm11, %v710_v50, %v711_v31 }
  0x49   : > { %v2407_v23 = vsel %vm709_vm11, %v713_v29, %v714_v34  ;;  %v717_v24 = vrot.slane %v328_v2, 1  ;;  %v722_v26 = vrot.slane %v2359_v14, 1  ;;  %v299_v36 = vmax.f32 %v281_v62, 0.0  ;;  %v1680_v2 = vld [vmem:[%s2055_s9 + $0x1f0] sm:$0xff] }
  0x4a   : > { %1854 = vmatmul.mubr.msk.bf16.vlgmr.msra.gmra.mrb[0].mxu0 %vm531_vm6, %v1167_v17  ;;  %v742_v33 = vpack.c.bf16 %v2407_v23, %v712_v22  ;;  %v720_v59 = vrot.slane %v330_v8, 1  ;;  %v292_v37 = vmax.f32 %v274_v41, 0.0  ;;  %v294_v29 = vmax.f32 %v276_v10, 0.0  ;;  %v238_v8 = vld [vmem:[%s2055_s9 + $0x88] sm:$0x1] }
  0x4b   : > { %1862 = vmatpush3.bf16.msra.mxu0 %v2199_v55  ;;  %v2417_v50 = vsel %vm709_vm11, %v716_v47, %v717_v24  ;;  %1857 = vmatprep.mubr.msk.bf16.mxu0 %vm531_vm6, %v1168_v5  ;;  %v256_v14 = vmul.f32 %v2050_v12, %v234_v9  ;;  %v258_v38 = vmul.f32 %v2050_v12, %v236_v21  ;;  %v725_v17 = vrot.slane %v2362_v16, 1  ;;  %v1681_v5 = vld [vmem:[%s2055_s9 + $0x200] sm:$0xff] }
  0x4c   : > { %1813 = vmatprep.mubr.msk.bf16.mxu1 %vm531_vm6, %v742_v33  ;;  %v2424_v39 = vsel %vm709_vm11, %v719_v48, %v720_v59  ;;  %v2427_v44 = vmul.f32 %v2098_v32, %v299_v36  ;;  %v332_v55 = vmul.f32 %v2139_v3, %v292_v37  ;;  %1956 = vmatprep.subr.msk.bf16.mxu0 %vm544_vm0, %v1723_v27  ;;  %v728_v0 = vrot.slane %v2371_v28, 1 }
  0x4d   : > { %v743_v13 = vpack.c.bf16 %v2424_v39, %v2417_v50  ;;  %v334_v47 = vmul.f32 %v2139_v3, %v294_v29  ;;  %v278_v49 = vadd.f32 %v2060_v15, %v256_v14  ;;  %v280_v48 = vadd.f32 %v2060_v15, %v258_v38 }
  0x4e   : > { %v1169_v51 = vpack.c.bf16 %v2427_v44, %v2377_v35  ;;  %v723_v32 = vrot.slane %v332_v55, 1  ;;  %v1260_v54 = vpack.c.bf16 %v2126_v57, %v2123_v56  ;;  %v731_v34 = vrot.slane %v2377_v35, 1 }
  0x4f   : > { %1814 = vmatmul.mubr.msk.bf16.vlgmr.msra.gmra.mrb[0].mxu1 %vm531_vm6, %v743_v13  ;;  %v726_v16 = vrot.slane %v334_v47, 1  ;;  %v296_v58 = vmax.f32 %v278_v49, 0.0  ;;  %v298_v60 = vmax.f32 %v280_v48, 0.0  ;;  %v359_v28 = vmul.f32 %v1658_v19, %v2050_v12  ;;  %v1683_v13 = vld [vmem:[%s2055_s9 + $0x220] sm:$0xff] }
  0x50   : > { %1822 = vmatpush3.bf16.msra.mxu1 %v2272_v20  ;;  %v2445_v63 = vsel %vm709_vm11, %v722_v26, %v723_v32  ;;  %v836_v35 = vpack.c.bf16 %v2217_v7, %v2204_v18  ;;  %v492_v10 = vmul.f32 %v1680_v2, %v2050_v12  ;;  %v493_v22 = vmul.f32 %v1681_v5, %v2050_v12 }
  0x51   : > { %v2449_v31 = vsel %vm709_vm11, %v725_v17, %v726_v16  ;;  %v336_v56 = vmul.f32 %v2139_v3, %v296_v58  ;;  %v338_v57 = vmul.f32 %v2139_v3, %v298_v60  ;;  %1952 = vmatprep.subr.msk.bf16.mxu1 %vm544_vm0, %v2017_v1  ;;  %v368_v1 = vadd.f32 %v2060_v15, %v359_v28  ;;  %v1682_v17 = vld [vmem:[%s2055_s9 + $0x210] sm:$0xff] }
  0x52   : > { %1858 = vmatmul.mubr.msk.bf16.gmra.mrb[4].mxu0 %vm531_vm6, %v1169_v51  ;;  %v744_v20 = vpack.c.bf16 %v2449_v31, %v2445_v63  ;;  %v260_v24 = vmul.f32 %v2050_v12, %v238_v8  ;;  %v1261_v26 = vpack.c.bf16 %v2176_v43, %v2143_v6  ;;  %v1262_v18 = vpack.c.bf16 %v2191_v52, %v2183_v46 }
  0x53   : > { %v729_v62 = vrot.slane %v336_v56, 1  ;;  %v732_v41 = vrot.slane %v338_v57, 1  ;;  %1863 = vmatprep.mubr.msk.bf16.mxu0 %vm531_vm6, %v1260_v54  ;;  %v377_v59 = vmax.f32 %v368_v1, 0.0  ;;  %v1379_v36 = vsel %vm544_vm0, %v1723_v27, 0 }
  0x54   : > { %1817 = vmatprep.mubr.msk.bf16.mxu1 %vm531_vm6, %v744_v20  ;;  %v282_v7 = vadd.f32 %v2060_v15, %v260_v24  ;;  %v500_v37 = vadd.f32 %v2060_v15, %v492_v10  ;;  %v501_v29 = vadd.f32 %v2060_v15, %v493_v22  ;;  %v1356_v46 = vrot.slane %v2427_v44, 1 }
  0x55   : > { %v730_v9 = vsel %vm709_vm11, %v728_v0, %v729_v62  ;;  %v733_v21 = vsel %vm709_vm11, %v731_v34, %v732_v41  ;;  %v397_v43 = vmul.f32 %v2109_v42, %v377_v59  ;;  %v837_v27 = vpack.c.bf16 %v2242_v45, %v2238_v40 }
  0x56   : > { %v745_v33 = vpack.c.bf16 %v733_v21, %v730_v9  ;;  %v300_v6 = vmax.f32 %v282_v7, 0.0  ;;  %v838_v14 = vpack.c.bf16 %v2312_v61, %v2302_v53  ;;  %v508_v38 = vmax.f32 %v500_v37, 0.0 }
  0x57   : > { %v509_v55 = vmax.f32 %v501_v29, 0.0  ;;  %v1263_v49 = vpack.c.bf16 %v397_v43, %v2194_v11  ;;  %v1360_v44 = vpack.c.bf16 %v2417_v50, %v2407_v23  ;;  %v495_v40 = vmul.f32 %v1683_v13, %v2050_v12 }
  0x58   : > { %1818 = vmatmul.mubr.msk.bf16.gmra.mrb[4].mxu1 %vm531_vm6, %v745_v33  ;;  %v340_v52 = vmul.f32 %v2139_v3, %v300_v6  ;;  %v494_v3 = vmul.f32 %v1682_v17, %v2050_v12  ;;  %v516_v45 = vmul.f32 %v2109_v42, %v508_v38  ;;  %v839_v11 = vpack.c.bf16 %v2333_v30, %v2325_v25 }
  0x59   : > { %1823 = vmatprep.mubr.msk.bf16.mxu1 %vm531_vm6, %v836_v35  ;;  %v517_v53 = vmul.f32 %v2109_v42, %v509_v55  ;;  %v503_v23 = vadd.f32 %v2060_v15, %v495_v40  ;;  %v1362_v50 = vpack.c.bf16 %v730_v9, %v2449_v31 }
  0x5a   : > { %1864 = vmatmul.mubr.msk.bf16.vlgmr.msra.gmra.mrb[0].mxu0 %vm531_vm6, %v1261_v26  ;;  %v1357_v47 = vrot.slane %v340_v52, 1  ;;  %v502_v61 = vadd.f32 %v2060_v15, %v494_v3 }
  0x5b   : > { %1872 = vmatpush3.bf16.msra.mxu0 %v1379_v36  ;;  %1867 = vmatprep.mubr.msk.bf16.mxu0 %vm531_vm6, %v1262_v18  ;;  %v932_v12 = vpack.c.bf16 %v517_v53, %v516_v45  ;;  %v511_v32 = vmax.f32 %v503_v23, 0.0 }
  0x5c   : > { %v1358_v48 = vsel %vm709_vm11, %v1356_v46, %v1357_v47  ;;  %v510_v51 = vmax.f32 %v502_v61, 0.0 }
  0x5d   : > { %v519_v15 = vmul.f32 %v2109_v42, %v511_v32  ;;  %v1363_v30 = vpack.c.bf16 %v1358_v48, %v733_v21 }
  0x5e   : > { %v518_v25 = vmul.f32 %v2109_v42, %v510_v51 }
  0x60   : > { %1824 = vmatmul.mubr.msk.bf16.vlgmr.msra.gmra.mrb[0].mxu1 %vm531_vm6, %v837_v27  ;;  %v933_v54 = vpack.c.bf16 %v519_v15, %v518_v25 }
  0x61   : > { %1882 = vmatpush3.bf16.msra.mxu1 %v2026_v4  ;;  %1827 = vmatprep.mubr.msk.bf16.mxu1 %vm531_vm6, %v838_v14  ;;  %v1361_v4 = vpack.c.bf16 %v2445_v63, %v2424_v39 }
  0x62   : > { %1868 = vmatmul.mubr.msk.bf16.gmra.mrb[4].mxu0 %vm531_vm6, %v1263_v49 }
  0x63   : > { %1873 = vmatprep.mubr.msk.bf16.mxu0 %vm531_vm6, %v1360_v44 }
  0x68   : > { %1828 = vmatmul.mubr.msk.bf16.gmra.mrb[4].mxu1 %vm531_vm6, %v839_v11 }
  0x69   : > { %1837 = vmatprep.mubr.msk.bf16.mxu1 %vm531_vm6, %v932_v12 }
  0x6a   : > { %1874 = vmatmul.mubr.msk.bf16.vlgmr.msra.gmra.mrb[0].mxu0 %vm531_vm6, %v1361_v4 }
  0x6b   : > { %1877 = vmatprep.mubr.msk.bf16.mxu0 %vm531_vm6, %v1362_v50 }
  0x72   : > { %1878 = vmatmul.mubr.msk.bf16.gmra.mrb[4].mxu0 %vm531_vm6, %v1363_v30 }
  0x74   : > { %1838 = vmatmul.mubr.msk.bf16.vlgmr.msra.gmra.mrb[4].mxu1 %vm531_vm6, %v933_v54 }
 0x133   : > { %v1825_v39 = vpop.f32.mrb[0].mxu1 }
 0x134   : > { %v891_v16 = vpop.f32.mrb[1].mxu1 }
 0x135   : > { %v1826_v58 = vpop.f32.mrb[2].mxu1 }
 0x136   : > { %v894_v60 = vpop.f32.mrb[3].mxu1 }
 0x13d   : > { %v1875_v19 = vpop.f32.mrb[0].mxu0 }
 0x13e   : > { %v1883_v63 = vadd.f32 %v1875_v19, %v1825_v39  ;;  %v1415_v0 = vpop.f32.mrb[1].mxu0 }
 0x13f   : > { %v1884_v42 = vadd.f32 %v1415_v0, %v891_v16  ;;  %v1876_v31 = vpop.f32.mrb[2].mxu0 }
 0x140   : > { %v1740_v56 = vpack.c.bf16 %v1883_v63, %v1883_v63  ;;  %v1885_v57 = vadd.f32 %v1876_v31, %v1826_v58  ;;  %v1418_v34 = vpop.f32.mrb[3].mxu0  ;;  %v1518_v5 = vmul.f32 %v1883_v63, %v1883_v63  ;;  %v1498_v9 = vsel %vm531_vm6, %v1883_v63, 0.0 }
 0x141   : > { %v1738_v2 = vpack.c.bf16 %v1884_v42, %v1884_v42  ;;  %v1516_v20 = vmul.f32 %v1884_v42, %v1884_v42  ;;  %v1886_v28 = vadd.f32 %v1418_v34, %v894_v60  ;;  %v1495_v62 = vsel %vm531_vm6, %v1884_v42, 0.0 }
 0x142   : > { %1489 = vst.msk [vmem:[%s2526_s24 + $0x8] sm:$0xf] %vm1486_vm12, %v1740_v56  ;;  %v1741_v8 = vpack.c.bf16 %v1885_v57, %v1885_v57  ;;  %v1519_v22 = vmul.f32 %v1885_v57, %v1885_v57  ;;  %v1527_v7 = vsel %vm531_vm6, %v1518_v5, 0.0  ;;  %v1500_v36 = vsel %vm531_vm6, %v1885_v57, 0.0 }
 0x143   : > { %1487 = vst.msk [vmem:[%s2526_s24] sm:$0xf] %vm1486_vm12, %v1738_v2  ;;  %v1739_v41 = vpack.c.bf16 %v1886_v28, %v1886_v28  ;;  %v1496_v35 = vsel %vm531_vm6, %v1886_v28, 0.0  ;;  %v1517_v1 = vmul.f32 %v1886_v28, %v1886_v28  ;;  %v1524_v21 = vsel %vm531_vm6, %v1516_v20, 0.0 }
 0x144   : > { %1490 = vst.msk [vmem:[%s2526_s24 + $0xc] sm:$0xf] %vm1486_vm12, %v1741_v8  ;;  %v1497_v10 = vadd.f32 %v1496_v35, %v1495_v62  ;;  %v1529_v14 = vsel %vm531_vm6, %v1519_v22, 0.0 }
 0x145   : > { %1488 = vst.msk [vmem:[%s2526_s24 + $0x4] sm:$0xf] %vm1486_vm12, %v1739_v41  ;;  %v1525_v24 = vsel %vm531_vm6, %v1517_v1, 0.0  ;;  %v1879_v26 = vpop.f32.mrb[4].mxu0 }
 0x146   : > { %v1499_v33 = vadd.f32 %v1498_v9, %v1497_v10  ;;  %v1526_v59 = vadd.f32 %v1525_v24, %v1524_v21  ;;  %v1431_v18 = vpop.f32.mrb[5].mxu0 }
 0x147   : > { %v1839_v37 = vpop.f32.mrb[4].mxu1  ;;  %v1880_v29 = vpop.f32.mrb[6].mxu0 }
 0x148   : > { %v1528_v6 = vadd.f32 %v1527_v7, %v1526_v59  ;;  %v1887_v43 = vadd.f32 %v1879_v26, %v1839_v37  ;;  %v1001_v46 = vpop.f32.mrb[5].mxu1  ;;  %v1501_v52 = vadd.f32 %v1500_v36, %v1499_v33  ;;  %v1434_v27 = vpop.f32.mrb[7].mxu0 }
 0x149   : > { %v1888_v38 = vadd.f32 %v1431_v18, %v1001_v46  ;;  %v1840_v55 = vpop.f32.mrb[6].mxu1 }
 0x14a   : > { %v1744_v17 = vpack.c.bf16 %v1887_v43, %v1887_v43  ;;  %v1530_v13 = vadd.f32 %v1529_v14, %v1528_v6  ;;  %v1004_v47 = vpop.f32.mrb[7].mxu1  ;;  %v1889_v3 = vadd.f32 %v1880_v29, %v1840_v55  ;;  %v1522_v53 = vmul.f32 %v1887_v43, %v1887_v43 }
 0x14b   : > { %v1742_v49 = vpack.c.bf16 %v1888_v38, %v1888_v38  ;;  %v1502_v44 = vsel %vm531_vm6, %v1888_v38, 0.0  ;;  %v1520_v48 = vmul.f32 %v1888_v38, %v1888_v38  ;;  %v1890_v45 = vadd.f32 %v1434_v27, %v1004_v47 }
 0x14c   : > { %1493 = vst.msk [vmem:[%s2526_s24 + $0x18] sm:$0xf] %vm1486_vm12, %v1744_v17  ;;  %v1503_v40 = vadd.f32 %v1502_v44, %v1501_v52  ;;  %v1745_v61 = vpack.c.bf16 %v1889_v3, %v1889_v3  ;;  %v1506_v32 = vsel %vm531_vm6, %v1887_v43, 0.0  ;;  %v1523_v25 = vmul.f32 %v1889_v3, %v1889_v3 }
 0x14d   : > { %1491 = vst.msk [vmem:[%s2526_s24 + $0x10] sm:$0xf] %vm1486_vm12, %v1742_v49  ;;  %v1531_v11 = vsel %vm531_vm6, %v1520_v48, 0.0  ;;  %v1743_v12 = vpack.c.bf16 %v1890_v45, %v1890_v45  ;;  %v1504_v4 = vsel %vm531_vm6, %v1890_v45, 0.0  ;;  %v1521_v50 = vmul.f32 %v1890_v45, %v1890_v45 }
 0x14e   : > { %v1532_v23 = vadd.f32 %v1531_v11, %v1530_v13  ;;  %1494 = vst.msk [vmem:[%s2526_s24 + $0x1c] sm:$0xf] %vm1486_vm12, %v1745_v61  ;;  %v1505_v51 = vadd.f32 %v1504_v4, %v1503_v40  ;;  %v1535_v39 = vsel %vm531_vm6, %v1522_v53, 0.0  ;;  %v1508_v16 = vsel %vm531_vm6, %v1889_v3, 0.0 }
 0x14f   : > { %1492 = vst.msk [vmem:[%s2526_s24 + $0x14] sm:$0xf] %vm1486_vm12, %v1743_v12  ;;  %v1533_v15 = vsel %vm531_vm6, %v1521_v50, 0.0  ;;  %v1537_v19 = vsel %vm531_vm6, %v1523_v25, 0.0 }
 0x150   : > { %v1507_v30 = vadd.f32 %v1506_v32, %v1505_v51  ;;  %v1534_v54 = vadd.f32 %v1533_v15, %v1532_v23 }
 0x152   : > { %v1509_v58 = vadd.f32 %v1508_v16, %v1507_v30  ;;  %v1536_v60 = vadd.f32 %v1535_v39, %v1534_v54 }
 0x154   : > { %v1510_v63 = vrot.slane %v1509_v58, 4  ;;  %v1538_v0 = vadd.f32 %v1537_v19, %v1536_v60 }
 0x156   : > { %v1511_v42 = vadd.f32 %v1510_v63, %v1509_v58  ;;  %v1539_v31 = vrot.slane %v1538_v0, 4 }
 0x158   : > { %v1512_v56 = vrot.slane %v1511_v42, 2  ;;  %v1540_v57 = vadd.f32 %v1539_v31, %v1538_v0 }
 0x15a   : > { %v1513_v34 = vadd.f32 %v1512_v56, %v1511_v42  ;;  %v1541_v2 = vrot.slane %v1540_v57, 2 }
 0x15c   : > { %v1514_v20 = vrot.slane %v1513_v34, 1  ;;  %v1542_v28 = vadd.f32 %v1541_v2, %v1540_v57 }
 0x15e   : > { %v1543_v5 = vrot.slane %v1542_v28, 1  ;;  %v1515_v8 = vadd.f32 %v1514_v20, %v1513_v34 }
 0x160   : > { %v1544_v62 = vadd.f32 %v1543_v5, %v1542_v28 }
 0x162   : > { %v1546_v41 = vsel %vm1545_vm13, %v1515_v8, %v1544_v62 }
 0x163   : > { %1548 = vst.msk [vmem:[%s214_s28] sm:$0x3] %vm1547_vm14, %v1546_v41 }
 0x164 PF: > { %s15_s15 = sadd.s32 1, %s1973_s15  }
 0x165   : > { %p12_p6 = scmp.ge.s32.totalorder %s15_s15, 4  }
 0x167   :  { %14 = sbr.rel (!%p12_p6) target bundleno = 1 (0x1), region = 85 }

// kernel: bottleneck_forward.6
= control target key start
LH: loop header
LB: loop body
LE: loop exit
PB: predicated region body
PF: predicated region fallthrough
CT: control target
= control target key end

     0   :  { %vm490_vm0 = vcmask 130048   ;;  %vm149_vm1 = vcmask 1043456   ;;  %vm124_vm2 = vcmask 64512   ;;  %vm331_vm3 = vcmask 261120   ;;  %s1433_s4 = inlined_call_operand.vmem [shape: bf16[16,32], index: 4, kind: input, shape index: {}]   ;;  %s1434_s3 = inlined_call_operand.vmem [shape: bf16[128,16], index: 3, kind: input, shape index: {}]   ;;  %s1435_s2 = inlined_call_operand.vmem [shape: bf16[8,32], index: 2, kind: input, shape index: {}]   ;;  %s1436_s0 = inlined_call_operand.vmem [shape: bf16[128,8], index: 0, kind: input, shape index: {}]   ;;  %s1437_s1 = inlined_call_operand.vmem [shape: f32[2,8], index: 1, kind: input, shape index: {}]   ;;  %s1438_s7 = inlined_call_operand.vmem [shape: bf16[128,32], index: 7, kind: output, shape index: {2}]   ;;  %s1439_s5 = inlined_call_operand.vmem [shape: bf16[128,32], index: 5, kind: output, shape index: {0}]   ;;  %s1440_s8 = inlined_call_operand.vmem [shape: f32[1,2,32], index: 8, kind: output, shape index: {3}]   ;;  %s1441_s6 = inlined_call_operand.vmem [shape: f32[1,2,32], index: 6, kind: output, shape index: {1}]  }
   0x1   :  { %v985_v0 = vld [vmem:[%s1433_s4] sm:$0xff]   ;;  %v987_v2 = vld [vmem:[%s1434_s3 + $0x8] sm:$0xff]   ;;  %v988_v13 = vld [vmem:[%s1434_s3 + $0x10] sm:$0xff]   ;;  %vm314_vm4 = vcmask 257024   ;;  %vm422_vm5 = vcmask 1040384   ;;  %vm424_vm6 = vcmask 254976  }
   0x2   :  { %v986_v1 = vld [vmem:[%s1434_s3] sm:$0xff]   ;;  %966 = vmatprep.subr.bf16.mxu1 %v985_v0  ;;  %v923_v10 = vld [vmem:[%s1436_s0 + $0x8] sm:$0xff]   ;;  %v924_v16 = vld [vmem:[%s1436_s0 + $0x10] sm:$0xff]  }
   0x3   :  { %967 = vmatpush3.bf16.msra.mxu1 %v985_v0  ;;  %968 = vmatprep.mubr.msk.bf16.mxu1 %vm490_vm0, %v986_v1  ;;  %v123_v3 = vld [vmem:[%s1435_s2] sm:$0xf]  ;;  %v897_v11 = vunpack.c.l.bf16 %v923_v10  ;;  %v898_v12 = vunpack.c.h.bf16 %v923_v10  ;;  %v901_v19 = vunpack.c.l.bf16 %v924_v16  ;;  %v902_v20 = vunpack.c.h.bf16 %v924_v16  ;;  %v925_v21 = vld [vmem:[%s1436_s0 + $0x18] sm:$0xff]   ;;  %v927_v41 = vld [vmem:[%s1436_s0 + $0x28] sm:$0xff]  }
   0x4   :  { %v892_v4 = vld [vmem:[%s1436_s0] sm:$0xff]   ;;  %984 = vmatprep.subr.msk.bf16.mxu0 %vm149_vm1, %v123_v3  ;;  %v151_v6 = vsel %vm149_vm1, %v123_v3, 0  ;;  %v905_v24 = vunpack.c.l.bf16 %v925_v21  ;;  %v906_v25 = vunpack.c.h.bf16 %v925_v21  ;;  %v989_v28 = vld [vmem:[%s1434_s3 + $0x18] sm:$0xff]   ;;  %v928_v46 = vld [vmem:[%s1436_s0 + $0x30] sm:$0xff]   ;;  %v913_v54 = vunpack.c.l.bf16 %v927_v41 }
   0x5   :  { %v1058_v5 = vld [vmem:[%s1437_s1] ss:$0 sm:$0xff]  ;;  %v893_v7 = vunpack.c.l.bf16 %v892_v4  ;;  %v894_v8 = vunpack.c.h.bf16 %v892_v4  ;;  %v1063_v9 = vld [vmem:[%s1437_s1 + $0x1] ss:$0 sm:$0xff]  ;;  %949 = vmatpush3.bf16.msra.mxu0 %v151_v6  ;;  %v914_v57 = vunpack.c.h.bf16 %v927_v41  ;;  %v917_v58 = vunpack.c.l.bf16 %v928_v46  ;;  %v929_v59 = vld [vmem:[%s1436_s0 + $0x38] sm:$0xff]  }
   0x6   :  { %969 = vmatmul.mubr.msk.bf16.vlgmr.msra.gmra.mrb[0].mxu1 %vm490_vm0, %v987_v2  ;;  %v64_v17 = vmul.f32 %v897_v11, %v1058_v5  ;;  %v65_v18 = vmul.f32 %v898_v12, %v1058_v5  ;;  %v66_v29 = vmul.f32 %v901_v19, %v1058_v5  ;;  %v67_v30 = vmul.f32 %v902_v20, %v1058_v5  ;;  %v926_v31 = vld [vmem:[%s1436_s0 + $0x20] sm:$0xff]   ;;  %v991_v3 = vld [vmem:[%s1434_s3 + $0x28] sm:$0xff]   ;;  %v992_v12 = vld [vmem:[%s1434_s3 + $0x30] sm:$0xff]  }
   0x7   :  { %v62_v14 = vmul.f32 %v893_v7, %v1058_v5  ;;  %v63_v15 = vmul.f32 %v894_v8, %v1058_v5  ;;  %972 = vmatprep.mubr.msk.bf16.mxu1 %vm490_vm0, %v988_v13  ;;  %v68_v34 = vmul.f32 %v905_v24, %v1058_v5  ;;  %v69_v35 = vmul.f32 %v906_v25, %v1058_v5  ;;  %v990_v40 = vld [vmem:[%s1434_s3 + $0x20] sm:$0xff]  }
   0x8   :  { %v85_v26 = vadd.f32 %v1063_v9, %v64_v17  ;;  %v86_v27 = vadd.f32 %v1063_v9, %v65_v18  ;;  %v87_v38 = vadd.f32 %v1063_v9, %v66_v29  ;;  %v88_v39 = vadd.f32 %v1063_v9, %v67_v30 }
   0x9   :  { %v83_v22 = vadd.f32 %v1063_v9, %v62_v14  ;;  %v84_v23 = vadd.f32 %v1063_v9, %v63_v15  ;;  %v89_v43 = vadd.f32 %v1063_v9, %v68_v34  ;;  %v90_v44 = vadd.f32 %v1063_v9, %v69_v35 }
   0xa   :  { %v101_v36 = vmax.f32 %v85_v26, 0.0  ;;  %v102_v37 = vmax.f32 %v86_v27, 0.0  ;;  %v909_v45 = vunpack.c.l.bf16 %v926_v31  ;;  %v103_v48 = vmax.f32 %v87_v38, 0.0 }
   0xb   :  { %v99_v32 = vmax.f32 %v83_v22, 0.0  ;;  %v100_v33 = vmax.f32 %v84_v23, 0.0  ;;  %v104_v49 = vmax.f32 %v88_v39, 0.0  ;;  %v910_v50 = vunpack.c.h.bf16 %v926_v31  ;;  %v993_v23 = vld [vmem:[%s1434_s3 + $0x38] sm:$0xff]  }
   0xc   :  { %v116_v47 = vpack.c.bf16 %v102_v37, %v101_v36  ;;  %v105_v51 = vmax.f32 %v89_v43, 0.0  ;;  %v106_v52 = vmax.f32 %v90_v44, 0.0  ;;  %v70_v53 = vmul.f32 %v909_v45, %v1058_v5 }
   0xd   :  { %v115_v42 = vpack.c.bf16 %v100_v33, %v99_v32  ;;  %v117_v55 = vpack.c.bf16 %v104_v49, %v103_v48  ;;  %v71_v56 = vmul.f32 %v910_v50, %v1058_v5  ;;  %v72_v61 = vmul.f32 %v913_v54, %v1058_v5 }
   0xe   :  { %973 = vmatmul.mubr.msk.bf16.gmra.mrb[4].mxu1 %vm490_vm0, %v989_v28  ;;  %v91_v60 = vadd.f32 %v1063_v9, %v70_v53  ;;  %v918_v62 = vunpack.c.h.bf16 %v928_v46  ;;  %v73_v0 = vmul.f32 %v914_v57, %v1058_v5  ;;  %v74_v1 = vmul.f32 %v917_v58, %v1058_v5 }
   0xf   :  { %950 = vmatprep.mubr.msk.bf16.mxu0 %vm124_vm2, %v115_v42  ;;  %976 = vmatprep.mubr.msk.bf16.mxu1 %vm490_vm0, %v990_v40  ;;  %v92_v63 = vadd.f32 %v1063_v9, %v71_v56  ;;  %v118_v2 = vpack.c.bf16 %v106_v52, %v105_v51  ;;  %v921_v7 = vunpack.c.l.bf16 %v929_v59  ;;  %v93_v10 = vadd.f32 %v1063_v9, %v72_v61 }
  0x10   :  { %951 = vmatmul.mubr.msk.bf16.vlgmr.msra.gmra.mrb[0].mxu0 %vm124_vm2, %v116_v47  ;;  %v107_v4 = vmax.f32 %v91_v60, 0.0  ;;  %v75_v6 = vmul.f32 %v918_v62, %v1058_v5  ;;  %v94_v11 = vadd.f32 %v1063_v9, %v73_v0  ;;  %v922_v13 = vunpack.c.h.bf16 %v929_v59 }
  0x11   :  { %954 = vmatprep.mubr.msk.bf16.mxu0 %vm124_vm2, %v117_v55  ;;  %v108_v8 = vmax.f32 %v92_v63, 0.0  ;;  %v95_v14 = vadd.f32 %v1063_v9, %v74_v1  ;;  %v109_v17 = vmax.f32 %v93_v10, 0.0  ;;  %v76_v19 = vmul.f32 %v921_v7, %v1058_v5 }
  0x12   :  { %v96_v15 = vadd.f32 %v1063_v9, %v75_v6  ;;  %v110_v18 = vmax.f32 %v94_v11, 0.0  ;;  %v77_v20 = vmul.f32 %v922_v13, %v1058_v5 }
  0x13   :  { %v119_v16 = vpack.c.bf16 %v108_v8, %v107_v4  ;;  %v111_v21 = vmax.f32 %v95_v14, 0.0  ;;  %v97_v25 = vadd.f32 %v1063_v9, %v76_v19 }
  0x14   :  { %v112_v22 = vmax.f32 %v96_v15, 0.0  ;;  %v120_v24 = vpack.c.bf16 %v110_v18, %v109_v17  ;;  %v98_v26 = vadd.f32 %v1063_v9, %v77_v20 }
  0x15   :  { %v113_v28 = vmax.f32 %v97_v25, 0.0 }
  0x16   :  { %977 = vmatmul.mubr.msk.bf16.gmra.mrb[8].mxu1 %vm490_vm0, %v991_v3  ;;  %v121_v27 = vpack.c.bf16 %v112_v22, %v111_v21  ;;  %v114_v5 = vmax.f32 %v98_v26, 0.0 }
  0x17   :  { %980 = vmatprep.mubr.msk.bf16.mxu1 %vm490_vm0, %v992_v12 }
  0x18   :  { %955 = vmatmul.mubr.msk.bf16.gmra.mrb[4].mxu0 %vm124_vm2, %v118_v2  ;;  %v122_v29 = vpack.c.bf16 %v114_v5, %v113_v28 }
  0x19   :  { %958 = vmatprep.mubr.msk.bf16.mxu0 %vm124_vm2, %v119_v16 }
  0x1e   :  { %981 = vmatmul.mubr.msk.bf16.gmra.mrb[12].mxu1 %vm490_vm0, %v993_v23 }
  0x20   :  { %959 = vmatmul.mubr.msk.bf16.gmra.mrb[8].mxu0 %vm124_vm2, %v120_v24 }
  0x21   :  { %962 = vmatprep.mubr.msk.bf16.mxu0 %vm124_vm2, %v121_v27 }
  0x28   :  { %963 = vmatmul.mubr.msk.bf16.gmra.mrb[12].mxu0 %vm124_vm2, %v122_v29 }
  0xd9   :  { %v970_v30 = vpop.f32.mrb[0].mxu1 }
  0xda   :  { %v877_v31 = vpack.c.bf16 %v970_v30, %v970_v30  ;;  %v549_v32 = vpop.f32.mrb[1].mxu1  ;;  %v731_v33 = vmul.f32 %v970_v30, %v970_v30  ;;  %v695_v37 = vsel %vm331_vm3, %v970_v30, 0.0 }
  0xdb   :  { %v875_v34 = vpack.c.bf16 %v549_v32, %v549_v32  ;;  %v692_v9 = vsel %vm331_vm3, %v549_v32, 0.0  ;;  %v729_v35 = vmul.f32 %v549_v32, %v549_v32  ;;  %v971_v36 = vpop.f32.mrb[2].mxu1 }
  0xdc   :  { %678 = vst.msk [vmem:[%s1438_s7 + $0x8] sm:$0xf] %vm314_vm4, %v877_v31  ;;  %v878_v38 = vpack.c.bf16 %v971_v36, %v971_v36  ;;  %v552_v39 = vpop.f32.mrb[3].mxu1  ;;  %v748_v45 = vsel %vm331_vm3, %v731_v33, 0.0  ;;  %v732_v46 = vmul.f32 %v971_v36, %v971_v36  ;;  %v697_v55 = vsel %vm331_vm3, %v971_v36, 0.0 }
  0xdd   :  { %676 = vst.msk [vmem:[%s1438_s7] sm:$0xf] %vm314_vm4, %v875_v34  ;;  %v745_v40 = vsel %vm331_vm3, %v729_v35, 0.0  ;;  %v876_v41 = vpack.c.bf16 %v552_v39, %v552_v39  ;;  %v693_v42 = vsel %vm331_vm3, %v552_v39, 0.0  ;;  %v730_v43 = vmul.f32 %v552_v39, %v552_v39 }
  0xde   :  { %679 = vst.msk [vmem:[%s1438_s7 + $0xc] sm:$0xf] %vm314_vm4, %v878_v38  ;;  %v694_v44 = vadd.f32 %v693_v42, %v692_v9  ;;  %v750_v56 = vsel %vm331_vm3, %v732_v46, 0.0 }
  0xdf   :  { %677 = vst.msk [vmem:[%s1438_s7 + $0x4] sm:$0xf] %vm314_vm4, %v876_v41  ;;  %v746_v47 = vsel %vm331_vm3, %v730_v43, 0.0 }
  0xe0   :  { %v696_v48 = vadd.f32 %v695_v37, %v694_v44  ;;  %v747_v49 = vadd.f32 %v746_v47, %v745_v40 }
  0xe1   :  { %v974_v50 = vpop.f32.mrb[4].mxu1 }
  0xe2   :  { %v749_v51 = vadd.f32 %v748_v45, %v747_v49  ;;  %v881_v53 = vpack.c.bf16 %v974_v50, %v974_v50  ;;  %v565_v54 = vpop.f32.mrb[5].mxu1  ;;  %v703_v0 = vsel %vm331_vm3, %v974_v50, 0.0  ;;  %v735_v1 = vmul.f32 %v974_v50, %v974_v50 }
  0xe3   :  { %v952_v52 = vpop.f32.mrb[0].mxu0  ;;  %v879_v59 = vpack.c.bf16 %v565_v54, %v565_v54  ;;  %v1175_v60 = vpop.f32.mrb[6].mxu1  ;;  %v698_v16 = vadd.f32 %v697_v55, %v696_v48  ;;  %v699_v17 = vsel %vm331_vm3, %v565_v54, 0.0  ;;  %v733_v19 = vmul.f32 %v565_v54, %v565_v54 }
  0xe4   :  { %v861_v57 = vpack.c.bf16 %v952_v52, %v952_v52  ;;  %v187_v58 = vpop.f32.mrb[1].mxu0  ;;  %682 = vst.msk [vmem:[%s1438_s7 + $0x18] sm:$0xf] %vm314_vm4, %v881_v53  ;;  %v568_v2 = vpop.f32.mrb[7].mxu1  ;;  %v335_v3 = vsel %vm331_vm3, %v952_v52, 0.0  ;;  %v371_v4 = vmul.f32 %v952_v52, %v952_v52  ;;  %v751_v20 = vadd.f32 %v750_v56, %v749_v51 }
  0xe5   :  { %v859_v61 = vpack.c.bf16 %v187_v58, %v187_v58  ;;  %v369_v62 = vmul.f32 %v187_v58, %v187_v58  ;;  %v953_v63 = vpop.f32.mrb[2].mxu0  ;;  %v332_v6 = vsel %vm331_vm3, %v187_v58, 0.0  ;;  %680 = vst.msk [vmem:[%s1438_s7 + $0x10] sm:$0xf] %vm314_vm4, %v879_v59  ;;  %v882_v21 = vpack.c.bf16 %v1175_v60, %v1175_v60 }
  0xe6   :  { %317 = vst.msk [vmem:[%s1439_s5 + $0x8] sm:$0xf] %vm314_vm4, %v861_v57  ;;  %v862_v7 = vpack.c.bf16 %v953_v63, %v953_v63  ;;  %v190_v8 = vpop.f32.mrb[3].mxu0  ;;  %v372_v10 = vmul.f32 %v953_v63, %v953_v63  ;;  %v756_v24 = vsel %vm331_vm3, %v735_v1, 0.0  ;;  %v700_v25 = vadd.f32 %v699_v17, %v698_v16 }
  0xe7   :  { %315 = vst.msk [vmem:[%s1439_s5] sm:$0xf] %vm314_vm4, %v859_v61  ;;  %v860_v11 = vpack.c.bf16 %v190_v8, %v190_v8  ;;  %v333_v12 = vsel %vm331_vm3, %v190_v8, 0.0  ;;  %v370_v13 = vmul.f32 %v190_v8, %v190_v8  ;;  %v385_v14 = vsel %vm331_vm3, %v369_v62, 0.0  ;;  %683 = vst.msk [vmem:[%s1438_s7 + $0x1c] sm:$0xf] %vm314_vm4, %v882_v21 }
  0xe8   :  { %318 = vst.msk [vmem:[%s1439_s5 + $0xc] sm:$0xf] %vm314_vm4, %v862_v7  ;;  %v334_v15 = vadd.f32 %v333_v12, %v332_v6  ;;  %v388_v27 = vsel %vm331_vm3, %v371_v4, 0.0  ;;  %v752_v28 = vsel %vm331_vm3, %v733_v19, 0.0  ;;  %v880_v5 = vpack.c.bf16 %v568_v2, %v568_v2 }
  0xe9   :  { %316 = vst.msk [vmem:[%s1439_s5 + $0x4] sm:$0xf] %vm314_vm4, %v860_v11  ;;  %v386_v18 = vsel %vm331_vm3, %v370_v13, 0.0  ;;  %v1211_v26 = vpop.f32.mrb[8].mxu1  ;;  %v701_v29 = vsel %vm331_vm3, %v568_v2, 0.0  ;;  %v753_v33 = vadd.f32 %v752_v28, %v751_v20  ;;  %v734_v9 = vmul.f32 %v568_v2, %v568_v2 }
  0xea   :  { %v336_v22 = vadd.f32 %v335_v3, %v334_v15  ;;  %v387_v23 = vadd.f32 %v386_v18, %v385_v14  ;;  %v581_v31 = vpop.f32.mrb[9].mxu1  ;;  %v702_v34 = vadd.f32 %v701_v29, %v700_v25  ;;  %v337_v37 = vsel %vm331_vm3, %v953_v63, 0.0  ;;  %681 = vst.msk [vmem:[%s1438_s7 + $0x14] sm:$0xf] %vm314_vm4, %v880_v5 }
  0xeb   :  { %v956_v30 = vpop.f32.mrb[4].mxu0  ;;  %v1220_v36 = vpop.f32.mrb[10].mxu1  ;;  %v390_v38 = vsel %vm331_vm3, %v372_v10, 0.0  ;;  %v736_v39 = vmul.f32 %v1175_v60, %v1175_v60  ;;  %v754_v44 = vsel %vm331_vm3, %v734_v9, 0.0  ;;  %v705_v52 = vsel %vm331_vm3, %v1175_v60, 0.0 }
  0xec   :  { %v389_v32 = vadd.f32 %v388_v27, %v387_v23  ;;  %v203_v35 = vpop.f32.mrb[5].mxu0  ;;  %v865_v40 = vpack.c.bf16 %v956_v30, %v956_v30  ;;  %v1230_v42 = vpop.f32.mrb[11].mxu1  ;;  %v704_v43 = vadd.f32 %v703_v0, %v702_v34  ;;  %v338_v46 = vadd.f32 %v337_v37, %v336_v22 }
  0xed   :  { %v957_v41 = vpop.f32.mrb[6].mxu0  ;;  %v863_v45 = vpack.c.bf16 %v203_v35, %v203_v35  ;;  %v755_v48 = vadd.f32 %v754_v44, %v753_v33  ;;  %v375_v49 = vmul.f32 %v956_v30, %v956_v30  ;;  %v339_v50 = vsel %vm331_vm3, %v203_v35, 0.0 }
  0xee   :  { %v206_v47 = vpop.f32.mrb[7].mxu0  ;;  %321 = vst.msk [vmem:[%s1439_s5 + $0x18] sm:$0xf] %vm314_vm4, %v865_v40  ;;  %v373_v51 = vmul.f32 %v203_v35, %v203_v35  ;;  %v340_v53 = vadd.f32 %v339_v50, %v338_v46  ;;  %v391_v54 = vadd.f32 %v390_v38, %v389_v32  ;;  %v866_v55 = vpack.c.bf16 %v957_v41, %v957_v41 }
  0xef   :  { %319 = vst.msk [vmem:[%s1439_s5 + $0x10] sm:$0xf] %vm314_vm4, %v863_v45  ;;  %v758_v56 = vsel %vm331_vm3, %v736_v39, 0.0  ;;  %v757_v57 = vadd.f32 %v756_v24, %v755_v48  ;;  %v864_v59 = vpack.c.bf16 %v206_v47, %v206_v47  ;;  %v341_v60 = vsel %vm331_vm3, %v206_v47, 0.0 }
  0xf0   :  { %v392_v58 = vsel %vm331_vm3, %v373_v51, 0.0  ;;  %322 = vst.msk [vmem:[%s1439_s5 + $0x1c] sm:$0xf] %vm314_vm4, %v866_v55  ;;  %v374_v62 = vmul.f32 %v206_v47, %v206_v47  ;;  %v885_v63 = vpack.c.bf16 %v1211_v26, %v1211_v26  ;;  %v343_v1 = vsel %vm331_vm3, %v956_v30, 0.0 }
  0xf1   :  { %v393_v61 = vadd.f32 %v392_v58, %v391_v54  ;;  %v1253_v0 = vpop.f32.mrb[12].mxu1  ;;  %v396_v2 = vsel %vm331_vm3, %v375_v49, 0.0  ;;  %v376_v3 = vmul.f32 %v957_v41, %v957_v41  ;;  %320 = vst.msk [vmem:[%s1439_s5 + $0x14] sm:$0xf] %vm314_vm4, %v864_v59  ;;  %v342_v4 = vadd.f32 %v341_v60, %v340_v53 }
  0xf2   :  { %v1261_v7 = vpop.f32.mrb[13].mxu1  ;;  %v394_v8 = vsel %vm331_vm3, %v374_v62, 0.0  ;;  %686 = vst.msk [vmem:[%s1438_s7 + $0x28] sm:$0xf] %vm314_vm4, %v885_v63  ;;  %v883_v10 = vpack.c.bf16 %v581_v31, %v581_v31  ;;  %v706_v11 = vadd.f32 %v705_v52, %v704_v43  ;;  %v707_v12 = vsel %vm331_vm3, %v581_v31, 0.0 }
  0xf3   :  { %v960_v6 = vpop.f32.mrb[8].mxu0  ;;  %v1269_v14 = vpop.f32.mrb[14].mxu1  ;;  %v344_v15 = vadd.f32 %v343_v1, %v342_v4  ;;  %v395_v16 = vadd.f32 %v394_v8, %v393_v61  ;;  %v739_v17 = vmul.f32 %v1211_v26, %v1211_v26  ;;  %v737_v18 = vmul.f32 %v581_v31, %v581_v31 }
  0xf4   :  { %v219_v13 = vpop.f32.mrb[9].mxu0  ;;  %v1275_v20 = vpop.f32.mrb[15].mxu1  ;;  %v345_v21 = vsel %vm331_vm3, %v957_v41, 0.0  ;;  %684 = vst.msk [vmem:[%s1438_s7 + $0x20] sm:$0xf] %vm314_vm4, %v883_v10  ;;  %v708_v22 = vadd.f32 %v707_v12, %v706_v11  ;;  %v759_v23 = vadd.f32 %v758_v56, %v757_v57  ;;  %v886_v24 = vpack.c.bf16 %v1220_v36, %v1220_v36 }
  0xf5   :  { %v1273_v19 = vpop.f32.mrb[10].mxu0  ;;  %v397_v27 = vadd.f32 %v396_v2, %v395_v16  ;;  %v711_v28 = vsel %vm331_vm3, %v1211_v26, 0.0  ;;  %v760_v5 = vsel %vm331_vm3, %v737_v18, 0.0  ;;  %v884_v29 = vpack.c.bf16 %v1230_v42, %v1230_v42 }
  0xf6   :  { %v222_v25 = vpop.f32.mrb[11].mxu0  ;;  %v761_v30 = vadd.f32 %v760_v5, %v759_v23  ;;  %687 = vst.msk [vmem:[%s1438_s7 + $0x2c] sm:$0xf] %vm314_vm4, %v886_v24  ;;  %v709_v31 = vsel %vm331_vm3, %v1230_v42, 0.0  ;;  %v738_v32 = vmul.f32 %v1230_v42, %v1230_v42  ;;  %v869_v33 = vpack.c.bf16 %v960_v6, %v960_v6 }
  0xf7   :  { %v398_v26 = vsel %vm331_vm3, %v376_v3, 0.0  ;;  %v764_v34 = vsel %vm331_vm3, %v739_v17, 0.0  ;;  %v740_v9 = vmul.f32 %v1220_v36, %v1220_v36  ;;  %685 = vst.msk [vmem:[%s1438_s7 + $0x24] sm:$0xf] %vm314_vm4, %v884_v29  ;;  %v710_v35 = vadd.f32 %v709_v31, %v708_v22 }
  0xf8   :  { %v762_v37 = vsel %vm331_vm3, %v738_v32, 0.0  ;;  %325 = vst.msk [vmem:[%s1439_s5 + $0x28] sm:$0xf] %vm314_vm4, %v869_v33  ;;  %v867_v38 = vpack.c.bf16 %v219_v13, %v219_v13  ;;  %v346_v39 = vadd.f32 %v345_v21, %v344_v15  ;;  %v347_v40 = vsel %vm331_vm3, %v219_v13, 0.0 }
  0xf9   :  { %v712_v41 = vadd.f32 %v711_v28, %v710_v35  ;;  %v763_v42 = vadd.f32 %v762_v37, %v761_v30  ;;  %v379_v43 = vmul.f32 %v960_v6, %v960_v6  ;;  %v377_v44 = vmul.f32 %v219_v13, %v219_v13 }
  0xfa   :  { %v713_v46 = vsel %vm331_vm3, %v1220_v36, 0.0  ;;  %323 = vst.msk [vmem:[%s1439_s5 + $0x20] sm:$0xf] %vm314_vm4, %v867_v38  ;;  %v348_v47 = vadd.f32 %v347_v40, %v346_v39  ;;  %v399_v48 = vadd.f32 %v398_v26, %v397_v27  ;;  %v870_v49 = vpack.c.bf16 %v1273_v19, %v1273_v19 }
  0xfb   :  { %v1311_v45 = vpop.f32.mrb[12].mxu0  ;;  %v766_v51 = vsel %vm331_vm3, %v740_v9, 0.0  ;;  %v765_v52 = vadd.f32 %v764_v34, %v763_v42  ;;  %v400_v53 = vsel %vm331_vm3, %v377_v44, 0.0  ;;  %v868_v54 = vpack.c.bf16 %v222_v25, %v222_v25 }
  0xfc   :  { %v235_v50 = vpop.f32.mrb[13].mxu0  ;;  %v401_v36 = vadd.f32 %v400_v53, %v399_v48  ;;  %326 = vst.msk [vmem:[%s1439_s5 + $0x2c] sm:$0xf] %vm314_vm4, %v870_v49  ;;  %v349_v56 = vsel %vm331_vm3, %v222_v25, 0.0  ;;  %v378_v57 = vmul.f32 %v222_v25, %v222_v25  ;;  %v889_v58 = vpack.c.bf16 %v1253_v0, %v1253_v0 }
  0xfd   :  { %v1323_v55 = vpop.f32.mrb[14].mxu0  ;;  %v351_v61 = vsel %vm331_vm3, %v960_v6, 0.0  ;;  %v404_v60 = vsel %vm331_vm3, %v379_v43, 0.0  ;;  %v380_v62 = vmul.f32 %v1273_v19, %v1273_v19  ;;  %324 = vst.msk [vmem:[%s1439_s5 + $0x24] sm:$0xf] %vm314_vm4, %v868_v54  ;;  %v350_v63 = vadd.f32 %v349_v56, %v348_v47 }
  0xfe   :  { %v1332_v59 = vpop.f32.mrb[15].mxu0  ;;  %v402_v1 = vsel %vm331_vm3, %v378_v57, 0.0  ;;  %690 = vst.msk [vmem:[%s1438_s7 + $0x38] sm:$0xf] %vm314_vm4, %v889_v58  ;;  %v887_v2 = vpack.c.bf16 %v1261_v7, %v1261_v7  ;;  %v714_v3 = vadd.f32 %v713_v46, %v712_v41  ;;  %v715_v4 = vsel %vm331_vm3, %v1261_v7, 0.0 }
  0xff   :  { %v352_v6 = vadd.f32 %v351_v61, %v350_v63  ;;  %v403_v8 = vadd.f32 %v402_v1, %v401_v36  ;;  %v743_v10 = vmul.f32 %v1253_v0, %v1253_v0  ;;  %v741_v11 = vmul.f32 %v1261_v7, %v1261_v7 }
 0x100   :  { %v719_v12 = vsel %vm331_vm3, %v1253_v0, 0.0  ;;  %688 = vst.msk [vmem:[%s1438_s7 + $0x30] sm:$0xf] %vm314_vm4, %v887_v2  ;;  %v716_v13 = vadd.f32 %v715_v4, %v714_v3  ;;  %v767_v15 = vadd.f32 %v766_v51, %v765_v52  ;;  %v890_v16 = vpack.c.bf16 %v1269_v14, %v1269_v14 }
 0x101   :  { %v405_v17 = vadd.f32 %v404_v60, %v403_v8  ;;  %v768_v18 = vsel %vm331_vm3, %v741_v11, 0.0  ;;  %v744_v21 = vmul.f32 %v1269_v14, %v1269_v14  ;;  %v888_v7 = vpack.c.bf16 %v1275_v20, %v1275_v20 }
 0x102   :  { %v769_v0 = vadd.f32 %v768_v18, %v767_v15  ;;  %691 = vst.msk [vmem:[%s1438_s7 + $0x3c] sm:$0xf] %vm314_vm4, %v890_v16  ;;  %v717_v22 = vsel %vm331_vm3, %v1275_v20, 0.0  ;;  %v742_v23 = vmul.f32 %v1275_v20, %v1275_v20  ;;  %v873_v24 = vpack.c.bf16 %v1311_v45, %v1311_v45 }
 0x103   :  { %v353_v25 = vsel %vm331_vm3, %v1273_v19, 0.0  ;;  %v772_v27 = vsel %vm331_vm3, %v743_v10, 0.0  ;;  %v721_v28 = vsel %vm331_vm3, %v1269_v14, 0.0  ;;  %689 = vst.msk [vmem:[%s1438_s7 + $0x34] sm:$0xf] %vm314_vm4, %v888_v7  ;;  %v718_v5 = vadd.f32 %v717_v22, %v716_v13 }
 0x104   :  { %v770_v29 = vsel %vm331_vm3, %v742_v23, 0.0  ;;  %329 = vst.msk [vmem:[%s1439_s5 + $0x38] sm:$0xf] %vm314_vm4, %v873_v24  ;;  %v871_v20 = vpack.c.bf16 %v235_v50, %v235_v50  ;;  %v354_v19 = vadd.f32 %v353_v25, %v352_v6  ;;  %v355_v30 = vsel %vm331_vm3, %v235_v50, 0.0 }
 0x105   :  { %v406_v31 = vsel %vm331_vm3, %v380_v62, 0.0  ;;  %v720_v14 = vadd.f32 %v719_v12, %v718_v5  ;;  %v771_v32 = vadd.f32 %v770_v29, %v769_v0  ;;  %v381_v33 = vmul.f32 %v235_v50, %v235_v50 }
 0x106   :  { %v774_v26 = vsel %vm331_vm3, %v744_v21, 0.0  ;;  %327 = vst.msk [vmem:[%s1439_s5 + $0x30] sm:$0xf] %vm314_vm4, %v871_v20  ;;  %v356_v34 = vadd.f32 %v355_v30, %v354_v19  ;;  %v407_v9 = vadd.f32 %v406_v31, %v405_v17  ;;  %v874_v35 = vpack.c.bf16 %v1323_v55, %v1323_v55 }
 0x107   :  { %v722_v37 = vadd.f32 %v721_v28, %v720_v14  ;;  %v773_v38 = vadd.f32 %v772_v27, %v771_v32  ;;  %v383_v39 = vmul.f32 %v1311_v45, %v1311_v45  ;;  %v408_v40 = vsel %vm331_vm3, %v381_v33, 0.0 }
 0x108   :  { %v409_v41 = vadd.f32 %v408_v40, %v407_v9  ;;  %330 = vst.msk [vmem:[%s1439_s5 + $0x3c] sm:$0xf] %vm314_vm4, %v874_v35  ;;  %v872_v42 = vpack.c.bf16 %v1332_v59, %v1332_v59  ;;  %v357_v43 = vsel %vm331_vm3, %v1332_v59, 0.0  ;;  %v382_v44 = vmul.f32 %v1332_v59, %v1332_v59 }
 0x109   :  { %v723_v46 = vrot.slane %v722_v37, 4  ;;  %v775_v47 = vadd.f32 %v774_v26, %v773_v38  ;;  %v358_v48 = vadd.f32 %v357_v43, %v356_v34  ;;  %v359_v49 = vsel %vm331_vm3, %v1311_v45, 0.0 }
 0x10a   :  { %v384_v50 = vmul.f32 %v1323_v55, %v1323_v55  ;;  %328 = vst.msk [vmem:[%s1439_s5 + $0x34] sm:$0xf] %vm314_vm4, %v872_v42  ;;  %v410_v51 = vsel %vm331_vm3, %v382_v44, 0.0  ;;  %v412_v56 = vsel %vm331_vm3, %v383_v39, 0.0  ;;  %v361_v57 = vsel %vm331_vm3, %v1323_v55, 0.0 }
 0x10b   :  { %v724_v52 = vadd.f32 %v723_v46, %v722_v37  ;;  %v776_v53 = vrot.slane %v775_v47, 4  ;;  %v360_v54 = vadd.f32 %v359_v49, %v358_v48  ;;  %v411_v36 = vadd.f32 %v410_v51, %v409_v41 }
 0x10c   :  { %v414_v60 = vsel %vm331_vm3, %v384_v50, 0.0 }
 0x10d   :  { %v725_v45 = vrot.slane %v724_v52, 2  ;;  %v777_v58 = vadd.f32 %v776_v53, %v775_v47  ;;  %v362_v59 = vadd.f32 %v361_v57, %v360_v54  ;;  %v413_v61 = vadd.f32 %v412_v56, %v411_v36 }
 0x10f   :  { %v726_v62 = vadd.f32 %v725_v45, %v724_v52  ;;  %v778_v63 = vrot.slane %v777_v58, 2  ;;  %v363_v1 = vrot.slane %v362_v59, 4  ;;  %v415_v2 = vadd.f32 %v414_v60, %v413_v61 }
 0x111   :  { %v727_v3 = vrot.slane %v726_v62, 1  ;;  %v779_v4 = vadd.f32 %v778_v63, %v777_v58  ;;  %v364_v6 = vadd.f32 %v363_v1, %v362_v59  ;;  %v416_v8 = vrot.slane %v415_v2, 4 }
 0x113   :  { %v780_v10 = vrot.slane %v779_v4, 1  ;;  %v365_v11 = vrot.slane %v364_v6, 2  ;;  %v417_v12 = vadd.f32 %v416_v8, %v415_v2  ;;  %v728_v55 = vadd.f32 %v727_v3, %v726_v62 }
 0x115   :  { %v781_v13 = vadd.f32 %v780_v10, %v779_v4  ;;  %v366_v15 = vadd.f32 %v365_v11, %v364_v6  ;;  %v418_v16 = vrot.slane %v417_v12, 2 }
 0x117   :  { %v782_v17 = vsel %vm422_vm5, %v728_v55, %v781_v13  ;;  %v367_v18 = vrot.slane %v366_v15, 1  ;;  %v419_v21 = vadd.f32 %v418_v16, %v417_v12 }
 0x118   :  { %783 = vst.msk [vmem:[%s1440_s8] sm:$0x3] %vm424_vm6, %v782_v17 }
 0x119   :  { %v420_v7 = vrot.slane %v419_v21, 1  ;;  %v368_v0 = vadd.f32 %v367_v18, %v366_v15 }
 0x11b   :  { %v421_v22 = vadd.f32 %v420_v7, %v419_v21 }
 0x11d   :  { %v423_v23 = vsel %vm422_vm5, %v368_v0, %v421_v22 }
 0x11e   :  { %425 = vst.msk [vmem:[%s1441_s6] sm:$0x3] %vm424_vm6, %v423_v23 }

// kernel: bottleneck_forward.7
= control target key start
LH: loop header
LB: loop body
LE: loop exit
PB: predicated region body
PF: predicated region fallthrough
CT: control target
= control target key end

     0   :  { %vm198_vm0 = vcmask 261120   ;;  %s528_s0 = inlined_call_operand.vmem [shape: bf16[128,32], index: 0, kind: input, shape index: {}]   ;;  %s529_s1 = inlined_call_operand.vmem [shape: f32[2,32], index: 1, kind: input, shape index: {}]   ;;  %s530_s2 = inlined_call_operand.vmem [shape: bf16[128,32], index: 2, kind: input, shape index: {}]   ;;  %s531_s3 = inlined_call_operand.vmem [shape: f32[2,32], index: 3, kind: input, shape index: {}]   ;;  %s532_s4 = inlined_call_operand.hbm [shape: f32[128,32], index: 4, kind: output, shape index: {}]  }
   0x1   :  { %v236_v0 = vld [vmem:[%s528_s0] sm:$0xff]   ;;  %v299_v9 = vld [vmem:[%s528_s0 + $0x8] sm:$0xff]   ;;  %v300_v20 = vld [vmem:[%s528_s0 + $0x10] sm:$0xff]  }
   0x2   :  { %v374_v1 = vld [vmem:[%s529_s1] ss:$0 sm:$0xff]  ;;  %v237_v2 = vunpack.c.l.bf16 %v236_v0  ;;  %v238_v5 = vunpack.c.h.bf16 %v236_v0  ;;  %v387_v6 = vld [vmem:[%s529_s1 + $0x1] ss:$0 sm:$0xff]  ;;  %v306_v10 = vld [vmem:[%s530_s2 + $0x8] sm:$0xff]   ;;  %v241_v14 = vunpack.c.l.bf16 %v299_v9  ;;  %v242_v18 = vunpack.c.h.bf16 %v299_v9 }
   0x3   :  { %v268_v3 = vld [vmem:[%s530_s2] sm:$0xff]   ;;  %v273_v15 = vunpack.c.l.bf16 %v306_v10  ;;  %v274_v19 = vunpack.c.h.bf16 %v306_v10  ;;  %v307_v21 = vld [vmem:[%s530_s2 + $0x10] sm:$0xff]  }
   0x4   :  { %v382_v4 = vld [vmem:[%s531_s3] ss:$0 sm:$0xff]  ;;  %v269_v7 = vunpack.c.l.bf16 %v268_v3  ;;  %v270_v8 = vunpack.c.h.bf16 %v268_v3  ;;  %v55_v11 = vmul.f32 %v237_v2, %v374_v1  ;;  %v399_v12 = vld [vmem:[%s531_s3 + $0x1] ss:$0 sm:$0xff]  ;;  %v56_v13 = vmul.f32 %v238_v5, %v374_v1 }
   0x5   :  { %v57_v24 = vmul.f32 %v241_v14, %v374_v1  ;;  %v131_v25 = vmul.f32 %v273_v15, %v382_v4  ;;  %v58_v28 = vmul.f32 %v242_v18, %v374_v1  ;;  %v132_v29 = vmul.f32 %v274_v19, %v382_v4 }
   0x6   :  { %v129_v16 = vmul.f32 %v269_v7, %v382_v4  ;;  %v130_v17 = vmul.f32 %v270_v8, %v382_v4  ;;  %v76_v22 = vadd.f32 %v387_v6, %v55_v11  ;;  %v77_v23 = vadd.f32 %v387_v6, %v56_v13 }
   0x8   :  { %v150_v26 = vadd.f32 %v399_v12, %v129_v16  ;;  %v151_v27 = vadd.f32 %v399_v12, %v130_v17 }
   0x9   :  { %9 = vsyncpa [#allocation3], 0  ;;  %v78_v30 = vadd.f32 %v387_v6, %v57_v24  ;;  %v152_v31 = vadd.f32 %v399_v12, %v131_v25  ;;  %v245_v32 = vunpack.c.l.bf16 %v300_v20  ;;  %v277_v33 = vunpack.c.l.bf16 %v307_v21  ;;  %v301_v42 = vld [vmem:[%s528_s0 + $0x18] sm:$0xff]   ;;  %v302_v52 = vld [vmem:[%s528_s0 + $0x20] sm:$0xff]  }
   0xa   :  { %v166_v34 = vadd.f32 %v150_v26, %v76_v22  ;;  %v167_v35 = vadd.f32 %v151_v27, %v77_v23  ;;  %v79_v36 = vadd.f32 %v387_v6, %v58_v28  ;;  %v153_v37 = vadd.f32 %v399_v12, %v132_v29  ;;  %v308_v43 = vld [vmem:[%s530_s2 + $0x18] sm:$0xff]   ;;  %v309_v57 = vld [vmem:[%s530_s2 + $0x20] sm:$0xff]   ;;  %v303_v14 = vld [vmem:[%s528_s0 + $0x28] sm:$0xff]  }
   0xb   :  { %v168_v38 = vadd.f32 %v152_v31, %v78_v30  ;;  %v59_v39 = vmul.f32 %v245_v32, %v374_v1  ;;  %v133_v40 = vmul.f32 %v277_v33, %v382_v4  ;;  %v246_v41 = vunpack.c.h.bf16 %v300_v20  ;;  %v310_v19 = vld [vmem:[%s530_s2 + $0x28] sm:$0xff]   ;;  %v304_v32 = vld [vmem:[%s528_s0 + $0x30] sm:$0xff]  }
   0xc   :  { %v182_v44 = vmax.f32 %v166_v34, 0.0  ;;  %v183_v45 = vmax.f32 %v167_v35, 0.0  ;;  %v169_v46 = vadd.f32 %v153_v37, %v79_v36  ;;  %v278_v47 = vunpack.c.h.bf16 %v307_v21  ;;  %v311_v33 = vld [vmem:[%s530_s2 + $0x30] sm:$0xff]  }
   0xd   :  { %v184_v48 = vmax.f32 %v168_v38, 0.0  ;;  %v80_v49 = vadd.f32 %v387_v6, %v59_v39  ;;  %v154_v50 = vadd.f32 %v399_v12, %v133_v40  ;;  %v60_v51 = vmul.f32 %v246_v41, %v374_v1 }
   0xe   :  { %199 = vst.msk [vmem:[#allocation2] sm:$0xff] %vm198_vm0, %v182_v44  ;;  %200 = vst.msk [vmem:[#allocation2 + $0x8] sm:$0xff] %vm198_vm0, %v183_v45  ;;  %v185_v53 = vmax.f32 %v169_v46, 0.0  ;;  %v134_v54 = vmul.f32 %v278_v47, %v382_v4  ;;  %v249_v55 = vunpack.c.l.bf16 %v301_v42  ;;  %v281_v56 = vunpack.c.l.bf16 %v308_v43  ;;  %v305_v46 = vld [vmem:[%s528_s0 + $0x38] sm:$0xff]   ;;  %s340_s0 = smov [#allocation2]  }
   0xf   :  { %201 = vst.msk [vmem:[#allocation2 + $0x10] sm:$0xff] %vm198_vm0, %v184_v48  ;;  %v170_v58 = vadd.f32 %v154_v50, %v80_v49  ;;  %v81_v59 = vadd.f32 %v387_v6, %v60_v51  ;;  %v250_v60 = vunpack.c.h.bf16 %v301_v42  ;;  %v282_v61 = vunpack.c.h.bf16 %v308_v43 }
  0x10   :  { %202 = vst.msk [vmem:[#allocation2 + $0x18] sm:$0xff] %vm198_vm0, %v185_v53  ;;  %v155_v62 = vadd.f32 %v399_v12, %v134_v54  ;;  %v61_v63 = vmul.f32 %v249_v55, %v374_v1  ;;  %v135_v0 = vmul.f32 %v281_v56, %v382_v4  ;;  %v253_v2 = vunpack.c.l.bf16 %v302_v52  ;;  %v312_v55 = vld [vmem:[%s530_s2 + $0x38] sm:$0xff]   ;;  %s220_s2 = sshll.u32 %s340_s0, 4  ;;  %s221_s2 = int_to_ptr.vmem [resolvable:$true] %s220_s2 }
  0x11   :  { %v186_v3 = vmax.f32 %v170_v58, 0.0  ;;  %v62_v5 = vmul.f32 %v250_v60, %v374_v1  ;;  %v136_v7 = vmul.f32 %v282_v61, %v382_v4  ;;  %v285_v8 = vunpack.c.l.bf16 %v309_v57  ;;  %s316_s27 = scalar_lea.vmem %s221_s2, 2048  ;;  %p321_p1 = scmp.lt.s32.totalorder %s221_s2, %s221_s2 }
  0x12   :  { %v171_v9 = vadd.f32 %v155_v62, %v81_v59  ;;  %v82_v10 = vadd.f32 %v387_v6, %v61_v63  ;;  %v156_v11 = vadd.f32 %v399_v12, %v135_v0  ;;  %v63_v13 = vmul.f32 %v253_v2, %v374_v1  ;;  %p317_p0 = scmp.ne.s32.totalorder %s221_s2, %s316_s27  ;;  %p322_p2 = scmp.lt.s32.totalorder %s316_s27, %s316_s27 }
  0x13   :  { %203 = vst.msk [vmem:[#allocation2 + $0x20] sm:$0xff] %vm198_vm0, %v186_v3  ;;  %v83_v15 = vadd.f32 %v387_v6, %v62_v5  ;;  %v157_v16 = vadd.f32 %v399_v12, %v136_v7  ;;  %v137_v17 = vmul.f32 %v285_v8, %v382_v4  ;;  %v254_v18 = vunpack.c.h.bf16 %v302_v52 }
  0x14   :  { %v187_v20 = vmax.f32 %v171_v9, 0.0  ;;  %v172_v21 = vadd.f32 %v156_v11, %v82_v10  ;;  %v84_v22 = vadd.f32 %v387_v6, %v63_v13  ;;  %v286_v23 = vunpack.c.h.bf16 %v309_v57  ;;  %p323_p3 = por %p322_p2, %p321_p1 }
  0x15   :  { %v173_v24 = vadd.f32 %v157_v16, %v83_v15  ;;  %v158_v25 = vadd.f32 %v399_v12, %v137_v17  ;;  %v64_v26 = vmul.f32 %v254_v18, %v374_v1  ;;  %v257_v27 = vunpack.c.l.bf16 %v303_v14 }
  0x16   :  { %204 = vst.msk [vmem:[#allocation2 + $0x28] sm:$0xff] %vm198_vm0, %v187_v20  ;;  %v188_v28 = vmax.f32 %v172_v21, 0.0  ;;  %v138_v29 = vmul.f32 %v286_v23, %v382_v4  ;;  %v289_v30 = vunpack.c.l.bf16 %v310_v19  ;;  %v258_v31 = vunpack.c.h.bf16 %v303_v14  ;;  %p324_p4 = pnand %p323_p3, %p317_p0 }
  0x17   :  { %v189_v34 = vmax.f32 %v173_v24, 0.0  ;;  %v174_v35 = vadd.f32 %v158_v25, %v84_v22  ;;  %v85_v36 = vadd.f32 %v387_v6, %v64_v26  ;;  %v65_v37 = vmul.f32 %v257_v27, %v374_v1 }
  0x18   :  { %205 = vst.msk [vmem:[#allocation2 + $0x30] sm:$0xff] %vm198_vm0, %v188_v28  ;;  %v159_v38 = vadd.f32 %v399_v12, %v138_v29  ;;  %v139_v39 = vmul.f32 %v289_v30, %v382_v4  ;;  %v66_v40 = vmul.f32 %v258_v31, %v374_v1  ;;  %v290_v41 = vunpack.c.h.bf16 %v310_v19 }
  0x19   :  { %206 = vst.msk [vmem:[#allocation2 + $0x38] sm:$0xff] %vm198_vm0, %v189_v34  ;;  %v190_v42 = vmax.f32 %v174_v35, 0.0  ;;  %v86_v43 = vadd.f32 %v387_v6, %v65_v37  ;;  %v261_v44 = vunpack.c.l.bf16 %v304_v32  ;;  %v293_v45 = vunpack.c.l.bf16 %v311_v33 }
  0x1a   :  { %v175_v47 = vadd.f32 %v159_v38, %v85_v36  ;;  %v160_v48 = vadd.f32 %v399_v12, %v139_v39  ;;  %v87_v49 = vadd.f32 %v387_v6, %v66_v40  ;;  %v140_v50 = vmul.f32 %v290_v41, %v382_v4 }
  0x1b   :  { %207 = vst.msk [vmem:[#allocation2 + $0x40] sm:$0xff] %vm198_vm0, %v190_v42  ;;  %v67_v51 = vmul.f32 %v261_v44, %v374_v1  ;;  %v141_v52 = vmul.f32 %v293_v45, %v382_v4  ;;  %v262_v53 = vunpack.c.h.bf16 %v304_v32  ;;  %v294_v54 = vunpack.c.h.bf16 %v311_v33 }
  0x1c   :  { %v191_v56 = vmax.f32 %v175_v47, 0.0  ;;  %v176_v57 = vadd.f32 %v160_v48, %v86_v43  ;;  %v161_v58 = vadd.f32 %v399_v12, %v140_v50  ;;  %v265_v59 = vunpack.c.l.bf16 %v305_v46 }
  0x1d   :  { %v88_v60 = vadd.f32 %v387_v6, %v67_v51  ;;  %v162_v61 = vadd.f32 %v399_v12, %v141_v52  ;;  %v68_v62 = vmul.f32 %v262_v53, %v374_v1  ;;  %v142_v63 = vmul.f32 %v294_v54, %v382_v4 }
  0x1e   :  { %208 = vst.msk [vmem:[#allocation2 + $0x48] sm:$0xff] %vm198_vm0, %v191_v56  ;;  %v192_v0 = vmax.f32 %v176_v57, 0.0  ;;  %v177_v2 = vadd.f32 %v161_v58, %v87_v49  ;;  %v69_v3 = vmul.f32 %v265_v59, %v374_v1  ;;  %v297_v5 = vunpack.c.l.bf16 %v312_v55 }
  0x1f   :  { %v178_v7 = vadd.f32 %v162_v61, %v88_v60  ;;  %v89_v8 = vadd.f32 %v387_v6, %v68_v62  ;;  %v163_v9 = vadd.f32 %v399_v12, %v142_v63  ;;  %v266_v10 = vunpack.c.h.bf16 %v305_v46 }
  0x20   :  { %209 = vst.msk [vmem:[#allocation2 + $0x50] sm:$0xff] %vm198_vm0, %v192_v0  ;;  %v193_v11 = vmax.f32 %v177_v2, 0.0  ;;  %v90_v13 = vadd.f32 %v387_v6, %v69_v3  ;;  %v143_v14 = vmul.f32 %v297_v5, %v382_v4  ;;  %v298_v15 = vunpack.c.h.bf16 %v312_v55 }
  0x21   :  { %v194_v16 = vmax.f32 %v178_v7, 0.0  ;;  %v179_v17 = vadd.f32 %v163_v9, %v89_v8  ;;  %v70_v18 = vmul.f32 %v266_v10, %v374_v1 }
  0x22   :  { %210 = vst.msk [vmem:[#allocation2 + $0x58] sm:$0xff] %vm198_vm0, %v193_v11  ;;  %v164_v19 = vadd.f32 %v399_v12, %v143_v14  ;;  %v144_v20 = vmul.f32 %v298_v15, %v382_v4 }
  0x23   :  { %211 = vst.msk [vmem:[#allocation2 + $0x60] sm:$0xff] %vm198_vm0, %v194_v16  ;;  %v195_v21 = vmax.f32 %v179_v17, 0.0  ;;  %v91_v22 = vadd.f32 %v387_v6, %v70_v18 }
  0x24   :  { %v180_v23 = vadd.f32 %v164_v19, %v90_v13  ;;  %v165_v24 = vadd.f32 %v399_v12, %v144_v20 }
  0x25   :  { %212 = vst.msk [vmem:[#allocation2 + $0x68] sm:$0xff] %vm198_vm0, %v195_v21 }
  0x26   :  { %v196_v25 = vmax.f32 %v180_v23, 0.0  ;;  %v181_v1 = vadd.f32 %v165_v24, %v91_v22 }
  0x28   :  { %213 = vst.msk [vmem:[#allocation2 + $0x70] sm:$0xff] %vm198_vm0, %v196_v25  ;;  %v197_v26 = vmax.f32 %v181_v1, 0.0 }
  0x2a   :  { %214 = vst.msk [vmem:[#allocation2 + $0x78] sm:$0xff] %vm198_vm0, %v197_v26 }
  0x2b   :  { %327 = shalt.err (!%p324_p4)
}
  0x2c   :  { %s328_s30 = scalar_lea.hbm %s532_s4, 2048 }
  0x2d   :  { %p329_p5 = scmp.ne.s32.totalorder %s532_s4, %s328_s30  ;;  %p332_p6 = scmp.lt.u32.totalorder %s328_s30, %s532_s4 }
  0x2f   :  { %p334_p7 = pnand %p332_p6, %p329_p5 }
  0x31   :  { %337 = shalt.err (!%p334_p7)
}
  0x32   :  { %s341_s3 = smov 128   ;;  %s342_s8 = smov 8  }
  0x33   :  { %226 = dma.vmem_to_hbm [thread:$0]  %s221_s2, 2048, %s532_s4, [#allocation3], %s341_s3, %s341_s3, %s342_s8  }
  0x34   :  { %338 = dma.done.wait [#allocation3], 2048  }
  0x35   :  { %339 = vsyncadd [#allocation3], 4294965248 }
  0x36   :  { %230 = vsyncpa [#allocation3], 1 }

</bundles_post_ra>
